<compile_context>
chip_gen: v5e
topology: v5e:2x2
jax: 0.10.0
libtpu: 0.0.40
codegen_flags: <defaults>
</compile_context>

<pallas_src>
import jax
import jax.numpy as jnp
from jax.experimental import pallas as pl
from jax.experimental.pallas import tpu as pltpu

KH = KW = 3
LANE = 128


def encoder_kernel(x_ref, w_ref, b_ref, o_ref):
    """Fused Conv3x3(pad=1) + bias + ReLU + global-avg-pool for one batch element.

    x_ref: (1, H+2, W+2, Cin)      padded NHWC input, bf16
    w_ref: (KH*KW, Cin, Cout_pad)  per-tap weight slices, bf16
    b_ref: (1, Cout_pad)           bias, f32
    o_ref: (1, 1, Cout_pad)        pooled features, f32 (lane-dense 128 lanes)
    """
    Hp, Wp, Cin = x_ref.shape[1], x_ref.shape[2], x_ref.shape[3]
    H, W = Hp - 2, Wp - 2
    HW = H * W
    Cout_pad = o_ref.shape[2]

    # Convolution as 9 accumulated MXU dots over VMEM-resident tap slices.
    acc = jnp.zeros((HW, Cout_pad), dtype=jnp.float32)
    for dy in range(KH):
        for dx in range(KW):
            xs = x_ref[0, dy:dy + H, dx:dx + W, :].reshape(HW, Cin)      # bf16
            acc = acc + jnp.dot(xs, w_ref[dy * KW + dx],
                                preferred_element_type=jnp.float32)      # f32 acc

    # Bias + ReLU in f32, then AdaptiveAvgPool2d(1) (sum * 1/HW keeps divide off
    # the critical path).
    y = jnp.maximum(acc + b_ref[...], 0.0)                               # (HW, Cout_pad)
    o_ref[0] = jnp.sum(y, axis=0, keepdims=True) * (1.0 / HW)            # (1, Cout_pad)


def encoder_forward(x_nchw, w_conv, b_conv):
    """x_nchw: (N, Cin, H, W) f32. Returns (N, Cout) f32 pooled features."""
    N, Cin, H, W = x_nchw.shape
    Cout = w_conv.shape[0]
    assert w_conv.shape == (Cout, Cin, KH, KW)
    Cout_pad = ((Cout + LANE - 1) // LANE) * LANE

    # NCHW -> NHWC, zero pad of 1 (Conv2d padding=1); bf16 operands for the MXU.
    x_nhwc = jnp.transpose(x_nchw, (0, 2, 3, 1))
    xp = jnp.pad(x_nhwc, ((0, 0), (1, 1), (1, 1), (0, 0))).astype(jnp.bfloat16)

    # (Cout, Cin, KH, KW) -> (KH, KW, Cin, Cout) -> (KH*KW, Cin, Cout_pad), bf16.
    w_t = jnp.transpose(w_conv, (2, 3, 1, 0)).reshape(KH * KW, Cin, Cout)
    w_t = jnp.pad(w_t, ((0, 0), (0, 0), (0, Cout_pad - Cout))).astype(jnp.bfloat16)
    b_p = jnp.pad(b_conv.reshape(1, Cout),
                  ((0, 0), (0, Cout_pad - Cout))).astype(jnp.float32)

    out = pl.pallas_call(
        encoder_kernel,
        out_shape=jax.ShapeDtypeStruct((N, 1, Cout_pad), jnp.float32),
        grid_spec=pltpu.PrefetchScalarGridSpec(
            num_scalar_prefetch=0,
            grid=(N,),
            in_specs=[
                pl.BlockSpec((1, H + 2, W + 2, Cin), lambda i: (i, 0, 0, 0)),
                pl.BlockSpec((KH * KW, Cin, Cout_pad), lambda i: (0, 0, 0)),
                pl.BlockSpec((1, Cout_pad), lambda i: (0, 0)),
            ],
            out_specs=pl.BlockSpec((1, 1, Cout_pad), lambda i: (i, 0, 0)),
        ),
        compiler_params=pltpu.CompilerParams(
            dimension_semantics=("parallel",)),
    )(xp, w_t, b_p)

    # Encoder.forward: feats.squeeze(3).squeeze(2) -> (N, Cout); drop lane padding.
    return out.reshape(N, Cout_pad)[:, :Cout]


if __name__ == "__main__":
    # Small shapes consistent with the module: batch=2, channels=4, spatial=16.
    N, Cin, H, W = 2, 4, 16, 16
    Cout = 32

    key = jax.random.PRNGKey(0)
    kx, kw, kb = jax.random.split(key, 3)

    x = jax.random.normal(kx, (N, Cin, H, W), dtype=jnp.float32)
    # Deterministic synthetic params (shapes match nn.Conv2d(Cin, Cout, 3, padding=1)).
    w_conv = jax.random.normal(kw, (Cout, Cin, KH, KW), dtype=jnp.float32) * 0.1
    b_conv = jax.random.normal(kb, (Cout,), dtype=jnp.float32) * 0.1

    feats = encoder_forward(x, w_conv, b_conv)
    jax.block_until_ready(feats)
    assert feats.shape == (N, Cout)

    # f32 reference: Conv3x3(pad=1) -> ReLU -> AdaptiveAvgPool2d(1) -> squeeze.
    xp = jnp.pad(jnp.transpose(x, (0, 2, 3, 1)), ((0, 0), (1, 1), (1, 1), (0, 0)))
    taps = [xp[:, dy:dy + H, dx:dx + W, :] for dy in range(KH) for dx in range(KW)]
    patches = jnp.stack(taps, axis=3).reshape(N, H * W, KH * KW * Cin)
    w_mat = jnp.transpose(w_conv, (2, 3, 1, 0)).reshape(KH * KW * Cin, Cout)
    ref = jnp.einsum('npk,kc->npc', patches, w_mat,
                     precision=jax.lax.Precision.HIGHEST) + b_conv
    ref = jnp.maximum(ref, 0.0).mean(axis=1)

    err = float(jnp.max(jnp.abs(feats - ref)))
    assert err < 5e-2, f"max abs err vs f32 reference: {err}"  # bf16 operands -> relaxed tol
    print("KERNEL_OK")
</pallas_src>

<mosaic_0001>
module attributes {stable_mosaic.version = 11 : i64} {
  func.func @encoder_kernel(%arg0: i32, %arg1: memref<1x18x18x4xbf16, #tpu.memory_space<vmem>>, %arg2: memref<9x4x128xbf16, #tpu.memory_space<vmem>>, %arg3: memref<1x128xf32, #tpu.memory_space<vmem>>, %arg4: memref<1x1x128xf32, #tpu.memory_space<vmem>>) attributes {dimension_semantics = [#tpu.dimension_semantics<parallel>], iteration_bounds = array<i64: 2>, scalar_prefetch = 0 : i64, scratch_operands = 0 : i64, tpu.core_type = #tpu.core_type<tc>, window_params = [{transform_indices = @transform_0, window_bounds = array<i64: 1, 18, 18, 4>}, {pipeline_mode = #tpu.pipeline_mode<synchronous>, transform_indices = @transform_1, window_bounds = array<i64: 9, 4, 128>}, {pipeline_mode = #tpu.pipeline_mode<synchronous>, transform_indices = @transform_2, window_bounds = array<i64: 1, 128>}, {transform_indices = @transform_3, window_bounds = array<i64: 1, 1, 128>}]} {
    %cst = arith.constant 0.000000e+00 : f32
    %0 = vector.broadcast %cst : f32 to vector<256x128xf32>
    %c0 = arith.constant 0 : index
    %c0_0 = arith.constant 0 : index
    %c0_1 = arith.constant 0 : index
    %c0_2 = arith.constant 0 : index
    %1 = vector.load %arg1[%c0, %c0_0, %c0_1, %c0_2] : memref<1x18x18x4xbf16, #tpu.memory_space<vmem>>, vector<1x16x16x4xbf16>
    %2 = vector.shape_cast %1 : vector<1x16x16x4xbf16> to vector<16x16x4xbf16>
    %3 = vector.shape_cast %2 : vector<16x16x4xbf16> to vector<256x4xbf16>
    %c0_3 = arith.constant 0 : index
    %c0_4 = arith.constant 0 : index
    %c0_5 = arith.constant 0 : index
    %4 = vector.load %arg2[%c0_3, %c0_4, %c0_5] : memref<9x4x128xbf16, #tpu.memory_space<vmem>>, vector<1x4x128xbf16>
    %5 = vector.shape_cast %4 : vector<1x4x128xbf16> to vector<4x128xbf16>
    %cst_6 = arith.constant dense<0.000000e+00> : vector<256x128xf32>
    %6 = tpu.matmul %3, %5, %cst_6 {dimension_numbers = #tpu.dot_dimension_numbers<[1], [0], [0], [1], [0, 0, 1, 1], [], []>} : vector<256x4xbf16>, vector<4x128xbf16>, vector<256x128xf32> -> vector<256x128xf32>
    %7 = arith.addf %0, %6 : vector<256x128xf32>
    %c0_7 = arith.constant 0 : index
    %c0_8 = arith.constant 0 : index
    %c1 = arith.constant 1 : index
    %c0_9 = arith.constant 0 : index
    %8 = vector.load %arg1[%c0_7, %c0_8, %c1, %c0_9] : memref<1x18x18x4xbf16, #tpu.memory_space<vmem>>, vector<1x16x16x4xbf16>
    %9 = vector.shape_cast %8 : vector<1x16x16x4xbf16> to vector<16x16x4xbf16>
    %10 = vector.shape_cast %9 : vector<16x16x4xbf16> to vector<256x4xbf16>
    %c1_10 = arith.constant 1 : index
    %c0_11 = arith.constant 0 : index
    %c0_12 = arith.constant 0 : index
    %11 = vector.load %arg2[%c1_10, %c0_11, %c0_12] : memref<9x4x128xbf16, #tpu.memory_space<vmem>>, vector<1x4x128xbf16>
    %12 = vector.shape_cast %11 : vector<1x4x128xbf16> to vector<4x128xbf16>
    %cst_13 = arith.constant dense<0.000000e+00> : vector<256x128xf32>
    %13 = tpu.matmul %10, %12, %cst_13 {dimension_numbers = #tpu.dot_dimension_numbers<[1], [0], [0], [1], [0, 0, 1, 1], [], []>} : vector<256x4xbf16>, vector<4x128xbf16>, vector<256x128xf32> -> vector<256x128xf32>
    %14 = arith.addf %7, %13 : vector<256x128xf32>
    %c0_14 = arith.constant 0 : index
    %c0_15 = arith.constant 0 : index
    %c2 = arith.constant 2 : index
    %c0_16 = arith.constant 0 : index
    %15 = vector.load %arg1[%c0_14, %c0_15, %c2, %c0_16] : memref<1x18x18x4xbf16, #tpu.memory_space<vmem>>, vector<1x16x16x4xbf16>
    %16 = vector.shape_cast %15 : vector<1x16x16x4xbf16> to vector<16x16x4xbf16>
    %17 = vector.shape_cast %16 : vector<16x16x4xbf16> to vector<256x4xbf16>
    %c2_17 = arith.constant 2 : index
    %c0_18 = arith.constant 0 : index
    %c0_19 = arith.constant 0 : index
    %18 = vector.load %arg2[%c2_17, %c0_18, %c0_19] : memref<9x4x128xbf16, #tpu.memory_space<vmem>>, vector<1x4x128xbf16>
    %19 = vector.shape_cast %18 : vector<1x4x128xbf16> to vector<4x128xbf16>
    %cst_20 = arith.constant dense<0.000000e+00> : vector<256x128xf32>
    %20 = tpu.matmul %17, %19, %cst_20 {dimension_numbers = #tpu.dot_dimension_numbers<[1], [0], [0], [1], [0, 0, 1, 1], [], []>} : vector<256x4xbf16>, vector<4x128xbf16>, vector<256x128xf32> -> vector<256x128xf32>
    %21 = arith.addf %14, %20 : vector<256x128xf32>
    %c0_21 = arith.constant 0 : index
    %c1_22 = arith.constant 1 : index
    %c0_23 = arith.constant 0 : index
    %c0_24 = arith.constant 0 : index
    %22 = vector.load %arg1[%c0_21, %c1_22, %c0_23, %c0_24] : memref<1x18x18x4xbf16, #tpu.memory_space<vmem>>, vector<1x16x16x4xbf16>
    %23 = vector.shape_cast %22 : vector<1x16x16x4xbf16> to vector<16x16x4xbf16>
    %24 = vector.shape_cast %23 : vector<16x16x4xbf16> to vector<256x4xbf16>
    %c3 = arith.constant 3 : index
    %c0_25 = arith.constant 0 : index
    %c0_26 = arith.constant 0 : index
    %25 = vector.load %arg2[%c3, %c0_25, %c0_26] : memref<9x4x128xbf16, #tpu.memory_space<vmem>>, vector<1x4x128xbf16>
    %26 = vector.shape_cast %25 : vector<1x4x128xbf16> to vector<4x128xbf16>
    %cst_27 = arith.constant dense<0.000000e+00> : vector<256x128xf32>
    %27 = tpu.matmul %24, %26, %cst_27 {dimension_numbers = #tpu.dot_dimension_numbers<[1], [0], [0], [1], [0, 0, 1, 1], [], []>} : vector<256x4xbf16>, vector<4x128xbf16>, vector<256x128xf32> -> vector<256x128xf32>
    %28 = arith.addf %21, %27 : vector<256x128xf32>
    %c0_28 = arith.constant 0 : index
    %c1_29 = arith.constant 1 : index
    %c1_30 = arith.constant 1 : index
    %c0_31 = arith.constant 0 : index
    %29 = vector.load %arg1[%c0_28, %c1_29, %c1_30, %c0_31] : memref<1x18x18x4xbf16, #tpu.memory_space<vmem>>, vector<1x16x16x4xbf16>
    %30 = vector.shape_cast %29 : vector<1x16x16x4xbf16> to vector<16x16x4xbf16>
    %31 = vector.shape_cast %30 : vector<16x16x4xbf16> to vector<256x4xbf16>
    %c4 = arith.constant 4 : index
    %c0_32 = arith.constant 0 : index
    %c0_33 = arith.constant 0 : index
    %32 = vector.load %arg2[%c4, %c0_32, %c0_33] : memref<9x4x128xbf16, #tpu.memory_space<vmem>>, vector<1x4x128xbf16>
    %33 = vector.shape_cast %32 : vector<1x4x128xbf16> to vector<4x128xbf16>
    %cst_34 = arith.constant dense<0.000000e+00> : vector<256x128xf32>
    %34 = tpu.matmul %31, %33, %cst_34 {dimension_numbers = #tpu.dot_dimension_numbers<[1], [0], [0], [1], [0, 0, 1, 1], [], []>} : vector<256x4xbf16>, vector<4x128xbf16>, vector<256x128xf32> -> vector<256x128xf32>
    %35 = arith.addf %28, %34 : vector<256x128xf32>
    %c0_35 = arith.constant 0 : index
    %c1_36 = arith.constant 1 : index
    %c2_37 = arith.constant 2 : index
    %c0_38 = arith.constant 0 : index
    %36 = vector.load %arg1[%c0_35, %c1_36, %c2_37, %c0_38] : memref<1x18x18x4xbf16, #tpu.memory_space<vmem>>, vector<1x16x16x4xbf16>
    %37 = vector.shape_cast %36 : vector<1x16x16x4xbf16> to vector<16x16x4xbf16>
    %38 = vector.shape_cast %37 : vector<16x16x4xbf16> to vector<256x4xbf16>
    %c5 = arith.constant 5 : index
    %c0_39 = arith.constant 0 : index
    %c0_40 = arith.constant 0 : index
    %39 = vector.load %arg2[%c5, %c0_39, %c0_40] : memref<9x4x128xbf16, #tpu.memory_space<vmem>>, vector<1x4x128xbf16>
    %40 = vector.shape_cast %39 : vector<1x4x128xbf16> to vector<4x128xbf16>
    %cst_41 = arith.constant dense<0.000000e+00> : vector<256x128xf32>
    %41 = tpu.matmul %38, %40, %cst_41 {dimension_numbers = #tpu.dot_dimension_numbers<[1], [0], [0], [1], [0, 0, 1, 1], [], []>} : vector<256x4xbf16>, vector<4x128xbf16>, vector<256x128xf32> -> vector<256x128xf32>
    %42 = arith.addf %35, %41 : vector<256x128xf32>
    %c0_42 = arith.constant 0 : index
    %c2_43 = arith.constant 2 : index
    %c0_44 = arith.constant 0 : index
    %c0_45 = arith.constant 0 : index
    %43 = vector.load %arg1[%c0_42, %c2_43, %c0_44, %c0_45] : memref<1x18x18x4xbf16, #tpu.memory_space<vmem>>, vector<1x16x16x4xbf16>
    %44 = vector.shape_cast %43 : vector<1x16x16x4xbf16> to vector<16x16x4xbf16>
    %45 = vector.shape_cast %44 : vector<16x16x4xbf16> to vector<256x4xbf16>
    %c6 = arith.constant 6 : index
    %c0_46 = arith.constant 0 : index
    %c0_47 = arith.constant 0 : index
    %46 = vector.load %arg2[%c6, %c0_46, %c0_47] : memref<9x4x128xbf16, #tpu.memory_space<vmem>>, vector<1x4x128xbf16>
    %47 = vector.shape_cast %46 : vector<1x4x128xbf16> to vector<4x128xbf16>
    %cst_48 = arith.constant dense<0.000000e+00> : vector<256x128xf32>
    %48 = tpu.matmul %45, %47, %cst_48 {dimension_numbers = #tpu.dot_dimension_numbers<[1], [0], [0], [1], [0, 0, 1, 1], [], []>} : vector<256x4xbf16>, vector<4x128xbf16>, vector<256x128xf32> -> vector<256x128xf32>
    %49 = arith.addf %42, %48 : vector<256x128xf32>
    %c0_49 = arith.constant 0 : index
    %c2_50 = arith.constant 2 : index
    %c1_51 = arith.constant 1 : index
    %c0_52 = arith.constant 0 : index
    %50 = vector.load %arg1[%c0_49, %c2_50, %c1_51, %c0_52] : memref<1x18x18x4xbf16, #tpu.memory_space<vmem>>, vector<1x16x16x4xbf16>
    %51 = vector.shape_cast %50 : vector<1x16x16x4xbf16> to vector<16x16x4xbf16>
    %52 = vector.shape_cast %51 : vector<16x16x4xbf16> to vector<256x4xbf16>
    %c7 = arith.constant 7 : index
    %c0_53 = arith.constant 0 : index
    %c0_54 = arith.constant 0 : index
    %53 = vector.load %arg2[%c7, %c0_53, %c0_54] : memref<9x4x128xbf16, #tpu.memory_space<vmem>>, vector<1x4x128xbf16>
    %54 = vector.shape_cast %53 : vector<1x4x128xbf16> to vector<4x128xbf16>
    %cst_55 = arith.constant dense<0.000000e+00> : vector<256x128xf32>
    %55 = tpu.matmul %52, %54, %cst_55 {dimension_numbers = #tpu.dot_dimension_numbers<[1], [0], [0], [1], [0, 0, 1, 1], [], []>} : vector<256x4xbf16>, vector<4x128xbf16>, vector<256x128xf32> -> vector<256x128xf32>
    %56 = arith.addf %49, %55 : vector<256x128xf32>
    %c0_56 = arith.constant 0 : index
    %c2_57 = arith.constant 2 : index
    %c2_58 = arith.constant 2 : index
    %c0_59 = arith.constant 0 : index
    %57 = vector.load %arg1[%c0_56, %c2_57, %c2_58, %c0_59] : memref<1x18x18x4xbf16, #tpu.memory_space<vmem>>, vector<1x16x16x4xbf16>
    %58 = vector.shape_cast %57 : vector<1x16x16x4xbf16> to vector<16x16x4xbf16>
    %59 = vector.shape_cast %58 : vector<16x16x4xbf16> to vector<256x4xbf16>
    %c8 = arith.constant 8 : index
    %c0_60 = arith.constant 0 : index
    %c0_61 = arith.constant 0 : index
    %60 = vector.load %arg2[%c8, %c0_60, %c0_61] : memref<9x4x128xbf16, #tpu.memory_space<vmem>>, vector<1x4x128xbf16>
    %61 = vector.shape_cast %60 : vector<1x4x128xbf16> to vector<4x128xbf16>
    %cst_62 = arith.constant dense<0.000000e+00> : vector<256x128xf32>
    %62 = tpu.matmul %59, %61, %cst_62 {dimension_numbers = #tpu.dot_dimension_numbers<[1], [0], [0], [1], [0, 0, 1, 1], [], []>} : vector<256x4xbf16>, vector<4x128xbf16>, vector<256x128xf32> -> vector<256x128xf32>
    %63 = arith.addf %56, %62 : vector<256x128xf32>
    %c0_63 = arith.constant 0 : index
    %c0_64 = arith.constant 0 : index
    %64 = vector.load %arg3[%c0_63, %c0_64] : memref<1x128xf32, #tpu.memory_space<vmem>>, vector<1x128xf32>
    %65 = vector.broadcast %64 : vector<1x128xf32> to vector<256x128xf32>
    %66 = arith.addf %63, %65 : vector<256x128xf32>
    %cst_65 = arith.constant 0.000000e+00 : f32
    %67 = vector.broadcast %cst_65 : f32 to vector<256x128xf32>
    %68 = arith.maximumf %66, %67 : vector<256x128xf32>
    %cst_66 = arith.constant dense<0.000000e+00> : vector<128xf32>
    %69 = vector.multi_reduction <add>, %68, %cst_66 [0] : vector<256x128xf32> to vector<128xf32>
    %70 = vector.shape_cast %69 : vector<128xf32> to vector<1x128xf32>
    %cst_67 = arith.constant 3.906250e-03 : f32
    %71 = vector.broadcast %cst_67 : f32 to vector<1x128xf32>
    %72 = arith.mulf %70, %71 : vector<1x128xf32>
    %c0_68 = arith.constant 0 : index
    %c0_69 = arith.constant 0 : index
    %c0_70 = arith.constant 0 : index
    %73 = vector.load %arg4[%c0_68, %c0_69, %c0_70] : memref<1x1x128xf32, #tpu.memory_space<vmem>>, vector<1x1x128xf32>
    %74 = vector.shape_cast %73 : vector<1x1x128xf32> to vector<1x128xf32>
    %75 = vector.shape_cast %72 : vector<1x128xf32> to vector<1x1x128xf32>
    tpu.vector_store %arg4[%c0_68, %c0_69, %c0_70], %75 {strides = array<i32>} : memref<1x1x128xf32, #tpu.memory_space<vmem>>, vector<1x1x128xf32>,
    return
  }
  func.func @transform_0(%arg0: i32) -> (i32, i32, i32, i32) {
    %c0_i32 = arith.constant 0 : i32
    %c0_i32_0 = arith.constant 0 : i32
    %c0_i32_1 = arith.constant 0 : i32
    %c0_i32_2 = arith.constant 0 : i32
    return %arg0, %c0_i32, %c0_i32_0, %c0_i32_1 : i32, i32, i32, i32
  }
  func.func @transform_1(%arg0: i32) -> (i32, i32, i32) {
    %c0_i32 = arith.constant 0 : i32
    %c0_i32_0 = arith.constant 0 : i32
    %c0_i32_1 = arith.constant 0 : i32
    %c0_i32_2 = arith.constant 0 : i32
    return %c0_i32, %c0_i32_0, %c0_i32_1 : i32, i32, i32
  }
  func.func @transform_2(%arg0: i32) -> (i32, i32) {
    %c0_i32 = arith.constant 0 : i32
    %c0_i32_0 = arith.constant 0 : i32
    %c0_i32_1 = arith.constant 0 : i32
    return %c0_i32, %c0_i32_0 : i32, i32
  }
  func.func @transform_3(%arg0: i32) -> (i32, i32, i32) {
    %c0_i32 = arith.constant 0 : i32
    %c0_i32_0 = arith.constant 0 : i32
    %c0_i32_1 = arith.constant 0 : i32
    return %arg0, %c0_i32, %c0_i32_0 : i32, i32, i32
  }
}

</mosaic_0001>

<bundles_post_ra>
// kernel: tpu_custom_call.1
= control target key start
LH: loop header
LB: loop body
LE: loop exit
PB: predicated region body
PF: predicated region fallthrough
CT: control target
= control target key end

     0   :  { %8 = vsyncpa [#allocation3], 0  ;;  %s6516_s0 = inlined_call_operand.vmem [shape: bf16[2,18,18,4], index: 0, kind: input, shape index: {}]   ;;  %s6517_s1 = inlined_call_operand.vmem [shape: bf16[9,4,128], index: 1, kind: input, shape index: {}]   ;;  %s6518_s2 = inlined_call_operand.vmem [shape: f32[1,128], index: 2, kind: input, shape index: {}]   ;;  %s6519_s3 = inlined_call_operand.hbm [shape: f32[2,1,128], index: 3, kind: output, shape index: {}]  }
   0x1   :  { %10 = vsyncpa [#allocation3 + $0x1], 0  ;;  %s5073_s12 = smov 0   ;;  %s5075_s13 = smov 0  }
   0x2   :  { %s5077_s14 = smov 0   ;;  %s5079_s15 = smov 0  }
   0x3 LB: > { %s5094_s16 = sadd.s32 4294967295, %s5051_s15   ;;  %s4255_s17 = sadd.s32 4294967294, %s5051_s15   ;;  %s5051_s15 = sphi %s5079_s15, %s6535_s15   ;;  %s5047_s14 = sphi %s5077_s14, %s6534_s14   ;;  %s5043_s13 = sphi %s5075_s13, %s6533_s13   ;;  %s5039_s12 = sphi %s5073_s12, %s6532_s12  }
   0x4   : > { %s5098_s18 = sadd.s32 1, %s5051_s15   ;;  %s91_s19 = sadd.s32 1, %s5047_s14 }
   0x5   : > { %s88_s20 = ssub.s32 %s5051_s15, %s5098_s18  ;;  %p101_p0 = scmp.ne.s32.totalorder %s5047_s14, %s5043_s13 }
   0x6   : > { %p89_p1 = scmp.eq.s32.totalorder %s88_s20, 0  ;;  %p102_p2 = scmp.eq.s32.totalorder %s5094_s16, 1 }
   0x7   : > { %p107_p3 = scmp.ne.s32.totalorder %s5043_s13, %s5039_s12  ;;  %p108_p4 = scmp.eq.s32.totalorder %s4255_s17, 1 }
   0x8   : > { %s5109_s21 = scalar_select %p89_p1, %s5047_s14, %s91_s19  }
   0x9   : > { %p5111_p5 = por %p102_p2, %p101_p0  ;;  %p5115_p6 = por %p108_p4, %p107_p3 }
   0xa   : > { %p4258_p7 = scmp.ge.s32.totalorder %s5051_s15, 1  ;;  %p140_p8 = scmp.lt.s32.totalorder %s5051_s15, 3 }
   0xc   : > { %p141_p9 = pnand %p4258_p7, %p140_p8 }
   0xe   : > { %144 = sbr.rel (%p141_p9) target bundleno = 785 (0x311), region = 32 }
  0x13   : > { %v4260_v0 = vld [vmem:[%s6517_s1 + $0x2] sm:$0x3]  ;;  %vm704_vm0 = vcmask 1041408   ;;  %p163_p10 = scmp.lt.s32.totalorder %s5094_s16, 1  ;;  %v4373_v2 = vld [vmem:[%s6517_s1 + $0x4] sm:$0x3]  ;;  %s4196_s9 = scalar_lea.hbm %s6519_s3, %s5094_s16 }
  0x14   : > { %v706_v1 = vsel %vm704_vm0, %v4260_v0, 0  ;;  %v1279_v3 = vsel %vm704_vm0, %v4373_v2, 0  ;;  %v4422_v4 = vld [vmem:[%s6517_s1 + $0x6] sm:$0x3]  ;;  %v201_v5 = vld [vmem:[%s6517_s1] sm:$0x3] }
  0x15   : > { %4894 = vmatpush.bf16.msra.mxu1 %v706_v1  ;;  %4895 = vmatpush.bf16.msra.mxu2 %v706_v1  ;;  %s164_s28 = scalar_select %p163_p10, %s5094_s16, 1  ;;  %v4551_v6 = vld [vmem:[%s6517_s1 + $0x8] sm:$0x3]  ;;  %v1566_v7 = vsel %vm704_vm0, %v4422_v4, 0  ;;  %v926_v8 = vsel %vm704_vm0, %v201_v5, 0  ;;  %vm655_vm4 = vcmask 31744  }
  0x16   : > { %4896 = vmatpush.bf16.msra.mxu3 %v706_v1  ;;  %715 = vmatpush.bf16.msra.mxu0 %v706_v1  ;;  %v2220_v9 = vsel %vm704_vm0, %v4551_v6, 0  ;;  %vm218_vm1 = vsmask.f32 3328  ;;  %vm219_vm2 = vsmask.f32 7440  ;;  %vm1065_vm5 = vcmask 1042432  }
  0x17   : > { %s4897_s8 = smul.u32 216, %s164_s28  ;;  %vm5158_vm3 = vmor %vm218_vm1, %vm219_vm2  ;;  %vm1066_vm6 = vcmask 1046532   ;;  %s161_s6 = sand.u32 1, %s5043_s13  }
  0x18   : > { %vm5332_vm7 = vmor %vm1065_vm5, %vm1066_vm6  ;;  %s162_s10 = scalar_lea.vmem [#allocation2], %s161_s6  ;;  %s4200_s17 = sshll.u32 %s4196_s9, 4  ;;  %s4201_s17 = int_to_ptr.hbm [resolvable:$true] %s4200_s17 }
  0x19   : > { %1288 = vmatpush.bf16.msrb.mxu2 %v1279_v3  ;;  %935 = vmatpush.bf16.msrb.mxu1 %v926_v8  ;;  %s5146_s11 = scalar_lea.vmem %s6516_s0, %s4897_s8  ;;  %s4188_s19 = scalar_lea.sflag [#allocation3], %s161_s6 }
  0x1a   : > { %1575 = vmatpush.bf16.msrb.mxu3 %v1566_v7  ;;  %2229 = vmatpush.bf16.msrb.mxu0 %v2220_v9  ;;  %v177_v10 = vld [vmem:[%s5146_s11 + $0x30] sm:$0xf]  ;;  %v178_v11 = vld [vmem:[%s5146_s11 + $0x34] sm:$0xf]  ;;  %v206_v12 = vld [vmem:[%s5146_s11 + $0x38] sm:$0x1] }
  0x1b   : > { %v318_v13 = vshrl.u32 %v177_v10, 16  ;;  %v321_v14 = vshll.u32 %v177_v10, 16  ;;  %v327_v15 = vshll.u32 %v178_v11, 16  ;;  %v331_v16 = vshrl.u32 %v178_v11, 16  ;;  %v185_v17 = vld [vmem:[%s5146_s11 + $0x60] sm:$0xf] }
  0x1c   : > { %v337_v18 = vshll.u32 %v206_v12, 16  ;;  %v186_v19 = vld [vmem:[%s5146_s11 + $0x64] sm:$0xf]  ;;  %v210_v20 = vld [vmem:[%s5146_s11 + $0x68] sm:$0x1]  ;;  %v414_v21 = vshrl.u32 %v185_v17, 16 }
  0x1d   : > { %v320_v22 = vrot.slane %v318_v13, 4  ;;  %v323_v23 = vrot.slane %v321_v14, 5  ;;  %v329_v24 = vrot.slane %v327_v15, 5  ;;  %v333_v25 = vrot.slane %v331_v16, 4  ;;  %v193_v26 = vld [vmem:[%s5146_s11 + $0x90] sm:$0xf] }
  0x1e   : > { %v339_v27 = vrot.slane %v337_v18, 5  ;;  %v416_v28 = vrot.slane %v414_v21, 4  ;;  %v417_v29 = vshll.u32 %v185_v17, 16  ;;  %v423_v30 = vshll.u32 %v186_v19, 16  ;;  %v194_v35 = vld [vmem:[%s5146_s11 + $0x94] sm:$0xf] }
  0x1f   : > { %v324_v31 = vor.u32 %v323_v23, %v320_v22  ;;  %v334_v32 = vor.u32 %v333_v25, %v329_v24  ;;  %v427_v33 = vshrl.u32 %v186_v19, 16  ;;  %v433_v34 = vshll.u32 %v210_v20, 16  ;;  %v214_v45 = vld [vmem:[%s5146_s11 + $0x98] sm:$0x1]  ;;  %v169_v61 = vld [vmem:[%s5146_s11] sm:$0xf] }
  0x20   : > { %v419_v37 = vrot.slane %v417_v29, 5  ;;  %v425_v38 = vrot.slane %v423_v30, 5  ;;  %v510_v39 = vshrl.u32 %v193_v26, 16  ;;  %v513_v47 = vshll.u32 %v193_v26, 16  ;;  %v5171_v1 = vld [vmem:[%s5146_s11 + $0x4] sm:$0xf] }
  0x21   : > { %v325_v40 = vrot.slane %v324_v31, 4  ;;  %v335_v41 = vrot.slane %v334_v32, 4  ;;  %v429_v42 = vrot.slane %v427_v33, 4  ;;  %v435_v43 = vrot.slane %v433_v34, 5  ;;  %v5174_v2 = vld [vmem:[%s5146_s11 + $0x8] sm:$0x1] }
  0x22   : > { %v420_v44 = vor.u32 %v419_v37, %v416_v28  ;;  %v512_v46 = vrot.slane %v510_v39, 4  ;;  %v519_v48 = vshll.u32 %v194_v35, 16  ;;  %v523_v52 = vshrl.u32 %v194_v35, 16  ;;  %v179_v19 = vld [vmem:[%s5146_s11 + $0x3c] sm:$0xf]  ;;  %s5003_s20 = sshra.s32 %s4201_s17, 4  ;;  %s5004_s20 = int_to_ptr.hbm [resolvable:$true] %s5003_s20 }
  0x23   : > { %v330_v49 = vsel %vm5158_vm3, %v325_v40, %v329_v24  ;;  %v340_v50 = vsel %vm5158_vm3, %v335_v41, %v339_v27  ;;  %v430_v51 = vor.u32 %v429_v42, %v425_v38  ;;  %v515_v56 = vrot.slane %v513_v47, 5  ;;  %v5186_v20 = vld [vmem:[%s5146_s11 + $0x40] sm:$0xf]  ;;  %v5191_v25 = vld [vmem:[%s5146_s11 + $0x44] sm:$0x1]  ;;  %s5005_s24 = scalar_lea.hbm %s5004_s20, 1  ;;  %p5010_p0 = scmp.lt.s32.totalorder %s5004_s20, %s6519_s3 }
  0x24   : > { %v615_v53 = vunpack.c.l.b16 %v330_v49  ;;  %v616_v54 = vunpack.c.l.b16 %v340_v50  ;;  %v421_v55 = vrot.slane %v420_v44, 4  ;;  %v521_v58 = vrot.slane %v519_v48, 5  ;;  %v187_v33 = vld [vmem:[%s5146_s11 + $0x6c] sm:$0xf]  ;;  %v211_v47 = vld [vmem:[%s5146_s11 + $0x74] sm:$0x1]  ;;  %p5006_p11 = scmp.ne.s32.totalorder %s5004_s20, %s5005_s24 }
  0x25   : > { %v431_v57 = vrot.slane %v430_v51, 4  ;;  %v525_v59 = vrot.slane %v523_v52, 4  ;;  %v529_v60 = vshll.u32 %v214_v45, 16  ;;  %v516_v0 = vor.u32 %v515_v56, %v512_v46  ;;  %s5009_s16 = scalar_lea.hbm %s6519_s3, 2 }
  0x26   : > { %v643_v62 = vpack.c.b16 %v616_v54, %v615_v53  ;;  %v426_v63 = vsel %vm5158_vm3, %v421_v55, %v425_v38  ;;  %v222_v9 = vshrl.u32 %v169_v61, 16  ;;  %v225_v10 = vshll.u32 %v169_v61, 16  ;;  %v195_v61 = vld [vmem:[%s5146_s11 + $0x9c] sm:$0xf]  ;;  %p5007_p12 = pnand %p5006_p11, %p5111_p5  ;;  %p5011_p1 = scmp.lt.s32.totalorder %s5009_s16, %s5005_s24 }
  0x27   : > { %v436_v3 = vsel %vm5158_vm3, %v431_v57, %v435_v43  ;;  %v623_v4 = vunpack.c.l.b16 %v426_v63  ;;  %v526_v5 = vor.u32 %v525_v59, %v521_v58  ;;  %v531_v6 = vrot.slane %v529_v60, 5  ;;  %v188_v43 = vld [vmem:[%s5146_s11 + $0x70] sm:$0xf] }
  0x28   : > { %4265 = vmatmul.msk.bf16.vlgmr.msra.gmra.mxu1 %vm655_vm4, %v643_v62  ;;  %v624_v7 = vunpack.c.l.b16 %v436_v3  ;;  %v517_v8 = vrot.slane %v516_v0, 4  ;;  %v231_v12 = vshll.u32 %v5171_v1, 16  ;;  %v235_v13 = vshrl.u32 %v5171_v1, 16  ;;  %v196_v3 = vld [vmem:[%s5146_s11 + $0xa0] sm:$0xf]  ;;  %p5008_p13 = pneg %p5007_p12  ;;  %p5012_p2 = por %p5011_p1, %p5010_p0 }
  0x29   : > { %v527_v11 = vrot.slane %v526_v5, 4  ;;  %v241_v14 = vshll.u32 %v5174_v2, 16  ;;  %v224_v17 = vrot.slane %v222_v9, 4  ;;  %v227_v18 = vrot.slane %v225_v10, 5 }
  0x2a   : > { %v647_v15 = vpack.c.b16 %v624_v7, %v623_v4  ;;  %v522_v16 = vsel %vm5158_vm3, %v517_v8, %v521_v58  ;;  %v233_v23 = vrot.slane %v231_v12, 5  ;;  %v237_v24 = vrot.slane %v235_v13, 4  ;;  %v215_v8 = vld [vmem:[%s5146_s11 + $0xa4] sm:$0x1]  ;;  %p5013_p3 = pnand %p5012_p2, %p5008_p13 }
  0x2b   : > { %v532_v21 = vsel %vm5158_vm3, %v527_v11, %v531_v6  ;;  %v631_v22 = vunpack.c.l.b16 %v522_v16  ;;  %v228_v27 = vor.u32 %v227_v18, %v224_v17  ;;  %v243_v28 = vrot.slane %v241_v14, 5 }
  0x2c   : > { %4269 = vmatmul.msk.bf16.vlgmr.msra.gmra.mxu2 %vm655_vm4, %v647_v15  ;;  %v632_v26 = vunpack.c.l.b16 %v532_v21  ;;  %v238_v29 = vor.u32 %v237_v24, %v233_v23  ;;  %v342_v30 = vshrl.u32 %v179_v19, 16  ;;  %v345_v31 = vshll.u32 %v179_v19, 16 }
  0x2d   : > { %v351_v32 = vshll.u32 %v5186_v20, 16  ;;  %v229_v35 = vrot.slane %v228_v27, 4  ;;  %v355_v37 = vshrl.u32 %v5186_v20, 16  ;;  %v361_v38 = vshll.u32 %v5191_v25, 16 }
  0x2e   : > { %v651_v34 = vpack.c.b16 %v632_v26, %v631_v22  ;;  %v239_v39 = vrot.slane %v238_v29, 4  ;;  %v344_v40 = vrot.slane %v342_v30, 4  ;;  %v347_v41 = vrot.slane %v345_v31, 5  ;;  %v171_v22 = vld [vmem:[%s5146_s11 + $0xc] sm:$0xf] }
  0x2f   : > { %v353_v42 = vrot.slane %v351_v32, 5  ;;  %v234_v44 = vsel %vm5158_vm3, %v229_v35, %v233_v23  ;;  %v357_v45 = vrot.slane %v355_v37, 4  ;;  %v363_v46 = vrot.slane %v361_v38, 5  ;;  %v5220_v32 = vld [vmem:[%s5146_s11 + $0x14] sm:$0x1] }
  0x30   : > { %4273 = vmatmul.msk.bf16.vlgmr.msra.gmra.mxu3 %vm655_vm4, %v651_v34  ;;  %v438_v48 = vshrl.u32 %v187_v33, 16  ;;  %v244_v49 = vsel %vm5158_vm3, %v239_v39, %v243_v28  ;;  %v607_v50 = vunpack.c.l.b16 %v234_v44  ;;  %v348_v51 = vor.u32 %v347_v41, %v344_v40  ;;  %v5217_v28 = vld [vmem:[%s5146_s11 + $0x10] sm:$0xf] }
  0x31   : > { %v441_v52 = vshll.u32 %v187_v33, 16  ;;  %v608_v53 = vunpack.c.l.b16 %v244_v49  ;;  %v358_v54 = vor.u32 %v357_v45, %v353_v42  ;;  %v447_v56 = vshll.u32 %v188_v43, 16 }
  0x32   : > { %v440_v55 = vrot.slane %v438_v48, 4  ;;  %v349_v57 = vrot.slane %v348_v51, 4  ;;  %v451_v59 = vshrl.u32 %v188_v43, 16  ;;  %v457_v60 = vshll.u32 %v211_v47, 16  ;;  %v5230_v47 = vld [vmem:[%s5146_s11 + $0x4c] sm:$0xf] }
  0x33   : > { %v443_v58 = vrot.slane %v441_v52, 5  ;;  %v639_v62 = vpack.c.b16 %v608_v53, %v607_v50  ;;  %v359_v63 = vrot.slane %v358_v54, 4  ;;  %v449_v0 = vrot.slane %v447_v56, 5  ;;  %v5235_v56 = vld [vmem:[%s5146_s11 + $0x50] sm:$0x1] }
  0x34   : > { %v354_v4 = vsel %vm5158_vm3, %v349_v57, %v353_v42  ;;  %v453_v6 = vrot.slane %v451_v59, 4  ;;  %v459_v7 = vrot.slane %v457_v60, 5  ;;  %v534_v11 = vshrl.u32 %v195_v61, 16  ;;  %v181_v42 = vld [vmem:[%s5146_s11 + $0x48] sm:$0xf] }
  0x35   : > { %v444_v5 = vor.u32 %v443_v58, %v440_v55  ;;  %4261 = vmatmul.msk.bf16.vlgmr.msra.gmra.mxu0 %vm655_vm4, %v639_v62  ;;  %v364_v9 = vsel %vm5158_vm3, %v359_v63, %v363_v46  ;;  %v617_v10 = vunpack.c.l.b16 %v354_v4  ;;  %v537_v12 = vshll.u32 %v195_v61, 16 }
  0x36   : > { %v618_v13 = vunpack.c.l.b16 %v364_v9  ;;  %v454_v15 = vor.u32 %v453_v6, %v449_v0  ;;  %v543_v16 = vshll.u32 %v196_v3, 16  ;;  %v536_v17 = vrot.slane %v534_v11, 4 }
  0x37   : > { %v445_v14 = vrot.slane %v444_v5, 4  ;;  %v539_v18 = vrot.slane %v537_v12, 5  ;;  %v547_v19 = vshrl.u32 %v196_v3, 16  ;;  %v553_v21 = vshll.u32 %v215_v8, 16  ;;  %v189_v3 = vld [vmem:[%s5146_s11 + $0x78] sm:$0xf] }
  0x38   : > { %v644_v23 = vpack.c.b16 %v618_v13, %v617_v10  ;;  %v455_v26 = vrot.slane %v454_v15, 4  ;;  %v545_v27 = vrot.slane %v543_v16, 5  ;;  %v246_v35 = vshrl.u32 %v171_v22, 16  ;;  %v190_v8 = vld [vmem:[%s5146_s11 + $0x7c] sm:$0xf] }
  0x39   : > { %v450_v24 = vsel %vm5158_vm3, %v445_v14, %v449_v0  ;;  %v540_v30 = vor.u32 %v539_v18, %v536_v17  ;;  %v549_v31 = vrot.slane %v547_v19, 4  ;;  %v555_v34 = vrot.slane %v553_v21, 5  ;;  %v212_v16 = vld [vmem:[%s5146_s11 + $0x80] sm:$0x1] }
  0x3a   : > { %v625_v29 = vunpack.c.l.b16 %v450_v24  ;;  %4266 = vmatmul.msk.bf16.gmra.mxu1 %vm655_vm4, %v644_v23  ;;  %v460_v33 = vsel %vm5158_vm3, %v455_v26, %v459_v7  ;;  %v249_v37 = vshll.u32 %v171_v22, 16  ;;  %v255_v41 = vshll.u32 %v5217_v28, 16 }
  0x3b   : > { %v626_v38 = vunpack.c.l.b16 %v460_v33  ;;  %v541_v39 = vrot.slane %v540_v30, 4  ;;  %v550_v40 = vor.u32 %v549_v31, %v545_v27  ;;  %v248_v43 = vrot.slane %v246_v35, 4 }
  0x3c   : > { %v251_v44 = vrot.slane %v249_v37, 5  ;;  %v259_v45 = vshrl.u32 %v5217_v28, 16  ;;  %v265_v46 = vshll.u32 %v5220_v32, 16  ;;  %v257_v51 = vrot.slane %v255_v41, 5 }
  0x3d   : > { %v648_v48 = vpack.c.b16 %v626_v38, %v625_v29  ;;  %v546_v49 = vsel %vm5158_vm3, %v541_v39, %v545_v27  ;;  %v551_v50 = vrot.slane %v550_v40, 4  ;;  %v366_v58 = vshrl.u32 %v181_v42, 16  ;;  %v198_v39 = vld [vmem:[%s5146_s11 + $0xac] sm:$0xf]  ;;  %v216_v40 = vld [vmem:[%s5146_s11 + $0xb0] sm:$0x1] }
  0x3e   : > { %v633_v52 = vunpack.c.l.b16 %v546_v49  ;;  %v252_v53 = vor.u32 %v251_v44, %v248_v43  ;;  %v261_v54 = vrot.slane %v259_v45, 4  ;;  %v267_v55 = vrot.slane %v265_v46, 5 }
  0x3f   : > { %4270 = vmatmul.msk.bf16.gmra.mxu2 %vm655_vm4, %v648_v48  ;;  %v556_v57 = vsel %vm5158_vm3, %v551_v50, %v555_v34  ;;  %v369_v59 = vshll.u32 %v181_v42, 16  ;;  %v375_v60 = vshll.u32 %v5230_v47, 16  ;;  %v379_v0 = vshrl.u32 %v5230_v47, 16  ;;  %v197_v34 = vld [vmem:[%s5146_s11 + $0xa8] sm:$0xf] }
  0x40   : > { %v634_v61 = vunpack.c.l.b16 %v556_v57  ;;  %v253_v62 = vrot.slane %v252_v53, 4  ;;  %v262_v63 = vor.u32 %v261_v54, %v257_v51  ;;  %v368_v4 = vrot.slane %v366_v58, 4 }
  0x41   : > { %v371_v5 = vrot.slane %v369_v59, 5  ;;  %v377_v6 = vrot.slane %v375_v60, 5  ;;  %v385_v7 = vshll.u32 %v5235_v56, 16  ;;  %v381_v12 = vrot.slane %v379_v0, 4  ;;  %v173_v59 = vld [vmem:[%s5146_s11 + $0x18] sm:$0xf] }
  0x42   : > { %v652_v9 = vpack.c.b16 %v634_v61, %v633_v52  ;;  %v258_v10 = vsel %vm5158_vm3, %v253_v62, %v257_v51  ;;  %v263_v11 = vrot.slane %v262_v63, 4  ;;  %v462_v17 = vshrl.u32 %v189_v3, 16  ;;  %v5263_v63 = vld [vmem:[%s5146_s11 + $0x1c] sm:$0xf]  ;;  %v5266_v0 = vld [vmem:[%s5146_s11 + $0x20] sm:$0x1] }
  0x43   : > { %v609_v13 = vunpack.c.l.b16 %v258_v10  ;;  %v372_v14 = vor.u32 %v371_v5, %v368_v4  ;;  %v387_v15 = vrot.slane %v385_v7, 5  ;;  %v382_v19 = vor.u32 %v381_v12, %v377_v6 }
  0x44   : > { %4274 = vmatmul.msk.bf16.gmra.mxu3 %vm655_vm4, %v652_v9  ;;  %v268_v18 = vsel %vm5158_vm3, %v263_v11, %v267_v55  ;;  %v465_v21 = vshll.u32 %v189_v3, 16  ;;  %v471_v22 = vshll.u32 %v190_v8, 16  ;;  %v464_v26 = vrot.slane %v462_v17, 4 }
  0x45   : > { %v610_v23 = vunpack.c.l.b16 %v268_v18  ;;  %v373_v24 = vrot.slane %v372_v14, 4  ;;  %v475_v27 = vshrl.u32 %v190_v8, 16  ;;  %v383_v29 = vrot.slane %v382_v19, 4 }
  0x46   : > { %v467_v30 = vrot.slane %v465_v21, 5  ;;  %v473_v31 = vrot.slane %v471_v22, 5  ;;  %v481_v33 = vshll.u32 %v212_v16, 16  ;;  %v558_v48 = vshrl.u32 %v197_v34, 16  ;;  %v5276_v21 = vld [vmem:[%s5146_s11 + $0x58] sm:$0xf] }
  0x47   : > { %v640_v35 = vpack.c.b16 %v610_v23, %v609_v13  ;;  %v378_v37 = vsel %vm5158_vm3, %v373_v24, %v377_v6  ;;  %v477_v38 = vrot.slane %v475_v27, 4  ;;  %v388_v41 = vsel %vm5158_vm3, %v383_v29, %v387_v15  ;;  %v183_v15 = vld [vmem:[%s5146_s11 + $0x54] sm:$0xf]  ;;  %v5281_v27 = vld [vmem:[%s5146_s11 + $0x5c] sm:$0x1] }
  0x48   : > { %v619_v42 = vunpack.c.l.b16 %v378_v37  ;;  %v468_v43 = vor.u32 %v467_v30, %v464_v26  ;;  %v483_v44 = vrot.slane %v481_v33, 5  ;;  %v620_v45 = vunpack.c.l.b16 %v388_v41 }
  0x49   : > { %4262 = vmatmul.msk.bf16.gmra.mxu0 %vm655_vm4, %v640_v35  ;;  %v478_v46 = vor.u32 %v477_v38, %v473_v31  ;;  %v561_v49 = vshll.u32 %v197_v34, 16  ;;  %v567_v51 = vshll.u32 %v198_v39, 16  ;;  %v571_v52 = vshrl.u32 %v198_v39, 16  ;;  %v191_v39 = vld [vmem:[%s5146_s11 + $0x84] sm:$0xf] }
  0x4a   : > { %v469_v50 = vrot.slane %v468_v43, 4  ;;  %v577_v53 = vshll.u32 %v216_v40, 16  ;;  %v645_v54 = vpack.c.b16 %v620_v45, %v619_v42  ;;  %v560_v57 = vrot.slane %v558_v48, 4 }
  0x4b   : > { %v479_v55 = vrot.slane %v478_v46, 4  ;;  %v563_v58 = vrot.slane %v561_v49, 5  ;;  %v569_v61 = vrot.slane %v567_v51, 5  ;;  %v573_v62 = vrot.slane %v571_v52, 4  ;;  %v192_v49 = vld [vmem:[%s5146_s11 + $0x88] sm:$0xf] }
  0x4c   : > { %v474_v60 = vsel %vm5158_vm3, %v469_v50, %v473_v31  ;;  %4267 = vmatmul.msk.bf16.gmra.mxu1 %vm655_vm4, %v645_v54  ;;  %v579_v6 = vrot.slane %v577_v53, 5  ;;  %v270_v9 = vshrl.u32 %v173_v59, 16  ;;  %v273_v10 = vshll.u32 %v173_v59, 16  ;;  %v213_v53 = vld [vmem:[%s5146_s11 + $0x8c] sm:$0x1] }
  0x4d   : > { %v484_v3 = vsel %vm5158_vm3, %v479_v55, %v483_v44  ;;  %v627_v4 = vunpack.c.l.b16 %v474_v60  ;;  %v564_v5 = vor.u32 %v563_v58, %v560_v57  ;;  %v574_v8 = vor.u32 %v573_v62, %v569_v61 }
  0x4e   : > { %v628_v7 = vunpack.c.l.b16 %v484_v3  ;;  %v279_v12 = vshll.u32 %v5263_v63, 16  ;;  %v283_v13 = vshrl.u32 %v5263_v63, 16  ;;  %v289_v14 = vshll.u32 %v5266_v0, 16 }
  0x4f   : > { %v565_v11 = vrot.slane %v564_v5, 4  ;;  %v575_v17 = vrot.slane %v574_v8, 4  ;;  %v272_v18 = vrot.slane %v270_v9, 4  ;;  %v275_v19 = vrot.slane %v273_v10, 5  ;;  %v199_v8 = vld [vmem:[%s5146_s11 + $0xb4] sm:$0xf] }
  0x50   : > { %v649_v16 = vpack.c.b16 %v628_v7, %v627_v4  ;;  %v281_v23 = vrot.slane %v279_v12, 5  ;;  %v285_v24 = vrot.slane %v283_v13, 4  ;;  %v291_v26 = vrot.slane %v289_v14, 5  ;;  %v200_v12 = vld [vmem:[%s5146_s11 + $0xb8] sm:$0xf] }
  0x51   : > { %v570_v22 = vsel %vm5158_vm3, %v565_v11, %v569_v61  ;;  %v580_v29 = vsel %vm5158_vm3, %v575_v17, %v579_v6  ;;  %v276_v31 = vor.u32 %v275_v19, %v272_v18  ;;  %v390_v33 = vshrl.u32 %v183_v15, 16  ;;  %v217_v17 = vld [vmem:[%s5146_s11 + $0xbc] sm:$0x1] }
  0x52   : > { %4271 = vmatmul.msk.bf16.gmra.mxu2 %vm655_vm4, %v649_v16  ;;  %v635_v30 = vunpack.c.l.b16 %v570_v22  ;;  %v636_v34 = vunpack.c.l.b16 %v580_v29  ;;  %v286_v35 = vor.u32 %v285_v24, %v281_v23  ;;  %v393_v37 = vshll.u32 %v183_v15, 16 }
  0x53   : > { %v399_v38 = vshll.u32 %v5276_v21, 16  ;;  %v277_v40 = vrot.slane %v276_v31, 4  ;;  %v392_v41 = vrot.slane %v390_v33, 4  ;;  %v403_v42 = vshrl.u32 %v5276_v21, 16 }
  0x54   : > { %v409_v43 = vshll.u32 %v5281_v27, 16  ;;  %v653_v44 = vpack.c.b16 %v636_v34, %v635_v30  ;;  %v287_v45 = vrot.slane %v286_v35, 4  ;;  %v395_v46 = vrot.slane %v393_v37, 5  ;;  %v175_v37 = vld [vmem:[%s5146_s11 + $0x24] sm:$0xf] }
  0x55   : > { %v401_v48 = vrot.slane %v399_v38, 5  ;;  %v282_v50 = vsel %vm5158_vm3, %v277_v40, %v281_v23  ;;  %v405_v51 = vrot.slane %v403_v42, 4  ;;  %v486_v54 = vshrl.u32 %v191_v39, 16  ;;  %v5309_v42 = vld [vmem:[%s5146_s11 + $0x28] sm:$0xf] }
  0x56   : > { %v411_v52 = vrot.slane %v409_v43, 5  ;;  %4275 = vmatmul.msk.bf16.gmra.mxu3 %vm655_vm4, %v653_v44  ;;  %v292_v55 = vsel %vm5158_vm3, %v287_v45, %v291_v26  ;;  %v611_v57 = vunpack.c.l.b16 %v282_v50  ;;  %v396_v58 = vor.u32 %v395_v46, %v392_v41 }
  0x57   : > { %v489_v59 = vshll.u32 %v191_v39, 16  ;;  %v612_v60 = vunpack.c.l.b16 %v292_v55  ;;  %v406_v61 = vor.u32 %v405_v51, %v401_v48  ;;  %v488_v62 = vrot.slane %v486_v54, 4 }
  0x58   : > { %v495_v3 = vshll.u32 %v192_v49, 16  ;;  %v397_v4 = vrot.slane %v396_v58, 4  ;;  %v499_v6 = vshrl.u32 %v192_v49, 16  ;;  %v505_v7 = vshll.u32 %v213_v53, 16 }
  0x59   : > { %v491_v5 = vrot.slane %v489_v59, 5  ;;  %v641_v9 = vpack.c.b16 %v612_v60, %v611_v57  ;;  %v407_v10 = vrot.slane %v406_v61, 4  ;;  %v582_v22 = vshrl.u32 %v199_v8, 16  ;;  %v1017_v61 = vld [vmem:[%s5146_s11] sm:$0xe] }
  0x5a   : > { %v497_v11 = vrot.slane %v495_v3, 5  ;;  %v402_v13 = vsel %vm5158_vm3, %v397_v4, %v401_v48  ;;  %v501_v15 = vrot.slane %v499_v6, 4  ;;  %v507_v16 = vrot.slane %v505_v7, 5  ;;  %v5313_v48 = vld [vmem:[%s5146_s11 + $0x2c] sm:$0x1] }
  0x5b   : > { %v492_v14 = vor.u32 %v491_v5, %v488_v62  ;;  %4263 = vmatmul.msk.bf16.gmra.mxu0 %vm655_vm4, %v641_v9  ;;  %v412_v18 = vsel %vm5158_vm3, %v407_v10, %v411_v52  ;;  %v621_v19 = vunpack.c.l.b16 %v402_v13  ;;  %v585_v23 = vshll.u32 %v199_v8, 16  ;;  %v4503_v6 = vld [vmem:[%s5146_s11 + $0xc] sm:$0xf] }
  0x5c   : > { %v622_v24 = vunpack.c.l.b16 %v412_v18  ;;  %v502_v29 = vor.u32 %v501_v15, %v497_v11  ;;  %v591_v30 = vshll.u32 %v200_v12, 16  ;;  %v584_v31 = vrot.slane %v582_v22, 4 }
  0x5d   : > { %v493_v26 = vrot.slane %v492_v14, 4  ;;  %v587_v33 = vrot.slane %v585_v23, 5  ;;  %v595_v34 = vshrl.u32 %v200_v12, 16  ;;  %v601_v35 = vshll.u32 %v217_v17, 16  ;;  %v4504_v12 = vld [vmem:[%s5146_s11 + $0x10] sm:$0xf] }
  0x5e   : > { %v646_v38 = vpack.c.b16 %v622_v24, %v621_v19  ;;  %v503_v40 = vrot.slane %v502_v29, 4  ;;  %v593_v41 = vrot.slane %v591_v30, 5  ;;  %v1073_v43 = vrot.slane %v5174_v2, 5 }
  0x5f   : > { %v498_v39 = vsel %vm5158_vm3, %v493_v26, %v497_v11  ;;  %v588_v45 = vor.u32 %v587_v33, %v584_v31  ;;  %v597_v46 = vrot.slane %v595_v34, 4  ;;  %v603_v50 = vrot.slane %v601_v35, 5  ;;  %v4649_v11 = vld [vmem:[%s6517_s1 + $0xc] sm:$0x3] }
  0x60   : > { %v629_v44 = vunpack.c.l.b16 %v498_v39  ;;  %4268 = vmatmul.msk.bf16.gmra.mxu1 %vm655_vm4, %v646_v38  ;;  %v508_v49 = vsel %vm5158_vm3, %v503_v40, %v507_v16  ;;  %v294_v51 = vshrl.u32 %v175_v37, 16  ;;  %v297_v52 = vshll.u32 %v175_v37, 16  ;;  %v4505_v38 = vld [vmem:[%s5146_s11 + $0x14] sm:$0x1] }
  0x61   : > { %v630_v53 = vunpack.c.l.b16 %v508_v49  ;;  %v589_v54 = vrot.slane %v588_v45, 4  ;;  %v598_v55 = vor.u32 %v597_v46, %v593_v41  ;;  %v303_v2 = vshll.u32 %v5309_v42, 16  ;;  %v4778_v45 = vld [vmem:[%s6517_s1 + $0xe] sm:$0x3] }
  0x62   : > { %v296_v57 = vrot.slane %v294_v51, 4  ;;  %v299_v58 = vrot.slane %v297_v52, 5  ;;  %v307_v59 = vshrl.u32 %v5309_v42, 16  ;;  %v313_v60 = vshll.u32 %v5313_v48, 16  ;;  %v4846_v51 = vld [vmem:[%s5146_s11] sm:$0xff] }
  0x63   : > { %v650_v62 = vpack.c.b16 %v630_v53, %v629_v44  ;;  %v594_v3 = vsel %vm5158_vm3, %v589_v54, %v593_v41  ;;  %v599_v4 = vrot.slane %v598_v55, 4  ;;  %v305_v5 = vrot.slane %v303_v2, 5  ;;  %v4827_v2 = vld [vmem:[%s6517_s1 + $0x10] sm:$0x3] }
  0x64   : > { %v637_v7 = vunpack.c.l.b16 %v594_v3  ;;  %v300_v8 = vor.u32 %v299_v58, %v296_v57  ;;  %v309_v9 = vrot.slane %v307_v59, 4  ;;  %v315_v10 = vrot.slane %v313_v60, 5 }
  0x65   : > { %4272 = vmatmul.msk.bf16.gmra.mxu2 %vm655_vm4, %v650_v62  ;;  %v604_v13 = vsel %vm5158_vm3, %v599_v4, %v603_v50  ;;  %v4357_v14 = vrot.slane %v1017_v61, 9  ;;  %v1070_v19 = vrot.slane %v5171_v1, 5  ;;  %v2905_v22 = vsel %vm704_vm0, %v4649_v11, 0  ;;  %v4600_v50 = vld [vmem:[%s6517_s1 + $0xa] sm:$0x3] }
  0x66   : > { %v638_v15 = vunpack.c.l.b16 %v604_v13  ;;  %v301_v16 = vrot.slane %v300_v8, 4  ;;  %v310_v17 = vor.u32 %v309_v9, %v305_v5  ;;  %v1738_v23 = vshrl.u32 %v4503_v6, 16  ;;  %2914 = vmatpush.bf16.msra.mxu2 %v2905_v22  ;;  %v1018_v8 = vld [vmem:[%s5146_s11 + $0xc] sm:$0xe] }
  0x67   : > { %v1741_v24 = vshll.u32 %v4503_v6, 16  ;;  %v1747_v26 = vshll.u32 %v4504_v12, 16  ;;  %v1071_v33 = vsel %vm5332_vm7, %v4357_v14, %v1070_v19  ;;  %v1072_v35 = vrot.slane %v1070_v19, 4  ;;  %v4507_v6 = vld [vmem:[%s5146_s11 + $0x1c] sm:$0xf] }
  0x68   : > { %v654_v29 = vpack.c.b16 %v638_v15, %v637_v7  ;;  %v306_v30 = vsel %vm5158_vm3, %v301_v16, %v305_v5  ;;  %v311_v31 = vrot.slane %v310_v17, 4  ;;  %v1182_v37 = vunpack.c.l.b16 %v1071_v33  ;;  %v4506_v5 = vld [vmem:[%s5146_s11 + $0x18] sm:$0xf]  ;;  %v4862_v15 = vld [vmem:[%s5146_s11 + $0xc] sm:$0xff] }
  0x69   : > { %v613_v34 = vunpack.c.l.b16 %v306_v30  ;;  %v1740_v1 = vrot.slane %v1738_v23, 4  ;;  %v1743_v40 = vrot.slane %v1741_v24, 5  ;;  %v1749_v41 = vrot.slane %v1747_v26, 5  ;;  %v4508_v30 = vld [vmem:[%s5146_s11 + $0x20] sm:$0x1] }
  0x6a   : > { %4276 = vmatmul.msk.bf16.gmra.mxu3 %vm655_vm4, %v654_v29  ;;  %v316_v39 = vsel %vm5158_vm3, %v311_v31, %v315_v10  ;;  %v1751_v44 = vshrl.u32 %v4504_v12, 16  ;;  %v1074_v49 = vsel %vm5332_vm7, %v1072_v35, %v1073_v43  ;;  %v1757_v55 = vshll.u32 %v4505_v38, 16  ;;  %v4847_v35 = vld [vmem:[%s5146_s11 + $0xc] sm:$0xff] }
  0x6b   : > { %v614_v46 = vunpack.c.l.b16 %v316_v39  ;;  %v1183_v52 = vunpack.c.l.b16 %v1074_v49  ;;  %v1744_v53 = vor.u32 %v1743_v40, %v1740_v1  ;;  %v3559_v58 = vsel %vm704_vm0, %v4778_v45, 0 }
  0x6c   : > { %v1753_v54 = vrot.slane %v1751_v44, 4  ;;  %3568 = vmatpush.bf16.msra.mxu3 %v3559_v58  ;;  %v2618_v60 = vsel %vm704_vm0, %v4600_v50, 0  ;;  %v3957_v61 = vsel %vm704_vm0, %v4827_v2, 0  ;;  %v1759_v4 = vrot.slane %v1757_v55, 5  ;;  %v1019_v50 = vld [vmem:[%s5146_s11 + $0x18] sm:$0xe] }
  0x6d   : > { %v642_v57 = vpack.c.b16 %v614_v46, %v613_v34  ;;  %v1214_v43 = vpack.c.b16 %v1183_v52, %v1182_v37  ;;  %2627 = vmatpush.bf16.msra.mxu1 %v2618_v60  ;;  %v1745_v62 = vrot.slane %v1744_v53, 4  ;;  %3966 = vmatpush.bf16.msra.mxu0 %v3957_v61  ;;  %v1077_v7 = vrot.slane %v5217_v28, 5  ;;  %v4510_v46 = vld [vmem:[%s5146_s11 + $0x28] sm:$0xf] }
  0x6e   : > { %v1754_v59 = vor.u32 %v1753_v54, %v1749_v41  ;;  %v1762_v9 = vshrl.u32 %v4506_v5, 16  ;;  %v1765_v10 = vshll.u32 %v4506_v5, 16  ;;  %v1771_v13 = vshll.u32 %v4507_v6, 16 }
  0x6f   : > { %4264 = vmatmul.msk.bf16.gmra.mxu0 %vm655_vm4, %v642_v57  ;;  %v1750_v11 = vsel %vm5158_vm3, %v1745_v62, %v1749_v41  ;;  %v1775_v14 = vshrl.u32 %v4507_v6, 16  ;;  %v4358_v16 = vrot.slane %v1018_v8, 9  ;;  %v1079_v17 = vrot.slane %v1077_v7, 4  ;;  %v4509_v41 = vld [vmem:[%s5146_s11 + $0x24] sm:$0xf] }
  0x70   : > { %4341 = vmatmul.msk.bf16.vlgmr.msrb.gmra.mxu1 %vm655_vm4, %v4846_v51  ;;  %v1755_v3 = vrot.slane %v1754_v59, 4  ;;  %v1080_v28 = vrot.slane %v5220_v32, 5  ;;  %v2123_v19 = vunpack.c.l.b16 %v1750_v11  ;;  %v1764_v23 = vrot.slane %v1762_v9, 4  ;;  %v4511_v6 = vld [vmem:[%s5146_s11 + $0x2c] sm:$0x1] }
  0x71   : > { %v1767_v24 = vrot.slane %v1765_v10, 5  ;;  %v1773_v26 = vrot.slane %v1771_v13, 5  ;;  %v1777_v29 = vrot.slane %v1775_v14, 4  ;;  %v1078_v31 = vsel %vm5332_vm7, %v4358_v16, %v1077_v7 }
  0x72   : > { %v1760_v12 = vsel %vm5158_vm3, %v1755_v3, %v1759_v4  ;;  %v1081_v33 = vsel %vm5332_vm7, %v1079_v17, %v1080_v28  ;;  %v1781_v38 = vshll.u32 %v4508_v30, 16  ;;  %v1184_v1 = vunpack.c.l.b16 %v1078_v31 }
  0x73   : > { %v2124_v22 = vunpack.c.l.b16 %v1760_v12  ;;  %v1768_v32 = vor.u32 %v1767_v24, %v1764_v23  ;;  %v1778_v37 = vor.u32 %v1777_v29, %v1773_v26  ;;  %v1185_v39 = vunpack.c.l.b16 %v1081_v33  ;;  %v4848_v12 = vld [vmem:[%s5146_s11 + $0x18] sm:$0xff]  ;;  %v1020_v29 = vld [vmem:[%s5146_s11 + $0x24] sm:$0xe] }
  0x74   : > { %v1783_v45 = vrot.slane %v1781_v38, 5  ;;  %v1084_v51 = vrot.slane %v5263_v63, 5  ;;  %v1786_v52 = vshrl.u32 %v4509_v41, 16  ;;  %v1789_v54 = vshll.u32 %v4509_v41, 16 }
  0x75   : > { %4374 = vmatmul.msk.bf16.vlgmr.msrb.gmra.mxu2 %vm655_vm4, %v1214_v43  ;;  %v2155_v34 = vpack.c.b16 %v2124_v22, %v2123_v19  ;;  %v1769_v40 = vrot.slane %v1768_v32, 4  ;;  %v1779_v44 = vrot.slane %v1778_v37, 4  ;;  %v1215_v49 = vpack.c.b16 %v1185_v39, %v1184_v1  ;;  %v4863_v43 = vld [vmem:[%s5146_s11 + $0x18] sm:$0xff]  ;;  %v4512_v19 = vld [vmem:[%s5146_s11 + $0x30] sm:$0xf]  ;;  %v4864_v32 = vld [vmem:[%s5146_s11 + $0x24] sm:$0xff] }
  0x76   : > { %v1795_v55 = vshll.u32 %v4510_v46, 16  ;;  %v1799_v2 = vshrl.u32 %v4510_v46, 16  ;;  %v4359_v58 = vrot.slane %v1019_v50, 9  ;;  %v1086_v60 = vrot.slane %v1084_v51, 4  ;;  %v4513_v22 = vld [vmem:[%s5146_s11 + $0x34] sm:$0xf] }
  0x77   : > { %v1774_v53 = vsel %vm5158_vm3, %v1769_v40, %v1773_v26  ;;  %v1784_v57 = vsel %vm5158_vm3, %v1779_v44, %v1783_v45  ;;  %v1087_v63 = vrot.slane %v5266_v0, 5  ;;  %v1788_v61 = vrot.slane %v1786_v52, 4  ;;  %v4514_v45 = vld [vmem:[%s5146_s11 + $0x38] sm:$0x1] }
  0x78   : > { %v2125_v59 = vunpack.c.l.b16 %v1774_v53  ;;  %v2126_v62 = vunpack.c.l.b16 %v1784_v57  ;;  %v1791_v3 = vrot.slane %v1789_v54, 5  ;;  %v1797_v4 = vrot.slane %v1795_v55, 5  ;;  %v4516_v57 = vld [vmem:[%s5146_s11 + $0x40] sm:$0xf] }
  0x79   : > { %v1801_v5 = vrot.slane %v1799_v2, 4  ;;  %v1085_v7 = vsel %vm5332_vm7, %v4359_v58, %v1084_v51  ;;  %v1088_v8 = vsel %vm5332_vm7, %v1086_v60, %v1087_v63  ;;  %v1805_v0 = vshll.u32 %v4511_v6, 16  ;;  %v4515_v2 = vld [vmem:[%s5146_s11 + $0x3c] sm:$0xf]  ;;  %v4938_v63 = vld [vmem:[%s5146_s11 + $0x34] sm:$0xf] }
  0x7a   : > { %4487 = vmatmul.msk.bf16.vlgmr.msrb.gmra.mxu3 %vm655_vm4, %v4862_v15  ;;  %v2156_v9 = vpack.c.b16 %v2126_v62, %v2125_v59  ;;  %v1792_v10 = vor.u32 %v1791_v3, %v1788_v61  ;;  %v1186_v13 = vunpack.c.l.b16 %v1085_v7  ;;  %v1187_v14 = vunpack.c.l.b16 %v1088_v8  ;;  %v1021_v62 = vld [vmem:[%s5146_s11 + $0x30] sm:$0xe] }
  0x7b   : > { %v1802_v11 = vor.u32 %v1801_v5, %v1797_v4  ;;  %v1807_v17 = vrot.slane %v1805_v0, 5  ;;  %v1091_v23 = vrot.slane %v5309_v42, 5  ;;  %v1810_v30 = vshrl.u32 %v4512_v19, 16  ;;  %v4939_v0 = vld [vmem:[%s5146_s11 + $0x38] sm:$0x1] }
  0x7c   : > { %v1793_v15 = vrot.slane %v1792_v10, 4  ;;  %v1216_v28 = vpack.c.b16 %v1187_v14, %v1186_v13  ;;  %v1813_v31 = vshll.u32 %v4512_v19, 16  ;;  %v1819_v33 = vshll.u32 %v4513_v22, 16  ;;  %v4865_v13 = vld [vmem:[%s5146_s11 + $0x30] sm:$0xff] }
  0x7d   : > { %v1803_v16 = vrot.slane %v1802_v11, 4  ;;  %v1093_v37 = vrot.slane %v1091_v23, 4  ;;  %v1094_v42 = vrot.slane %v5313_v48, 5  ;;  %v1812_v39 = vrot.slane %v1810_v30, 4  ;;  %v4849_v48 = vld [vmem:[%s5146_s11 + $0x24] sm:$0xff] }
  0x7e   : > { %v1798_v24 = vsel %vm5158_vm3, %v1793_v15, %v1797_v4  ;;  %v1815_v40 = vrot.slane %v1813_v31, 5  ;;  %v1821_v41 = vrot.slane %v1819_v33, 5  ;;  %v1829_v53 = vshll.u32 %v4514_v45, 16  ;;  %v4850_v33 = vld [vmem:[%s5146_s11 + $0x30] sm:$0xff] }
  0x7f   : > { %4552 = vmatmul.msk.bf16.vlgmr.msrb.gmra.mxu0 %vm655_vm4, %v2155_v34  ;;  %v1808_v26 = vsel %vm5158_vm3, %v1803_v16, %v1807_v17  ;;  %v1823_v34 = vshrl.u32 %v4513_v22, 16  ;;  %v2127_v38 = vunpack.c.l.b16 %v1798_v24  ;;  %v1098_v61 = vrot.slane %v4938_v63, 5  ;;  %v4517_v22 = vld [vmem:[%s5146_s11 + $0x44] sm:$0x1] }
  0x80   : > { %4342 = vmatmul.msk.bf16.gmra.mxu1 %vm655_vm4, %v4847_v35  ;;  %v4360_v35 = vrot.slane %v1020_v29, 9  ;;  %v2128_v1 = vunpack.c.l.b16 %v1808_v26  ;;  %v1816_v51 = vor.u32 %v1815_v40, %v1812_v39  ;;  %v1831_v59 = vrot.slane %v1829_v53, 5  ;;  %v4518_v39 = vld [vmem:[%s5146_s11 + $0x48] sm:$0xf]  ;;  %v4519_v40 = vld [vmem:[%s5146_s11 + $0x4c] sm:$0xf] }
  0x81   : > { %v1825_v44 = vrot.slane %v1823_v34, 4  ;;  %v1834_v3 = vshrl.u32 %v4515_v2, 16  ;;  %v1837_v4 = vshll.u32 %v4515_v2, 16  ;;  %v1843_v5 = vshll.u32 %v4516_v57, 16  ;;  %v4866_v2 = vld [vmem:[%s5146_s11 + $0x3c] sm:$0xff] }
  0x82   : > { %v1092_v46 = vsel %vm5332_vm7, %v4360_v35, %v1091_v23  ;;  %v2157_v50 = vpack.c.b16 %v2128_v1, %v2127_v38  ;;  %v1817_v58 = vrot.slane %v1816_v51, 4  ;;  %v1847_v6 = vshrl.u32 %v4516_v57, 16 }
  0x83   : > { %v1826_v52 = vor.u32 %v1825_v44, %v1821_v41  ;;  %v1188_v54 = vunpack.c.l.b16 %v1092_v46  ;;  %v4361_v10 = vrot.slane %v1021_v62, 9  ;;  %v1100_v11 = vrot.slane %v1098_v61, 4 }
  0x84   : > { %v1822_v8 = vsel %vm5158_vm3, %v1817_v58, %v1821_v41  ;;  %v1836_v14 = vrot.slane %v1834_v3, 4  ;;  %v1839_v15 = vrot.slane %v1837_v4, 5  ;;  %v1845_v16 = vrot.slane %v1843_v5, 5  ;;  %v4520_v4 = vld [vmem:[%s5146_s11 + $0x50] sm:$0x1] }
  0x85   : > { %4375 = vmatmul.msk.bf16.gmra.mxu2 %vm655_vm4, %v1215_v49  ;;  %v1095_v49 = vsel %vm5332_vm7, %v1093_v37, %v1094_v42  ;;  %v1849_v17 = vrot.slane %v1847_v6, 4  ;;  %v1099_v23 = vsel %vm5332_vm7, %v4361_v10, %v1098_v61  ;;  %v1853_v30 = vshll.u32 %v4517_v22, 16 }
  0x86   : > { %v1189_v55 = vunpack.c.l.b16 %v1095_v49  ;;  %v1840_v26 = vor.u32 %v1839_v15, %v1836_v14  ;;  %v1858_v51 = vshrl.u32 %v4518_v39, 16  ;;  %v1867_v53 = vshll.u32 %v4519_v40, 16 }
  0x87   : > { %v1850_v29 = vor.u32 %v1849_v17, %v1845_v16  ;;  %v1855_v1 = vrot.slane %v1853_v30, 5 }
  0x88   : > { %v1217_v60 = vpack.c.b16 %v1189_v55, %v1188_v54  ;;  %v1841_v42 = vrot.slane %v1840_v26, 4  ;;  %v1871_v54 = vshrl.u32 %v4519_v40, 16  ;;  %v1869_v62 = vrot.slane %v1867_v53, 5 }
  0x89   : > { %v1851_v38 = vrot.slane %v1850_v29, 4  ;;  %v1112_v26 = vrot.slane %v5230_v47, 5 }
  0x8a   : > { %4488 = vmatmul.msk.bf16.gmra.mxu3 %vm655_vm4, %v4863_v43  ;;  %v1827_v43 = vrot.slane %v1826_v52, 4  ;;  %v1846_v45 = vsel %vm5158_vm3, %v1841_v42, %v1845_v16  ;;  %v1861_v52 = vshll.u32 %v4518_v39, 16  ;;  %v1873_v3 = vrot.slane %v1871_v54, 4  ;;  %v4523_v54 = vld [vmem:[%s5146_s11 + $0x5c] sm:$0x1] }
  0x8b   : > { %v1856_v46 = vsel %vm5158_vm3, %v1851_v38, %v1855_v1  ;;  %v2131_v55 = vunpack.c.l.b16 %v1846_v45  ;;  %v4867_v1 = vld [vmem:[%s5146_s11 + $0x48] sm:$0xff]  ;;  %v1114_v40 = vrot.slane %v1112_v26, 4 }
  0x8c   : > { %v2132_v57 = vunpack.c.l.b16 %v1856_v46  ;;  %v1863_v61 = vrot.slane %v1861_v52, 5  ;;  %v1874_v10 = vor.u32 %v1873_v3, %v1869_v62 }
  0x8e   : > { %v1875_v16 = vrot.slane %v1874_v10, 4 }
  0x8f   : > { %4553 = vmatmul.msk.bf16.gmra.mxu0 %vm655_vm4, %v2156_v9  ;;  %v1832_v9 = vsel %vm5158_vm3, %v1827_v43, %v1831_v59 }
  0x90   : > { %4343 = vmatmul.msk.bf16.gmra.mxu1 %vm655_vm4, %v4848_v12  ;;  %v1101_v12 = vrot.slane %v4939_v0, 5  ;;  %v2130_v19 = vunpack.c.l.b16 %v1832_v9 }
  0x92   : > { %v1102_v24 = vsel %vm5332_vm7, %v1100_v11, %v1101_v12  ;;  %v1877_v11 = vshll.u32 %v4520_v4, 16  ;;  %v4851_v12 = vld [vmem:[%s5146_s11 + $0x3c] sm:$0xff] }
  0x93   : > { %v1191_v35 = vunpack.c.l.b16 %v1102_v24  ;;  %v4522_v24 = vld [vmem:[%s5146_s11 + $0x58] sm:$0xf]  ;;  %v4524_v4 = vld [vmem:[%s5146_s11 + $0x60] sm:$0xf] }
  0x94   : > { %v1879_v17 = vrot.slane %v1877_v11, 5  ;;  %v1895_v42 = vshrl.u32 %v4522_v24, 16 }
  0x95   : > { %4376 = vmatmul.msk.bf16.gmra.mxu2 %vm655_vm4, %v1216_v28  ;;  %v2129_v28 = vunpack.c.l.b16 %v1822_v8  ;;  %v2159_v8 = vpack.c.b16 %v2132_v57, %v2131_v55 }
  0x96   : > { %v1880_v30 = vsel %vm5158_vm3, %v1875_v16, %v1879_v17  ;;  %v1897_v52 = vrot.slane %v1895_v42, 4 }
  0x97   : > { %v2158_v31 = vpack.c.b16 %v2130_v19, %v2129_v28  ;;  %v2134_v46 = vunpack.c.l.b16 %v1880_v30 }
  0x9a   : > { %4489 = vmatmul.msk.bf16.gmra.mxu3 %vm655_vm4, %v4864_v32  ;;  %v1190_v32 = vunpack.c.l.b16 %v1099_v23  ;;  %v4521_v23 = vld [vmem:[%s5146_s11 + $0x54] sm:$0xf] }
  0x9c   : > { %v1218_v44 = vpack.c.b16 %v1191_v35, %v1190_v32  ;;  %v1885_v32 = vshll.u32 %v4521_v23, 16  ;;  %v1891_v35 = vshll.u32 %v4522_v24, 16 }
  0x9f   : > { %4554 = vmatmul.msk.bf16.gmra.mxu0 %vm655_vm4, %v2157_v50  ;;  %v1105_v50 = vrot.slane %v5186_v20, 5  ;;  %v1860_v20 = vrot.slane %v1858_v51, 4  ;;  %v1893_v51 = vrot.slane %v1891_v35, 5  ;;  %v1122_v35 = vrot.slane %v5281_v27, 5 }
  0xa0   : > { %4344 = vmatmul.msk.bf16.gmra.mxu1 %vm655_vm4, %v4849_v48  ;;  %v1022_v48 = vld [vmem:[%s5146_s11 + $0x3c] sm:$0xe] }
  0xa1   : > { %v4362_v43 = vrot.slane %v1022_v48, 9  ;;  %v1107_v59 = vrot.slane %v1105_v50, 4  ;;  %v1887_v48 = vrot.slane %v1885_v32, 5 }
  0xa3   : > { %v1106_v5 = vsel %vm5332_vm7, %v4362_v43, %v1105_v50  ;;  %v4852_v43 = vld [vmem:[%s5146_s11 + $0x48] sm:$0xff] }
  0xa5   : > { %v5427_v7 = vpop.f32.mrf.mxu1  ;;  %4377 = vmatmul.msk.bf16.gmra.mxu2 %vm655_vm4, %v1217_v60  ;;  %v1108_v60 = vrot.slane %v5191_v25, 5  ;;  %v1864_v25 = vor.u32 %v1863_v61, %v1860_v20  ;;  %v1901_v20 = vshll.u32 %v4523_v54, 16  ;;  %v4853_v54 = vld [vmem:[%s5146_s11 + $0x54] sm:$0xff] }
  0xa7   : > { %v1109_v6 = vsel %vm5332_vm7, %v1107_v59, %v1108_v60  ;;  %v1865_v15 = vrot.slane %v1864_v25, 4  ;;  %v1898_v60 = vor.u32 %v1897_v52, %v1893_v51  ;;  %v1903_v10 = vrot.slane %v1901_v20, 5 }
  0xa8   : > { %v1193_v14 = vunpack.c.l.b16 %v1109_v6 }
  0xa9   : > { %v1870_v29 = vsel %vm5158_vm3, %v1865_v15, %v1869_v62  ;;  %v1899_v25 = vrot.slane %v1898_v60, 4  ;;  %v1119_v15 = vrot.slane %v5276_v21, 5 }
  0xaa   : > { %4490 = vmatmul.msk.bf16.gmra.mxu3 %vm655_vm4, %v4865_v13  ;;  %v1192_v13 = vunpack.c.l.b16 %v1106_v5  ;;  %v2133_v45 = vunpack.c.l.b16 %v1870_v29  ;;  %v4525_v5 = vld [vmem:[%s5146_s11 + $0x64] sm:$0xf] }
  0xab   : > { %v1919_v16 = vshrl.u32 %v4525_v5, 16  ;;  %v1904_v24 = vsel %vm5158_vm3, %v1899_v25, %v1903_v10  ;;  %v1121_v32 = vrot.slane %v1119_v15, 4  ;;  %v4940_v10 = vld [vmem:[%s5146_s11 + $0x64] sm:$0xf] }
  0xac   : > { %v1219_v19 = vpack.c.b16 %v1193_v14, %v1192_v13  ;;  %v2160_v57 = vpack.c.b16 %v2134_v46, %v2133_v45  ;;  %v1909_v13 = vshll.u32 %v4524_v4, 16  ;;  %v1915_v14 = vshll.u32 %v4525_v5, 16 }
  0xad   : > { %v5443_v34 = vpop.f32.mrf.mxu1  ;;  %v1921_v42 = vrot.slane %v1919_v16, 4 }
  0xae   : > { %v1911_v30 = vrot.slane %v1909_v13, 5  ;;  %v1025_v13 = vld [vmem:[%s5146_s11 + $0x60] sm:$0xe] }
  0xaf   : > { %v5445_v37 = vpop.f32.mrf.mxu2  ;;  %4555 = vmatmul.msk.bf16.gmra.mxu0 %vm655_vm4, %v2158_v31  ;;  %v1023_v31 = vld [vmem:[%s5146_s11 + $0x48] sm:$0xe] }
  0xb0   : > { %4345 = vmatmul.msk.bf16.gmra.mxu1 %vm655_vm4, %v4850_v33  ;;  %v1882_v33 = vshrl.u32 %v4521_v23, 16  ;;  %v4363_v47 = vrot.slane %v1023_v31, 9  ;;  %v1917_v31 = vrot.slane %v1915_v14, 5 }
  0xb2   : > { %v5451_v41 = vpop.f32.mrf.mxu0  ;;  %v1884_v50 = vrot.slane %v1882_v33, 4  ;;  %v4868_v33 = vld [vmem:[%s5146_s11 + $0x54] sm:$0xff]  ;;  %v1922_v27 = vor.u32 %v1921_v42, %v1917_v31 }
  0xb3   : > { %v5457_v49 = vpop.f32.mrf.mxu3 }
  0xb4   : > { %v1888_v59 = vor.u32 %v1887_v48, %v1884_v50  ;;  %v1123_v48 = vsel %vm5332_vm7, %v1121_v32, %v1122_v35  ;;  %v1923_v60 = vrot.slane %v1922_v27, 4 }
  0xb5   : > { %4378 = vmatmul.msk.bf16.gmra.mxu2 %vm655_vm4, %v1218_v44  ;;  %v1115_v44 = vrot.slane %v5235_v56, 5 }
  0xb7   : > { %v5463_v58 = vpop.f32.mrf.mxu1  ;;  %v5466_v63 = vpop.f32.mrf.mxu2  ;;  %v1116_v56 = vsel %vm5332_vm7, %v1114_v40, %v1115_v44  ;;  %v4526_v40 = vld [vmem:[%s5146_s11 + $0x68] sm:$0x1] }
  0xb8   : > { %v1195_v62 = vunpack.c.l.b16 %v1116_v56 }
  0xba   : > { %4491 = vmatmul.msk.bf16.gmra.mxu3 %vm655_vm4, %v4866_v2  ;;  %v5474_v9 = vpop.f32.mrf.mxu0  ;;  %v1113_v2 = vsel %vm5332_vm7, %v4363_v47, %v1112_v26  ;;  %v2136_v47 = vunpack.c.l.b16 %v1904_v24 }
  0xbb   : > { %v5476_v0 = vpop.f32.mrf.mxu3  ;;  %v1194_v61 = vunpack.c.l.b16 %v1113_v2 }
  0xbd   : > { %v1220_v11 = vpack.c.b16 %v1195_v62, %v1194_v61  ;;  %v4527_v61 = vld [vmem:[%s5146_s11 + $0x6c] sm:$0xf]  ;;  %v4528_v62 = vld [vmem:[%s5146_s11 + $0x70] sm:$0xf] }
  0xbe   : > { %v1930_v14 = vshrl.u32 %v4527_v61, 16  ;;  %v1939_v16 = vshll.u32 %v4528_v62, 16 }
  0xbf   : > { %4556 = vmatmul.msk.bf16.gmra.mxu0 %vm655_vm4, %v2159_v8  ;;  %v5480_v28 = vpop.f32.mrf.mxu1  ;;  %v1889_v8 = vrot.slane %v1888_v59, 4 }
  0xc0   : > { %4346 = vmatmul.msk.bf16.gmra.mxu1 %vm655_vm4, %v4851_v12  ;;  %v1906_v12 = vshrl.u32 %v4524_v4, 16  ;;  %v1932_v35 = vrot.slane %v1930_v14, 4  ;;  %v4531_v14 = vld [vmem:[%s5146_s11 + $0x7c] sm:$0xf] }
  0xc1   : > { %v1894_v23 = vsel %vm5158_vm3, %v1889_v8, %v1893_v51  ;;  %v1925_v51 = vshll.u32 %v4526_v40, 16 }
  0xc2   : > { %v5483_v22 = vpop.f32.mrf.mxu2  ;;  %v1908_v29 = vrot.slane %v1906_v12, 4 }
  0xc3   : > { %v1927_v20 = vrot.slane %v1925_v51, 5 }
  0xc4   : > { %v1912_v46 = vor.u32 %v1911_v30, %v1908_v29  ;;  %v4869_v30 = vld [vmem:[%s5146_s11 + $0x60] sm:$0xff] }
  0xc5   : > { %4379 = vmatmul.msk.bf16.gmra.mxu2 %vm655_vm4, %v1219_v19  ;;  %v1024_v19 = vld [vmem:[%s5146_s11 + $0x54] sm:$0xe]  ;;  %v1928_v25 = vsel %vm5158_vm3, %v1923_v60, %v1927_v20 }
  0xc6   : > { %v5493_v38 = vpop.f32.mrf.mxu0  ;;  %v4364_v21 = vrot.slane %v1024_v19, 9  ;;  %v1913_v59 = vrot.slane %v1912_v46, 4  ;;  %v1943_v19 = vshrl.u32 %v4528_v62, 16  ;;  %v4529_v46 = vld [vmem:[%s5146_s11 + $0x74] sm:$0x1] }
  0xc7   : > { %v5497_v39 = vpop.f32.mrf.mxu3 }
  0xc8   : > { %v1120_v50 = vsel %vm5332_vm7, %v4364_v21, %v1119_v15  ;;  %v1918_v8 = vsel %vm5158_vm3, %v1913_v59, %v1917_v31  ;;  %v1933_v15 = vshll.u32 %v4527_v61, 16  ;;  %v4365_v21 = vrot.slane %v1025_v13, 9  ;;  %v4530_v13 = vld [vmem:[%s5146_s11 + $0x78] sm:$0xf] }
  0xc9   : > { %v5500_v53 = vpop.f32.mrf.mxu1  ;;  %v1196_v56 = vunpack.c.l.b16 %v1120_v50  ;;  %v2137_v31 = vunpack.c.l.b16 %v1918_v8 }
  0xca   : > { %4492 = vmatmul.msk.bf16.gmra.mxu3 %vm655_vm4, %v4867_v1  ;;  %v5504_v55 = vpop.f32.mrf.mxu2  ;;  %v2135_v1 = vunpack.c.l.b16 %v1894_v23  ;;  %v4941_v23 = vld [vmem:[%s5146_s11 + $0x68] sm:$0x1]  ;;  %v1935_v42 = vrot.slane %v1933_v15, 5  ;;  %v4942_v15 = vld [vmem:[%s5146_s11 + $0x70] sm:$0xf] }
  0xcb   : > { %v1129_v24 = vrot.slane %v4941_v23, 5  ;;  %v1026_v23 = vld [vmem:[%s5146_s11 + $0x6c] sm:$0xe] }
  0xcc   : > { %v2161_v52 = vpack.c.b16 %v2136_v47, %v2135_v1  ;;  %v1941_v1 = vrot.slane %v1939_v16, 5  ;;  %v1945_v47 = vrot.slane %v1943_v19, 4  ;;  %v1936_v51 = vor.u32 %v1935_v42, %v1932_v35  ;;  %v4943_v42 = vld [vmem:[%s5146_s11 + $0x74] sm:$0x1] }
  0xcd   : > { %v1133_v16 = vrot.slane %v4942_v15, 5 }
  0xce   : > { %v5511_v3 = vpop.f32.mrf.mxu0 }
  0xcf   : > { %4557 = vmatmul.msk.bf16.gmra.mxu0 %vm655_vm4, %v2160_v57  ;;  %v5516_v6 = vpop.f32.mrf.mxu3  ;;  %v1197_v57 = vunpack.c.l.b16 %v1123_v48 }
  0xd0   : > { %4347 = vmatmul.msk.bf16.gmra.mxu1 %vm655_vm4, %v4852_v43 }
  0xd1   : > { %v5520_v17 = vpop.f32.mrf.mxu1  ;;  %v1221_v4 = vpack.c.b16 %v1197_v57, %v1196_v56  ;;  %v4854_v57 = vld [vmem:[%s5146_s11 + $0x60] sm:$0xff] }
  0xd5   : > { %v5527_v26 = vpop.f32.mrf.mxu2  ;;  %4380 = vmatmul.msk.bf16.gmra.mxu2 %vm655_vm4, %v1220_v11  ;;  %v1126_v11 = vrot.slane %v4940_v10, 5 }
  0xd7   : > { %v1128_v32 = vrot.slane %v1126_v11, 4  ;;  %v1127_v50 = vsel %vm5332_vm7, %v4365_v21, %v1126_v11  ;;  %v1967_v21 = vshrl.u32 %v4531_v14, 16 }
  0xd8   : > { %v5533_v44 = vpop.f32.mrf.mxu0  ;;  %v1198_v20 = vunpack.c.l.b16 %v1127_v50  ;;  %v4366_v50 = vrot.slane %v1026_v23, 9 }
  0xd9   : > { %v5535_v45 = vpop.f32.mrf.mxu3  ;;  %v1130_v48 = vsel %vm5332_vm7, %v1128_v32, %v1129_v24 }
  0xda   : > { %4493 = vmatmul.msk.bf16.gmra.mxu3 %vm655_vm4, %v4868_v33  ;;  %v2138_v33 = vunpack.c.l.b16 %v1928_v25  ;;  %v1199_v61 = vunpack.c.l.b16 %v1130_v48  ;;  %v1135_v48 = vrot.slane %v1133_v16, 4 }
  0xdc   : > { %v2162_v27 = vpack.c.b16 %v2138_v33, %v2137_v31  ;;  %v1222_v11 = vpack.c.b16 %v1199_v61, %v1198_v20  ;;  %v1957_v31 = vshll.u32 %v4530_v13, 16  ;;  %v1963_v33 = vshll.u32 %v4531_v14, 16 }
  0xdd   : > { %v5543_v2 = vpop.f32.mrf.mxu1  ;;  %v5545_v43 = vpop.f32.mrf.mxu2  ;;  %v1969_v20 = vrot.slane %v1967_v21, 4 }
  0xdf   : > { %4558 = vmatmul.msk.bf16.gmra.mxu0 %vm655_vm4, %v2161_v52  ;;  %v1946_v52 = vor.u32 %v1945_v47, %v1941_v1  ;;  %v1136_v47 = vrot.slane %v4943_v42, 5 }
  0xe0   : > { %4348 = vmatmul.msk.bf16.gmra.mxu1 %vm655_vm4, %v4853_v54  ;;  %v5551_v5 = vpop.f32.mrf.mxu0  ;;  %v1949_v54 = vshll.u32 %v4529_v46, 16  ;;  %v4870_v46 = vld [vmem:[%s5146_s11 + $0x6c] sm:$0xff] }
  0xe1   : > { %v5558_v12 = vpop.f32.mrf.mxu3  ;;  %v1947_v8 = vrot.slane %v1946_v52, 4 }
  0xe2   : > { %v1951_v25 = vrot.slane %v1949_v54, 5 }
  0xe5   : > { %4381 = vmatmul.msk.bf16.gmra.mxu2 %vm655_vm4, %v1221_v4  ;;  %v5563_v29 = vpop.f32.mrf.mxu1  ;;  %v1937_v4 = vrot.slane %v1936_v51, 4 }
  0xe7   : > { %v1942_v19 = vsel %vm5158_vm3, %v1937_v4, %v1941_v1  ;;  %v4532_v4 = vld [vmem:[%s5146_s11 + $0x80] sm:$0x1] }
  0xe8   : > { %v5566_v40 = vpop.f32.mrf.mxu2 }
  0xea   : > { %4494 = vmatmul.msk.bf16.gmra.mxu3 %vm655_vm4, %v4869_v30  ;;  %v1954_v30 = vshrl.u32 %v4530_v13, 16  ;;  %v4855_v13 = vld [vmem:[%s5146_s11 + $0x6c] sm:$0xff] }
  0xec   : > { %v5574_v56 = vpop.f32.mrf.mxu0  ;;  %v1956_v54 = vrot.slane %v1954_v30, 4 }
  0xed   : > { %v5577_v59 = vpop.f32.mrf.mxu3  ;;  %v937_v60 = vpop.f32.mrf.mxu1 }
  0xee   : > { %v938_v62 = vadd.f32 %v937_v60, %v5451_v41  ;;  %v1952_v41 = vsel %vm5158_vm3, %v1947_v8, %v1951_v25  ;;  %v1965_v60 = vrot.slane %v1963_v33, 5  ;;  %v1134_v8 = vsel %vm5332_vm7, %v4366_v50, %v1133_v16 }
  0xef   : > { %4559 = vmatmul.msk.bf16.gmra.mxu0 %vm655_vm4, %v2162_v27  ;;  %v2139_v27 = vunpack.c.l.b16 %v1942_v19  ;;  %v2140_v51 = vunpack.c.l.b16 %v1952_v41  ;;  %v1973_v19 = vshll.u32 %v4532_v4, 16 }
  0xf0   : > { %v5581_v10 = vpop.f32.mrf.mxu2  ;;  %4349 = vmatmul.msk.bf16.gmra.mxu1 %vm655_vm4, %v4854_v57  ;;  %v1959_v57 = vrot.slane %v1957_v31, 5  ;;  %v1970_v15 = vor.u32 %v1969_v20, %v1965_v60 }
  0xf1   : > { %v2163_v25 = vpack.c.b16 %v2140_v51, %v2139_v27  ;;  %v1975_v42 = vrot.slane %v1973_v19, 5  ;;  %v4534_v27 = vld [vmem:[%s5146_s11 + $0x88] sm:$0xf]  ;;  %v4944_v51 = vld [vmem:[%s5146_s11 + $0x7c] sm:$0xf] }
  0xf2   : > { %v1960_v14 = vor.u32 %v1959_v57, %v1956_v54  ;;  %v1027_v54 = vld [vmem:[%s5146_s11 + $0x78] sm:$0xe] }
  0xf4   : > { %v5592_v24 = vpop.f32.mrf.mxu0  ;;  %v1961_v21 = vrot.slane %v1960_v14, 4 }
  0xf5   : > { %v5594_v32 = vpop.f32.mrf.mxu3  ;;  %4382 = vmatmul.msk.bf16.gmra.mxu2 %vm655_vm4, %v1222_v11  ;;  %v939_v35 = vpop.f32.mrf.mxu1 }
  0xf6   : > { %v940_v1 = vadd.f32 %v939_v35, %v5474_v9  ;;  %v1137_v9 = vsel %vm5332_vm7, %v1135_v48, %v1136_v47  ;;  %v1971_v35 = vrot.slane %v1970_v15, 4  ;;  %v4533_v47 = vld [vmem:[%s5146_s11 + $0x84] sm:$0xf]  ;;  %v4871_v15 = vld [vmem:[%s5146_s11 + $0x78] sm:$0xff] }
  0xf7   : > { %v1201_v30 = vunpack.c.l.b16 %v1137_v9  ;;  %v1981_v57 = vshll.u32 %v4533_v47, 16  ;;  %v1991_v9 = vshrl.u32 %v4534_v27, 16 }
  0xf8   : > { %v1290_v52 = vpop.f32.mrf.mxu2  ;;  %v1976_v4 = vsel %vm5158_vm3, %v1971_v35, %v1975_v42 }
  0xf9   : > { %v1370_v61 = vadd.f32 %v1290_v52, %v938_v62  ;;  %v1200_v62 = vunpack.c.l.b16 %v1134_v8  ;;  %v1140_v52 = vrot.slane %v4944_v51, 5  ;;  %v1987_v8 = vshll.u32 %v4534_v27, 16 }
  0xfa   : > { %4495 = vmatmul.msk.bf16.gmra.mxu3 %vm655_vm4, %v4870_v46  ;;  %v1993_v35 = vrot.slane %v1991_v9, 4 }
  0xfb   : > { %v1223_v48 = vpack.c.b16 %v1201_v30, %v1200_v62 }
  0xfc   : > { %v2231_v11 = vpop.f32.mrf.mxu0 }
  0xfd   : > { %v1577_v41 = vpop.f32.mrf.mxu3  ;;  %v942_v23 = vpop.f32.mrf.mxu1 }
  0xfe   : > { %v1657_v31 = vadd.f32 %v1577_v41, %v1370_v61  ;;  %v943_v16 = vadd.f32 %v942_v23, %v5493_v38  ;;  %v1978_v38 = vshrl.u32 %v4533_v47, 16  ;;  %v1966_v61 = vsel %vm5158_vm3, %v1961_v21, %v1965_v60 }
  0xff   : > { %4560 = vmatmul.msk.bf16.gmra.mxu0 %vm655_vm4, %v2163_v25  ;;  %v4945_v25 = vld [vmem:[%s5146_s11 + $0x80] sm:$0x1]  ;;  %v4367_v41 = vrot.slane %v1027_v54, 9  ;;  %v1142_v23 = vrot.slane %v1140_v52, 4  ;;  %v2141_v62 = vunpack.c.l.b16 %v1966_v61  ;;  %v2142_v60 = vunpack.c.l.b16 %v1976_v4 }
 0x100   : > { %v1292_v33 = vpop.f32.mrf.mxu2  ;;  %4350 = vmatmul.msk.bf16.gmra.mxu1 %vm655_vm4, %v4855_v13  ;;  %v5611_v46 = vadd.f32 %v2231_v11, %v1657_v31  ;;  %v1143_v11 = vrot.slane %v4945_v25, 5  ;;  %v1980_v30 = vrot.slane %v1978_v38, 4  ;;  %v1983_v31 = vrot.slane %v1981_v57, 5  ;;  %v4856_v38 = vld [vmem:[%s5146_s11 + $0x78] sm:$0xff] }
 0x101   : > { %v1371_v50 = vadd.f32 %v1292_v33, %v940_v1  ;;  %v1989_v21 = vrot.slane %v1987_v8, 5  ;;  %v2164_v27 = vpack.c.b16 %v2142_v60, %v2141_v62  ;;  %v4537_v62 = vld [vmem:[%s5146_s11 + $0x94] sm:$0xf]  ;;  %v4946_v60 = vld [vmem:[%s5146_s11 + $0x88] sm:$0xf] }
 0x102   : > { %v1984_v51 = vor.u32 %v1983_v31, %v1980_v30  ;;  %v1147_v30 = vrot.slane %v4946_v60, 5  ;;  %v1028_v31 = vld [vmem:[%s5146_s11 + $0x84] sm:$0xe] }
 0x103   : > { %v1994_v57 = vor.u32 %v1993_v35, %v1989_v21 }
 0x104   : > { %v2233_v20 = vpop.f32.mrf.mxu0  ;;  %v1985_v25 = vrot.slane %v1984_v51, 4 }
 0x105   : > { %v1579_v1 = vpop.f32.mrf.mxu3  ;;  %4383 = vmatmul.msk.bf16.gmra.mxu2 %vm655_vm4, %v1223_v48  ;;  %v944_v13 = vpop.f32.mrf.mxu1  ;;  %v4535_v48 = vld [vmem:[%s5146_s11 + $0x8c] sm:$0x1] }
 0x106   : > { %v1658_v14 = vadd.f32 %v1579_v1, %v1371_v50  ;;  %v945_v19 = vadd.f32 %v944_v13, %v5511_v3  ;;  %v1141_v50 = vsel %vm5332_vm7, %v4367_v41, %v1140_v52  ;;  %v1144_v3 = vsel %vm5332_vm7, %v1142_v23, %v1143_v11 }
 0x107   : > { %v1997_v61 = vshll.u32 %v4535_v48, 16  ;;  %v1203_v8 = vunpack.c.l.b16 %v1144_v3  ;;  %v1995_v1 = vrot.slane %v1994_v57, 4  ;;  %v2015_v3 = vshrl.u32 %v4537_v62, 16  ;;  %v4872_v57 = vld [vmem:[%s5146_s11 + $0x84] sm:$0xff] }
 0x108   : > { %v1295_v33 = vpop.f32.mrf.mxu2  ;;  %v5624_v42 = vadd.f32 %v2233_v20, %v1658_v14  ;;  %v4536_v14 = vld [vmem:[%s5146_s11 + $0x90] sm:$0xf] }
 0x109   : > { %v1372_v47 = vadd.f32 %v1295_v33, %v943_v16  ;;  %v1202_v16 = vunpack.c.l.b16 %v1141_v50  ;;  %v1999_v13 = vrot.slane %v1997_v61, 5  ;;  %v2002_v33 = vshrl.u32 %v4536_v14, 16 }
 0x10a   : > { %4496 = vmatmul.msk.bf16.gmra.mxu3 %vm655_vm4, %v4871_v15  ;;  %v2005_v48 = vshll.u32 %v4536_v14, 16  ;;  %v2011_v50 = vshll.u32 %v4537_v62, 16  ;;  %v4368_v61 = vrot.slane %v1028_v31, 9 }
 0x10b   : > { %v1224_v23 = vpack.c.b16 %v1203_v8, %v1202_v16  ;;  %v2004_v8 = vrot.slane %v2002_v33, 4 }
 0x10c   : > { %v2236_v54 = vpop.f32.mrf.mxu0 }
 0x10d   : > { %v1582_v4 = vpop.f32.mrf.mxu3  ;;  %v947_v20 = vpop.f32.mrf.mxu1 }
 0x10e   : > { %v1659_v9 = vadd.f32 %v1582_v4, %v1372_v47  ;;  %v948_v52 = vadd.f32 %v947_v20, %v5533_v44  ;;  %v1990_v44 = vsel %vm5158_vm3, %v1985_v25, %v1989_v21  ;;  %v2000_v47 = vsel %vm5158_vm3, %v1995_v1, %v1999_v13 }
 0x10f   : > { %4561 = vmatmul.msk.bf16.gmra.mxu0 %vm655_vm4, %v2164_v27  ;;  %v4947_v27 = vld [vmem:[%s5146_s11 + $0x8c] sm:$0x1]  ;;  %v1149_v4 = vrot.slane %v1147_v30, 4  ;;  %v2143_v20 = vunpack.c.l.b16 %v1990_v44  ;;  %v2144_v16 = vunpack.c.l.b16 %v2000_v47  ;;  %v2007_v25 = vrot.slane %v2005_v48, 5  ;;  %v4857_v44 = vld [vmem:[%s5146_s11 + $0x84] sm:$0xff] }
 0x110   : > { %v1297_v11 = vpop.f32.mrf.mxu2  ;;  %4351 = vmatmul.msk.bf16.gmra.mxu1 %vm655_vm4, %v4856_v38  ;;  %v5637_v15 = vadd.f32 %v2236_v54, %v1659_v9  ;;  %v1150_v51 = vrot.slane %v4947_v27, 5  ;;  %v2017_v1 = vrot.slane %v2015_v3, 4 }
 0x111   : > { %v1373_v41 = vadd.f32 %v1297_v11, %v945_v19  ;;  %v2013_v11 = vrot.slane %v2011_v50, 5  ;;  %v2165_v62 = vpack.c.b16 %v2144_v16, %v2143_v20  ;;  %v2008_v31 = vor.u32 %v2007_v25, %v2004_v8  ;;  %v4540_v20 = vld [vmem:[%s5146_s11 + $0xa0] sm:$0xf]  ;;  %v1029_v25 = vld [vmem:[%s5146_s11 + $0x90] sm:$0xe] }
 0x113   : > { %v2018_v33 = vor.u32 %v2017_v1, %v2013_v11 }
 0x114   : > { %v2238_v35 = vpop.f32.mrf.mxu0 }
 0x115   : > { %v1584_v19 = vpop.f32.mrf.mxu3  ;;  %4384 = vmatmul.msk.bf16.gmra.mxu2 %vm655_vm4, %v1224_v23  ;;  %v949_v54 = vpop.f32.mrf.mxu1  ;;  %v4538_v23 = vld [vmem:[%s5146_s11 + $0x98] sm:$0x1] }
 0x116   : > { %v1660_v38 = vadd.f32 %v1584_v19, %v1373_v41  ;;  %v950_v21 = vadd.f32 %v949_v54, %v5551_v5  ;;  %v1148_v5 = vsel %vm5332_vm7, %v4368_v61, %v1147_v30  ;;  %v1151_v41 = vsel %vm5332_vm7, %v1149_v4, %v1150_v51  ;;  %v4539_v30 = vld [vmem:[%s5146_s11 + $0x9c] sm:$0xf] }
 0x117   : > { %v2021_v47 = vshll.u32 %v4538_v23, 16  ;;  %v1205_v50 = vunpack.c.l.b16 %v1151_v41  ;;  %v2009_v19 = vrot.slane %v2008_v31, 4  ;;  %v2019_v54 = vrot.slane %v2018_v33, 4 }
 0x118   : > { %v1300_v9 = vpop.f32.mrf.mxu2  ;;  %v5650_v13 = vadd.f32 %v2238_v35, %v1660_v38  ;;  %v2026_v16 = vshrl.u32 %v4539_v30, 16  ;;  %v2029_v8 = vshll.u32 %v4539_v30, 16  ;;  %v2039_v41 = vshrl.u32 %v4540_v20, 16 }
 0x119   : > { %v1374_v14 = vadd.f32 %v1300_v9, %v948_v52  ;;  %v1204_v52 = vunpack.c.l.b16 %v1148_v5  ;;  %v2023_v38 = vrot.slane %v2021_v47, 5  ;;  %v4948_v9 = vld [vmem:[%s5146_s11 + $0x94] sm:$0xf]  ;;  %v2035_v5 = vshll.u32 %v4540_v20, 16 }
 0x11a   : > { %4497 = vmatmul.msk.bf16.gmra.mxu3 %vm655_vm4, %v4872_v57  ;;  %v2028_v31 = vrot.slane %v2026_v16, 4  ;;  %v2031_v33 = vrot.slane %v2029_v8, 5 }
 0x11b   : > { %v1225_v4 = vpack.c.b16 %v1205_v50, %v1204_v52  ;;  %v2024_v23 = vsel %vm5158_vm3, %v2019_v54, %v2023_v38  ;;  %v4369_v52 = vrot.slane %v1029_v25, 9 }
 0x11c   : > { %v2241_v60 = vpop.f32.mrf.mxu0  ;;  %v2032_v20 = vor.u32 %v2031_v33, %v2028_v31  ;;  %v4543_v31 = vld [vmem:[%s5146_s11 + $0xac] sm:$0xf] }
 0x11d   : > { %v1587_v48 = vpop.f32.mrf.mxu3  ;;  %v952_v35 = vpop.f32.mrf.mxu1 }
 0x11e   : > { %v1661_v3 = vadd.f32 %v1587_v48, %v1374_v14  ;;  %v953_v27 = vadd.f32 %v952_v35, %v5574_v56  ;;  %v1154_v56 = vrot.slane %v4948_v9, 5  ;;  %v2014_v14 = vsel %vm5158_vm3, %v2009_v19, %v2013_v11  ;;  %v4873_v48 = vld [vmem:[%s5146_s11 + $0x90] sm:$0xff] }
 0x11f   : > { %4562 = vmatmul.msk.bf16.gmra.mxu0 %vm655_vm4, %v2165_v62  ;;  %v4949_v62 = vld [vmem:[%s5146_s11 + $0x98] sm:$0x1]  ;;  %v2145_v50 = vunpack.c.l.b16 %v2014_v14  ;;  %v2041_v19 = vrot.slane %v2039_v41, 4  ;;  %v4858_v9 = vld [vmem:[%s5146_s11 + $0x90] sm:$0xff] }
 0x120   : > { %v1302_v51 = vpop.f32.mrf.mxu2  ;;  %4352 = vmatmul.msk.bf16.gmra.mxu1 %vm655_vm4, %v4857_v44  ;;  %v5663_v57 = vadd.f32 %v2241_v60, %v1661_v3  ;;  %v1157_v60 = vrot.slane %v4949_v62, 5  ;;  %v1156_v11 = vrot.slane %v1154_v56, 4  ;;  %v2146_v3 = vunpack.c.l.b16 %v2024_v23 }
 0x121   : > { %v1375_v61 = vadd.f32 %v1302_v51, %v950_v21  ;;  %v2037_v51 = vrot.slane %v2035_v5, 5  ;;  %v2033_v62 = vrot.slane %v2032_v20, 4  ;;  %v4951_v20 = vld [vmem:[%s5146_s11 + $0xa4] sm:$0x1] }
 0x122   : > { %v2166_v16 = vpack.c.b16 %v2146_v3, %v2145_v50  ;;  %v4950_v50 = vld [vmem:[%s5146_s11 + $0xa0] sm:$0xf] }
 0x123   : > { %v2042_v25 = vor.u32 %v2041_v19, %v2037_v51  ;;  %v1161_v3 = vrot.slane %v4950_v50, 5  ;;  %v1030_v19 = vld [vmem:[%s5146_s11 + $0x9c] sm:$0xe] }
 0x124   : > { %v2243_v1 = vpop.f32.mrf.mxu0 }
 0x125   : > { %v1589_v21 = vpop.f32.mrf.mxu3  ;;  %4385 = vmatmul.msk.bf16.gmra.mxu2 %vm655_vm4, %v1225_v4  ;;  %v954_v44 = vpop.f32.mrf.mxu1  ;;  %v4541_v4 = vld [vmem:[%s5146_s11 + $0xa4] sm:$0x1] }
 0x126   : > { %v1662_v47 = vadd.f32 %v1589_v21, %v1375_v61  ;;  %v955_v35 = vadd.f32 %v954_v44, %v5592_v24  ;;  %v1155_v61 = vsel %vm5332_vm7, %v4369_v52, %v1154_v56  ;;  %v1158_v24 = vsel %vm5332_vm7, %v1156_v11, %v1157_v60  ;;  %v4542_v21 = vld [vmem:[%s5146_s11 + $0xa8] sm:$0xf] }
 0x127   : > { %v2045_v14 = vshll.u32 %v4541_v4, 16  ;;  %v1207_v5 = vunpack.c.l.b16 %v1158_v24  ;;  %v2043_v60 = vrot.slane %v2042_v25, 4  ;;  %v2050_v52 = vshrl.u32 %v4542_v21, 16 }
 0x128   : > { %v1305_v30 = vpop.f32.mrf.mxu2  ;;  %v5676_v54 = vadd.f32 %v2243_v1, %v1662_v47  ;;  %v2038_v11 = vsel %vm5158_vm3, %v2033_v62, %v2037_v51  ;;  %v2063_v4 = vshrl.u32 %v4543_v31, 16 }
 0x129   : > { %v1376_v38 = vadd.f32 %v1305_v30, %v953_v27  ;;  %v1206_v27 = vunpack.c.l.b16 %v1155_v61  ;;  %v2047_v44 = vrot.slane %v2045_v14, 5  ;;  %v2053_v30 = vshll.u32 %v4542_v21, 16  ;;  %v4874_v14 = vld [vmem:[%s5146_s11 + $0x9c] sm:$0xff] }
 0x12a   : > { %4498 = vmatmul.msk.bf16.gmra.mxu3 %vm655_vm4, %v4873_v48  ;;  %v2052_v51 = vrot.slane %v2050_v52, 4 }
 0x12b   : > { %v1226_v48 = vpack.c.b16 %v1207_v5, %v1206_v27  ;;  %v2048_v24 = vsel %vm5158_vm3, %v2043_v60, %v2047_v44  ;;  %v1163_v27 = vrot.slane %v1161_v3, 4  ;;  %v2055_v5 = vrot.slane %v2053_v30, 5  ;;  %v4544_v44 = vld [vmem:[%s5146_s11 + $0xb0] sm:$0x1] }
 0x12c   : > { %v2246_v8 = vpop.f32.mrf.mxu0  ;;  %v2148_v62 = vunpack.c.l.b16 %v2048_v24 }
 0x12d   : > { %v1592_v1 = vpop.f32.mrf.mxu3  ;;  %v957_v23 = vpop.f32.mrf.mxu1  ;;  %v2056_v52 = vor.u32 %v2055_v5, %v2052_v51 }
 0x12e   : > { %v1663_v41 = vadd.f32 %v1592_v1, %v1376_v38  ;;  %v2059_v38 = vshll.u32 %v4543_v31, 16  ;;  %v4370_v1 = vrot.slane %v1030_v19, 9  ;;  %v4859_v19 = vld [vmem:[%s5146_s11 + $0x9c] sm:$0xff] }
 0x12f   : > { %4563 = vmatmul.msk.bf16.gmra.mxu0 %vm655_vm4, %v2166_v16  ;;  %v1164_v16 = vrot.slane %v4951_v20, 5 }
 0x130   : > { %v1307_v56 = vpop.f32.mrf.mxu2  ;;  %4353 = vmatmul.msk.bf16.gmra.mxu1 %vm655_vm4, %v4858_v9  ;;  %v5689_v33 = vadd.f32 %v2246_v8, %v1663_v41  ;;  %v2147_v8 = vunpack.c.l.b16 %v2038_v11  ;;  %v958_v41 = vadd.f32 %v957_v23, %v5427_v7  ;;  %v2061_v21 = vrot.slane %v2059_v38, 5 }
 0x131   : > { %v1377_v47 = vadd.f32 %v1307_v56, %v955_v35  ;;  %v2065_v56 = vrot.slane %v2063_v4, 4  ;;  %v2069_v11 = vshll.u32 %v4544_v44, 16 }
 0x132   : > { %v2167_v7 = vpack.c.b16 %v2148_v62, %v2147_v8  ;;  %v4545_v8 = vld [vmem:[%s5146_s11 + $0xb4] sm:$0xf] }
 0x133   : > { %v2066_v23 = vor.u32 %v2065_v56, %v2061_v21  ;;  %v2071_v51 = vrot.slane %v2069_v11, 5  ;;  %v2077_v44 = vshll.u32 %v4545_v8, 16 }
 0x134   : > { %v2248_v61 = vpop.f32.mrf.mxu0 }
 0x135   : > { %v1594_v35 = vpop.f32.mrf.mxu3  ;;  %4386 = vmatmul.msk.bf16.gmra.mxu2 %vm655_vm4, %v1226_v48  ;;  %v959_v9 = vpop.f32.mrf.mxu1  ;;  %v1165_v48 = vsel %vm5332_vm7, %v1163_v27, %v1164_v16  ;;  %v2067_v16 = vrot.slane %v2066_v23, 4 }
 0x136   : > { %v1664_v25 = vadd.f32 %v1594_v35, %v1377_v47  ;;  %v1162_v47 = vsel %vm5332_vm7, %v4370_v1, %v1161_v3  ;;  %v1209_v24 = vunpack.c.l.b16 %v1165_v48  ;;  %v2057_v35 = vrot.slane %v2056_v52, 4  ;;  %v4953_v52 = vld [vmem:[%s5146_s11 + $0xb0] sm:$0x1] }
 0x137   : > { %v960_v3 = vadd.f32 %v959_v9, %v5443_v34  ;;  %v2074_v34 = vshrl.u32 %v4545_v8, 16  ;;  %v2072_v9 = vsel %vm5158_vm3, %v2067_v16, %v2071_v51 }
 0x138   : > { %v1310_v60 = vpop.f32.mrf.mxu2  ;;  %v5702_v31 = vadd.f32 %v2248_v61, %v1664_v25  ;;  %v1208_v61 = vunpack.c.l.b16 %v1162_v47  ;;  %v2062_v56 = vsel %vm5158_vm3, %v2057_v35, %v2061_v21 }
 0x139   : > { %v1378_v50 = vadd.f32 %v1310_v60, %v958_v41  ;;  %v4952_v41 = vld [vmem:[%s5146_s11 + $0xac] sm:$0xf]  ;;  %v1031_v60 = vld [vmem:[%s5146_s11 + $0xa8] sm:$0xe] }
 0x13a   : > { %4499 = vmatmul.msk.bf16.gmra.mxu3 %vm655_vm4, %v4874_v14  ;;  %v4546_v14 = vld [vmem:[%s5146_s11 + $0xb8] sm:$0xf]  ;;  %v1227_v5 = vpack.c.b16 %v1209_v24, %v1208_v61  ;;  %v1168_v62 = vrot.slane %v4952_v41, 5  ;;  %v2149_v61 = vunpack.c.l.b16 %v2062_v56  ;;  %v2150_v24 = vunpack.c.l.b16 %v2072_v9  ;;  %v4547_v41 = vld [vmem:[%s5146_s11 + $0xbc] sm:$0x1] }
 0x13b   : > { %v2087_v47 = vshrl.u32 %v4546_v14, 16 }
 0x13c   : > { %v2251_v30 = vpop.f32.mrf.mxu0 }
 0x13d   : > { %v1597_v38 = vpop.f32.mrf.mxu3  ;;  %v962_v4 = vpop.f32.mrf.mxu1  ;;  %v2089_v51 = vrot.slane %v2087_v47, 4 }
 0x13e   : > { %v1665_v20 = vadd.f32 %v1597_v38, %v1378_v50  ;;  %v2083_v50 = vshll.u32 %v4546_v14, 16  ;;  %v4875_v38 = vld [vmem:[%s5146_s11 + $0xa8] sm:$0xff]  ;;  %v963_v35 = vadd.f32 %v962_v4, %v5463_v58  ;;  %v2168_v58 = vpack.c.b16 %v2150_v24, %v2149_v61 }
 0x13f   : > { %4564 = vmatmul.msk.bf16.gmra.mxu0 %vm655_vm4, %v2167_v7  ;;  %v1171_v7 = vrot.slane %v4953_v52, 5 }
 0x140   : > { %v1312_v25 = vpop.f32.mrf.mxu2  ;;  %4354 = vmatmul.msk.bf16.gmra.mxu1 %vm655_vm4, %v4859_v19  ;;  %v5715_v1 = vadd.f32 %v2251_v30, %v1665_v20  ;;  %v4371_v30 = vrot.slane %v1031_v60, 9  ;;  %v1170_v19 = vrot.slane %v1168_v62, 4  ;;  %v2076_v20 = vrot.slane %v2074_v34, 4  ;;  %v4860_v34 = vld [vmem:[%s5146_s11 + $0xa8] sm:$0xff] }
 0x141   : > { %v1379_v27 = vadd.f32 %v1312_v25, %v960_v3  ;;  %v2079_v3 = vrot.slane %v2077_v44, 5  ;;  %v5727_v16 = vrot.slane %v2083_v50, 5  ;;  %v2093_v50 = vshll.u32 %v4547_v41, 16 }
 0x143   : > { %v2080_v4 = vor.u32 %v2079_v3, %v2076_v20  ;;  %v2090_v56 = vor.u32 %v2089_v51, %v5727_v16  ;;  %v2095_v20 = vrot.slane %v2093_v50, 5 }
 0x144   : > { %v2253_v48 = vpop.f32.mrf.mxu0 }
 0x145   : > { %v1599_v23 = vpop.f32.mrf.mxu3  ;;  %4387 = vmatmul.msk.bf16.gmra.mxu2 %vm655_vm4, %v1227_v5  ;;  %v964_v11 = vpop.f32.mrf.mxu1  ;;  %v1169_v5 = vsel %vm5332_vm7, %v4371_v30, %v1168_v62  ;;  %v4548_v62 = vld [vmem:[%s5146_s11 + $0xc0] sm:$0xf]  ;;  %v4954_v30 = vld [vmem:[%s5146_s11 + $0x10] sm:$0xf] }
 0x146   : > { %v1666_v21 = vadd.f32 %v1599_v23, %v1379_v27  ;;  %v1172_v27 = vsel %vm5332_vm7, %v1170_v19, %v1171_v7  ;;  %v1210_v9 = vunpack.c.l.b16 %v1169_v5  ;;  %v4549_v23 = vld [vmem:[%s5146_s11 + $0xc4] sm:$0xf]  ;;  %v2409_v7 = vrot.slane %v4954_v30, 5 }
 0x147   : > { %v1211_v44 = vunpack.c.l.b16 %v1172_v27  ;;  %v965_v19 = vadd.f32 %v964_v11, %v5480_v28  ;;  %v2101_v3 = vshll.u32 %v4548_v62, 16  ;;  %v4955_v27 = vld [vmem:[%s5146_s11 + $0xb8] sm:$0xf]  ;;  %v1032_v11 = vld [vmem:[%s5146_s11 + $0xb4] sm:$0xe] }
 0x148   : > { %v1315_v8 = vpop.f32.mrf.mxu2  ;;  %v5729_v25 = vadd.f32 %v2253_v48, %v1666_v21  ;;  %v2081_v21 = vrot.slane %v2080_v4, 4  ;;  %v1175_v41 = vrot.slane %v4955_v27, 5  ;;  %v2411_v4 = vrot.slane %v2409_v7, 4  ;;  %v4876_v27 = vld [vmem:[%s5146_s11 + $0xb4] sm:$0xff] }
 0x149   : > { %v1380_v14 = vadd.f32 %v1315_v8, %v963_v35  ;;  %v1228_v24 = vpack.c.b16 %v1211_v44, %v1210_v9  ;;  %v2098_v35 = vshrl.u32 %v4548_v62, 16  ;;  %v2107_v8 = vshll.u32 %v4549_v23, 16 }
 0x14a   : > { %4500 = vmatmul.msk.bf16.gmra.mxu3 %vm655_vm4, %v4875_v38  ;;  %v2091_v38 = vrot.slane %v2090_v56, 4  ;;  %v4957_v56 = vld [vmem:[%s5146_s11 + $0x14] sm:$0x1]  ;;  %v2086_v9 = vsel %vm5158_vm3, %v2081_v21, %v5727_v16 }
 0x14b   : > { %v2100_v62 = vrot.slane %v2098_v35, 4  ;;  %v2151_v21 = vunpack.c.l.b16 %v2086_v9 }
 0x14c   : > { %v2256_v60 = vpop.f32.mrf.mxu0  ;;  %v2096_v44 = vsel %vm5158_vm3, %v2091_v38, %v2095_v20 }
 0x14d   : > { %v1602_v47 = vpop.f32.mrf.mxu3  ;;  %v967_v48 = vpop.f32.mrf.mxu1  ;;  %v2152_v38 = vunpack.c.l.b16 %v2096_v44 }
 0x14e   : > { %v1667_v52 = vadd.f32 %v1602_v47, %v1380_v14  ;;  %v2111_v14 = vshrl.u32 %v4549_v23, 16  ;;  %v2412_v47 = vrot.slane %v4957_v56, 5  ;;  %v5757_v23 = vrot.slane %v2107_v8, 5 }
 0x14f   : > { %4565 = vmatmul.msk.bf16.gmra.mxu0 %vm655_vm4, %v2168_v58  ;;  %v4956_v58 = vld [vmem:[%s5146_s11 + $0xbc] sm:$0x1]  ;;  %v1177_v56 = vrot.slane %v1175_v41, 4  ;;  %v968_v16 = vadd.f32 %v967_v48, %v5500_v53 }
 0x150   : > { %v1317_v61 = vpop.f32.mrf.mxu2  ;;  %4355 = vmatmul.msk.bf16.gmra.mxu1 %vm655_vm4, %v4860_v34  ;;  %v5745_v5 = vadd.f32 %v2256_v60, %v1667_v52  ;;  %v1178_v28 = vrot.slane %v4956_v58, 5  ;;  %v2103_v52 = vrot.slane %v2101_v3, 5  ;;  %v2113_v30 = vrot.slane %v2111_v14, 4 }
 0x151   : > { %v1381_v51 = vadd.f32 %v1317_v61, %v965_v19  ;;  %v4568_v19 = vld [vmem:[%s5146_s11 + $0xc] sm:$0xe]  ;;  %v4372_v58 = vrot.slane %v1032_v11, 9  ;;  %v2413_v3 = vsel %vm5332_vm7, %v2411_v4, %v2412_v47  ;;  %v4730_v4 = vld [vmem:[%s5146_s11 + $0x18] sm:$0xf] }
 0x152   : > { %6526 = vst [vmem:[#allocation5_spill] sm:$0xff] %v5745_v5  ;;  %v4584_v5 = vrot.slane %v4568_v19, 9  ;;  %v2104_v8 = vor.u32 %v2103_v52, %v2100_v62  ;;  %v2522_v11 = vunpack.c.l.b16 %v2413_v3  ;;  %v1179_v48 = vsel %vm5332_vm7, %v1177_v56, %v1178_v28  ;;  %v4861_v62 = vld [vmem:[%s5146_s11 + $0xb4] sm:$0xff]  ;;  %v5780_v52 = vld [vmem:[%s5146_s11 + $0x1c] sm:$0xf] }
 0x153   : > { %v1176_v53 = vsel %vm5332_vm7, %v4372_v58, %v1175_v41  ;;  %v2114_v9 = vor.u32 %v2113_v30, %v5757_v23  ;;  %v1213_v41 = vunpack.c.l.b16 %v1179_v48  ;;  %v3077_v56 = vshrl.u32 %v4730_v4, 16 }
 0x154   : > { %v2258_v34 = vpop.f32.mrf.mxu0  ;;  %v2410_v35 = vsel %vm5332_vm7, %v4584_v5, %v2409_v7  ;;  %v2169_v7 = vpack.c.b16 %v2152_v38, %v2151_v21  ;;  %v2105_v58 = vrot.slane %v2104_v8, 4  ;;  %v3080_v30 = vshll.u32 %v4730_v4, 16 }
 0x155   : > { %v1604_v60 = vpop.f32.mrf.mxu3  ;;  %4388 = vmatmul.msk.bf16.gmra.mxu2 %vm655_vm4, %v1228_v24  ;;  %v969_v50 = vpop.f32.mrf.mxu1  ;;  %v4550_v24 = vld [vmem:[%s5146_s11 + $0xc8] sm:$0x1]  ;;  %v2521_v14 = vunpack.c.l.b16 %v2410_v35  ;;  %v2115_v28 = vrot.slane %v2114_v9, 4  ;;  %v3090_v38 = vshrl.u32 %v5780_v52, 16  ;;  %v3079_v8 = vrot.slane %v3077_v56, 4 }
 0x156   : > { %v1668_v61 = vadd.f32 %v1604_v60, %v1381_v51  ;;  %v2117_v5 = vshll.u32 %v4550_v24, 16  ;;  %v970_v21 = vadd.f32 %v969_v50, %v5520_v17  ;;  %v2110_v17 = vsel %vm5158_vm3, %v2105_v58, %v5757_v23  ;;  %v4732_v9 = vld [vmem:[%s5146_s11 + $0x20] sm:$0x1]  ;;  %v4733_v56 = vld [vmem:[%s5146_s11 + $0x24] sm:$0xf] }
 0x157   : > { %v5773_v44 = vpack.c.b16 %v2522_v11, %v2521_v14  ;;  %v3082_v14 = vrot.slane %v3080_v30, 5  ;;  %v3096_v58 = vshll.u32 %v4732_v9, 16  ;;  %v5800_v30 = vld [vmem:[%s5146_s11 + $0x28] sm:$0xf] }
 0x158   : > { %v1320_v20 = vpop.f32.mrf.mxu2  ;;  %v5776_v47 = vadd.f32 %v2258_v34, %v1668_v61  ;;  %v2119_v34 = vrot.slane %v2117_v5, 5  ;;  %v3086_v61 = vshll.u32 %v5780_v52, 16 }
 0x159   : > { %v1382_v51 = vadd.f32 %v1320_v20, %v968_v16  ;;  %v1212_v16 = vunpack.c.l.b16 %v1176_v53  ;;  %v3092_v53 = vrot.slane %v3090_v38, 4  ;;  %v3098_v38 = vrot.slane %v3096_v58, 5 }
 0x15a   : > { %4501 = vmatmul.msk.bf16.gmra.mxu3 %vm655_vm4, %v4876_v27  ;;  %v2120_v50 = vsel %vm5158_vm3, %v2115_v28, %v2119_v34  ;;  %v3088_v11 = vrot.slane %v3086_v61, 5 }
 0x15b   : > { %v1229_v3 = vpack.c.b16 %v1213_v41, %v1212_v16  ;;  %v3083_v16 = vor.u32 %v3082_v14, %v3079_v8  ;;  %v3104_v8 = vshll.u32 %v4733_v56, 16  ;;  %v3110_v14 = vshll.u32 %v5800_v30, 16 }
 0x15c   : > { %v2261_v60 = vpop.f32.mrf.mxu0  ;;  %v3093_v41 = vor.u32 %v3092_v53, %v3088_v11 }
 0x15d   : > { %v1607_v19 = vpop.f32.mrf.mxu3  ;;  %v972_v27 = vpop.f32.mrf.mxu1  ;;  %v3084_v34 = vrot.slane %v3083_v16, 4 }
 0x15e   : > { %v1669_v20 = vadd.f32 %v1607_v19, %v1382_v51  ;;  %v2154_v19 = vunpack.c.l.b16 %v2120_v50  ;;  %v973_v23 = vadd.f32 %v972_v27, %v5543_v2  ;;  %v3094_v61 = vrot.slane %v3093_v41, 4 }
 0x15f   : > { %4566 = vmatmul.msk.bf16.gmra.mxu0 %vm655_vm4, %v2169_v7 }
 0x160   : > { %v1322_v24 = vpop.f32.mrf.mxu2  ;;  %4356 = vmatmul.msk.bf16.gmra.mxu1 %vm655_vm4, %v4861_v62  ;;  %v5787_v51 = vadd.f32 %v2261_v60, %v1669_v20  ;;  %v4877_v60 = vld [vmem:[%s5146_s11 + $0xc0] sm:$0xff]  ;;  %v2153_v62 = vunpack.c.l.b16 %v2110_v17  ;;  %v3114_v17 = vshrl.u32 %v5800_v30, 16  ;;  %v3099_v41 = vsel %vm5158_vm3, %v3094_v61, %v3098_v38  ;;  %v5826_v38 = vld [vmem:[%s5146_s11 + $0x2c] sm:$0x1] }
 0x161   : > { %v1383_v35 = vadd.f32 %v1322_v24, %v970_v21  ;;  %v4795_v24 = vld [vmem:[%s5146_s11 + $0x18] sm:$0xe]  ;;  %v3463_v61 = vunpack.c.l.b16 %v3099_v41 }
 0x162   : > { %v2170_v21 = vpack.c.b16 %v2154_v19, %v2153_v62  ;;  %v4959_v62 = vld [vmem:[%s5146_s11 + $0x20] sm:$0x1] }
 0x163   : > { %v2419_v19 = vrot.slane %v4959_v62, 5 }
 0x164   : > { %v2263_v48 = vpop.f32.mrf.mxu0 }
 0x165   : > { %v1609_v7 = vpop.f32.mrf.mxu3  ;;  %4389 = vmatmul.msk.bf16.gmra.mxu2 %vm655_vm4, %v1229_v3  ;;  %v974_v5 = vpop.f32.mrf.mxu1  ;;  %v3101_v3 = vshrl.u32 %v4733_v56, 16 }
 0x166   : > { %v1670_v4 = vadd.f32 %v1609_v7, %v1383_v35  ;;  %v3748_v35 = vrot.slane %v5780_v52, 5  ;;  %v4958_v7 = vld [vmem:[%s5146_s11 + $0x1c] sm:$0xf]  ;;  %v3089_v52 = vsel %vm5158_vm3, %v3084_v34, %v3088_v11  ;;  %v3116_v11 = vrot.slane %v3114_v17, 4 }
 0x168   : > { %v1325_v20 = vpop.f32.mrf.mxu2  ;;  %v5805_v2 = vadd.f32 %v2263_v48, %v1670_v4  ;;  %v4811_v48 = vrot.slane %v4795_v24, 9  ;;  %v4569_v4 = vld [vmem:[%s5146_s11 + $0x18] sm:$0xe]  ;;  %v3750_v58 = vrot.slane %v3748_v35, 4 }
 0x169   : > { %v1384_v28 = vadd.f32 %v1325_v20, %v973_v23  ;;  %v975_v23 = vadd.f32 %v974_v5, %v5563_v29  ;;  %v3751_v20 = vrot.slane %v4732_v9, 5  ;;  %v4878_v24 = vld [vmem:[%s5146_s11 + $0x18] sm:$0xff]  ;;  %v3462_v5 = vunpack.c.l.b16 %v3089_v52 }
 0x16a   : > { %4502 = vmatmul.msk.bf16.gmra.mxu3 %vm655_vm4, %v4877_v60  ;;  %6527 = vst [vmem:[#allocation6_spill] sm:$0xff] %v5805_v2  ;;  %v2416_v60 = vrot.slane %v4958_v7, 5  ;;  %v5820_v7 = vrot.slane %v3110_v14, 5  ;;  %v3749_v2 = vsel %vm5332_vm7, %v4811_v48, %v3748_v35  ;;  %v3120_v35 = vshll.u32 %v5826_v38, 16 }
 0x16b   : > { %v3494_v48 = vpack.c.b16 %v3463_v61, %v3462_v5  ;;  %v4960_v5 = vld [vmem:[%s5146_s11 + $0x28] sm:$0xf] }
 0x16c   : > { %v2266_v27 = vpop.f32.mrf.mxu0  ;;  %v2418_v62 = vrot.slane %v2416_v60, 4  ;;  %v2423_v61 = vrot.slane %v4960_v5, 5 }
 0x16d   : > { %v1612_v50 = vpop.f32.mrf.mxu3  ;;  %v977_v53 = vpop.f32.mrf.mxu1 }
 0x16e   : > { %v1671_v16 = vadd.f32 %v1612_v50, %v1384_v28  ;;  %v3103_v28 = vrot.slane %v3101_v3, 4  ;;  %v3106_v50 = vrot.slane %v3104_v8, 5  ;;  %v2420_v17 = vsel %vm5332_vm7, %v2418_v62, %v2419_v19  ;;  %v5845_v62 = vld [vmem:[%s5146_s11 + $0x34] sm:$0xf] }
 0x16f   : > { %4567 = vmatmul.msk.bf16.gmra.mxu0 %vm655_vm4, %v2170_v21  ;;  %v4585_v21 = vrot.slane %v4569_v4, 9  ;;  %v978_v4 = vadd.f32 %v977_v53, %v5445_v37 }
 0x170   : > { %v1327_v56 = vpop.f32.mrf.mxu2  ;;  %4601 = vmatmul.msk.bf16.vlgmr.msra.gmra.mxu1 %vm655_vm4, %v5773_v44  ;;  %v5823_v29 = vadd.f32 %v2266_v27, %v1671_v16  ;;  %v3752_v44 = vsel %vm5332_vm7, %v3750_v58, %v3751_v20  ;;  %v3107_v3 = vor.u32 %v3106_v50, %v3103_v28  ;;  %v3117_v16 = vor.u32 %v3116_v11, %v5820_v7  ;;  %v4796_v11 = vld [vmem:[%s5146_s11 + $0x24] sm:$0xe] }
 0x171   : > { %v1385_v34 = vadd.f32 %v1327_v56, %v975_v23  ;;  %v2417_v27 = vsel %vm5332_vm7, %v4585_v21, %v2416_v60  ;;  %v3860_v23 = vunpack.c.l.b16 %v3749_v2  ;;  %v3861_v41 = vunpack.c.l.b16 %v3752_v44 }
 0x172   : > { %v2523_v20 = vunpack.c.l.b16 %v2417_v27  ;;  %v2524_v60 = vunpack.c.l.b16 %v2420_v17  ;;  %v3108_v28 = vrot.slane %v3107_v3, 4  ;;  %v3118_v19 = vrot.slane %v3117_v16, 4 }
 0x173   : > { %v3122_v50 = vrot.slane %v3120_v35, 5  ;;  %v3755_v21 = vrot.slane %v5800_v30, 5  ;;  %v4812_v17 = vrot.slane %v4796_v11, 9  ;;  %v4570_v30 = vld [vmem:[%s5146_s11 + $0x24] sm:$0xe] }
 0x174   : > { %v2268_v9 = vpop.f32.mrf.mxu0  ;;  %v2554_v53 = vpack.c.b16 %v2524_v60, %v2523_v20 }
 0x175   : > { %v1614_v8 = vpop.f32.mrf.mxu3  ;;  %4714 = vmatmul.msk.bf16.vlgmr.msra.gmra.mxu2 %vm655_vm4, %v4878_v24  ;;  %v979_v14 = vpop.f32.mrf.mxu1  ;;  %v4736_v24 = vld [vmem:[%s5146_s11 + $0x30] sm:$0xf]  ;;  %v3123_v27 = vsel %vm5158_vm3, %v3118_v19, %v3122_v50  ;;  %v4879_v50 = vld [vmem:[%s5146_s11 + $0x24] sm:$0xff] }
 0x176   : > { %v1672_v52 = vadd.f32 %v1614_v8, %v1385_v34  ;;  %v3892_v34 = vpack.c.b16 %v3861_v41, %v3860_v23  ;;  %v3113_v8 = vsel %vm5158_vm3, %v3108_v28, %v5820_v7  ;;  %v3125_v16 = vshrl.u32 %v4736_v24, 16  ;;  %v4961_v41 = vld [vmem:[%s5146_s11 + $0x2c] sm:$0x1] }
 0x177   : > { %v3757_v23 = vrot.slane %v3755_v21, 4  ;;  %v3758_v7 = vrot.slane %v5826_v38, 5  ;;  %v3464_v60 = vunpack.c.l.b16 %v3113_v8  ;;  %v2425_v28 = vrot.slane %v2423_v61, 4 }
 0x178   : > { %v1330_v58 = vpop.f32.mrf.mxu2  ;;  %v5847_v37 = vadd.f32 %v2268_v9, %v1672_v52  ;;  %v3128_v9 = vshll.u32 %v4736_v24, 16  ;;  %v3134_v52 = vshll.u32 %v5845_v62, 16  ;;  %v3465_v11 = vunpack.c.l.b16 %v3123_v27 }
 0x179   : > { %v1386_v56 = vadd.f32 %v1330_v58, %v978_v4  ;;  %v980_v4 = vadd.f32 %v979_v14, %v5466_v63  ;;  %v2426_v58 = vrot.slane %v4961_v41, 5  ;;  %v3756_v24 = vsel %vm5332_vm7, %v4812_v17, %v3755_v21 }
 0x17a   : > { %4779 = vmatmul.msk.bf16.vlgmr.msra.gmra.mxu3 %vm655_vm4, %v3494_v48  ;;  %v3138_v48 = vshrl.u32 %v5845_v62, 16  ;;  %v3127_v63 = vrot.slane %v3125_v16, 4  ;;  %v3130_v14 = vrot.slane %v3128_v9, 5  ;;  %v5868_v38 = vrot.slane %v3134_v52, 5 }
 0x17b   : > { %v2427_v27 = vsel %vm5332_vm7, %v2425_v28, %v2426_v58  ;;  %v3862_v17 = vunpack.c.l.b16 %v3756_v24  ;;  %v4797_v24 = vld [vmem:[%s5146_s11 + $0x30] sm:$0xe] }
 0x17c   : > { %v2271_v2 = vpop.f32.mrf.mxu0  ;;  %v3140_v5 = vrot.slane %v3138_v48, 4  ;;  %v3131_v52 = vor.u32 %v3130_v14, %v3127_v63 }
 0x17d   : > { %v1617_v44 = vpop.f32.mrf.mxu3  ;;  %v982_v3 = vpop.f32.mrf.mxu1 }
 0x17e   : > { %v1673_v35 = vadd.f32 %v1617_v44, %v1386_v56  ;;  %v4586_v56 = vrot.slane %v4570_v30, 9  ;;  %v5877_v30 = vld [vmem:[%s5146_s11 + $0x38] sm:$0x1]  ;;  %v3141_v48 = vor.u32 %v3140_v5, %v5868_v38  ;;  %v3132_v28 = vrot.slane %v3131_v52, 4 }
 0x17f   : > { %4828 = vmatmul.msk.bf16.vlgmr.msra.gmra.mxu0 %vm655_vm4, %v3892_v34 }
 0x180   : > { %v1332_v20 = vpop.f32.mrf.mxu2  ;;  %4602 = vmatmul.msk.bf16.gmra.mxu1 %vm655_vm4, %v2554_v53  ;;  %v5866_v34 = vadd.f32 %v2271_v2, %v1673_v35  ;;  %v3759_v53 = vsel %vm5332_vm7, %v3757_v23, %v3758_v7  ;;  %v2424_v8 = vsel %vm5332_vm7, %v4586_v56, %v2423_v61  ;;  %v3495_v2 = vpack.c.b16 %v3465_v11, %v3464_v60  ;;  %v5885_v56 = vld [vmem:[%s5146_s11 + $0x40] sm:$0xf] }
 0x181   : > { %v1387_v19 = vadd.f32 %v1332_v20, %v980_v4  ;;  %v3863_v9 = vunpack.c.l.b16 %v3759_v53  ;;  %v983_v61 = vadd.f32 %v982_v3, %v5483_v22  ;;  %v2525_v4 = vunpack.c.l.b16 %v2424_v8  ;;  %v4739_v20 = vld [vmem:[%s5146_s11 + $0x3c] sm:$0xf] }
 0x182   : > { %v2526_v23 = vunpack.c.l.b16 %v2427_v27  ;;  %v3144_v7 = vshll.u32 %v5877_v30, 16  ;;  %v3762_v22 = vrot.slane %v5845_v62, 5  ;;  %v3149_v14 = vshrl.u32 %v4739_v20, 16 }
 0x183   : > { %v3893_v60 = vpack.c.b16 %v3863_v9, %v3862_v17  ;;  %v3152_v5 = vshll.u32 %v4739_v20, 16  ;;  %v3158_v53 = vshll.u32 %v5885_v56, 16  ;;  %v3162_v8 = vshrl.u32 %v5885_v56, 16  ;;  %v4963_v9 = vld [vmem:[%s5146_s11 + $0x38] sm:$0x1] }
 0x184   : > { %v2273_v44 = vpop.f32.mrf.mxu0  ;;  %v3146_v11 = vrot.slane %v3144_v7, 5  ;;  %v2433_v52 = vrot.slane %v4963_v9, 5  ;;  %v3765_v62 = vrot.slane %v5877_v30, 5  ;;  %v3764_v7 = vrot.slane %v3762_v22, 4  ;;  %v5912_v9 = vld [vmem:[%s5146_s11 + $0x44] sm:$0x1] }
 0x185   : > { %v1619_v21 = vpop.f32.mrf.mxu3  ;;  %4715 = vmatmul.msk.bf16.gmra.mxu2 %vm655_vm4, %v4879_v50  ;;  %v984_v16 = vpop.f32.mrf.mxu1  ;;  %v2555_v50 = vpack.c.b16 %v2526_v23, %v2525_v4  ;;  %v3137_v4 = vsel %vm5158_vm3, %v3132_v28, %v5868_v38  ;;  %v3154_v20 = vrot.slane %v3152_v5, 5  ;;  %v5906_v30 = vrot.slane %v3158_v53, 5 }
 0x186   : > { %v1674_v35 = vadd.f32 %v1619_v21, %v1387_v19  ;;  %v3142_v19 = vrot.slane %v3141_v48, 4  ;;  %v3466_v38 = vunpack.c.l.b16 %v3137_v4 }
 0x188   : > { %v1335_v41 = vpop.f32.mrf.mxu2  ;;  %v5890_v3 = vadd.f32 %v2273_v44, %v1674_v35  ;;  %v4571_v44 = vld [vmem:[%s5146_s11 + $0x30] sm:$0xe]  ;;  %v985_v35 = vadd.f32 %v984_v16, %v5504_v55  ;;  %v3147_v23 = vsel %vm5158_vm3, %v3142_v19, %v3146_v11 }
 0x189   : > { %v1388_v58 = vadd.f32 %v1335_v41, %v983_v61  ;;  %v4813_v61 = vrot.slane %v4797_v24, 9  ;;  %v3164_v24 = vrot.slane %v3162_v8, 4  ;;  %v4587_v55 = vrot.slane %v4571_v44, 9 }
 0x18a   : > { %4780 = vmatmul.msk.bf16.gmra.mxu3 %vm655_vm4, %v3495_v2  ;;  %v4962_v2 = vld [vmem:[%s5146_s11 + $0x34] sm:$0xf]  ;;  %v3467_v28 = vunpack.c.l.b16 %v3147_v23 }
 0x18b   : > { %v2430_v17 = vrot.slane %v4962_v2, 5  ;;  %v3763_v11 = vsel %vm5332_vm7, %v4813_v61, %v3762_v22  ;;  %v3168_v22 = vshll.u32 %v5912_v9, 16 }
 0x18c   : > { %v2276_v63 = vpop.f32.mrf.mxu0  ;;  %v3496_v44 = vpack.c.b16 %v3467_v28, %v3466_v38  ;;  %v4964_v28 = vld [vmem:[%s5146_s11 + $0x40] sm:$0xf] }
 0x18d   : > { %v1622_v27 = vpop.f32.mrf.mxu3  ;;  %v987_v21 = vpop.f32.mrf.mxu1  ;;  %v2432_v16 = vrot.slane %v2430_v17, 4 }
 0x18e   : > { %v1675_v48 = vadd.f32 %v1622_v27, %v1388_v58  ;;  %v3151_v58 = vrot.slane %v3149_v14, 4  ;;  %v4880_v27 = vld [vmem:[%s5146_s11 + $0x30] sm:$0xff] }
 0x18f   : > { %4829 = vmatmul.msk.bf16.gmra.mxu0 %vm655_vm4, %v3893_v60  ;;  %v2434_v8 = vsel %vm5332_vm7, %v2432_v16, %v2433_v52  ;;  %v5931_v16 = vld [vmem:[%s5146_s11 + $0x4c] sm:$0xf] }
 0x190   : > { %v1337_v41 = vpop.f32.mrf.mxu2  ;;  %4603 = vmatmul.msk.bf16.gmra.mxu1 %vm655_vm4, %v2555_v50  ;;  %v5909_v2 = vadd.f32 %v2276_v63, %v1675_v48  ;;  %v3766_v50 = vsel %vm5332_vm7, %v3764_v7, %v3765_v62  ;;  %v3155_v14 = vor.u32 %v3154_v20, %v3151_v58  ;;  %v2431_v63 = vsel %vm5332_vm7, %v4587_v55, %v2430_v17 }
 0x191   : > { %v1389_v60 = vadd.f32 %v1337_v41, %v985_v35  ;;  %v3165_v48 = vor.u32 %v3164_v24, %v5906_v30  ;;  %v988_v62 = vadd.f32 %v987_v21, %v5527_v26  ;;  %v3864_v35 = vunpack.c.l.b16 %v3763_v11  ;;  %v4798_v24 = vld [vmem:[%s5146_s11 + $0x3c] sm:$0xe] }
 0x192   : > { %v3865_v4 = vunpack.c.l.b16 %v3766_v50  ;;  %v2527_v7 = vunpack.c.l.b16 %v2431_v63  ;;  %v2528_v17 = vunpack.c.l.b16 %v2434_v8  ;;  %v3156_v58 = vrot.slane %v3155_v14, 4 }
 0x193   : > { %v3166_v52 = vrot.slane %v3165_v48, 4  ;;  %v3170_v20 = vrot.slane %v3168_v22, 5  ;;  %v3769_v55 = vrot.slane %v5885_v56, 5  ;;  %v2437_v11 = vrot.slane %v4964_v28, 5  ;;  %v4572_v56 = vld [vmem:[%s5146_s11 + $0x3c] sm:$0xe] }
 0x194   : > { %v2278_v19 = vpop.f32.mrf.mxu0  ;;  %v2556_v38 = vpack.c.b16 %v2528_v17, %v2527_v7  ;;  %v4814_v8 = vrot.slane %v4798_v24, 9 }
 0x195   : > { %v1624_v5 = vpop.f32.mrf.mxu3  ;;  %4716 = vmatmul.msk.bf16.gmra.mxu2 %vm655_vm4, %v4880_v27  ;;  %v989_v53 = vpop.f32.mrf.mxu1  ;;  %v4742_v27 = vld [vmem:[%s5146_s11 + $0x48] sm:$0xf]  ;;  %v3171_v63 = vsel %vm5158_vm3, %v3166_v52, %v3170_v20  ;;  %v4881_v20 = vld [vmem:[%s5146_s11 + $0x3c] sm:$0xff] }
 0x196   : > { %v1676_v61 = vadd.f32 %v1624_v5, %v1389_v60  ;;  %v3894_v60 = vpack.c.b16 %v3865_v4, %v3864_v35  ;;  %v3161_v5 = vsel %vm5158_vm3, %v3156_v58, %v5906_v30  ;;  %v3173_v48 = vshrl.u32 %v4742_v27, 16  ;;  %v4965_v4 = vld [vmem:[%s5146_s11 + $0x44] sm:$0x1] }
 0x197   : > { %v3771_v35 = vrot.slane %v3769_v55, 4  ;;  %v3772_v30 = vrot.slane %v5912_v9, 5  ;;  %v3468_v17 = vunpack.c.l.b16 %v3161_v5  ;;  %v2439_v58 = vrot.slane %v2437_v11, 4 }
 0x198   : > { %v1340_v23 = vpop.f32.mrf.mxu2  ;;  %v5933_v26 = vadd.f32 %v2278_v19, %v1676_v61  ;;  %v3176_v19 = vshll.u32 %v4742_v27, 16  ;;  %v3182_v61 = vshll.u32 %v5931_v16, 16  ;;  %v3469_v24 = vunpack.c.l.b16 %v3171_v63 }
 0x199   : > { %v1390_v41 = vadd.f32 %v1340_v23, %v988_v62  ;;  %v990_v62 = vadd.f32 %v989_v53, %v5545_v43  ;;  %v2440_v23 = vrot.slane %v4965_v4, 5  ;;  %v3770_v27 = vsel %vm5332_vm7, %v4814_v8, %v3769_v55 }
 0x19a   : > { %4781 = vmatmul.msk.bf16.gmra.mxu3 %vm655_vm4, %v3496_v44  ;;  %v3186_v44 = vshrl.u32 %v5931_v16, 16  ;;  %v3175_v43 = vrot.slane %v3173_v48, 4  ;;  %v3178_v53 = vrot.slane %v3176_v19, 5  ;;  %v5954_v9 = vrot.slane %v3182_v61, 5 }
 0x19b   : > { %v2441_v63 = vsel %vm5332_vm7, %v2439_v58, %v2440_v23  ;;  %v3866_v8 = vunpack.c.l.b16 %v3770_v27  ;;  %v4799_v27 = vld [vmem:[%s5146_s11 + $0x48] sm:$0xe] }
 0x19c   : > { %v2281_v21 = vpop.f32.mrf.mxu0  ;;  %v3188_v28 = vrot.slane %v3186_v44, 4  ;;  %v3179_v61 = vor.u32 %v3178_v53, %v3175_v43 }
 0x19d   : > { %v1627_v50 = vpop.f32.mrf.mxu3  ;;  %v992_v14 = vpop.f32.mrf.mxu1 }
 0x19e   : > { %v1677_v22 = vadd.f32 %v1627_v50, %v1390_v41  ;;  %v4588_v41 = vrot.slane %v4572_v56, 9  ;;  %v5963_v56 = vld [vmem:[%s5146_s11 + $0x50] sm:$0x1]  ;;  %v3189_v44 = vor.u32 %v3188_v28, %v5954_v9  ;;  %v3180_v58 = vrot.slane %v3179_v61, 4 }
 0x19f   : > { %4830 = vmatmul.msk.bf16.gmra.mxu0 %vm655_vm4, %v3894_v60 }
 0x1a0   : > { %v1342_v7 = vpop.f32.mrf.mxu2  ;;  %4604 = vmatmul.msk.bf16.gmra.mxu1 %vm655_vm4, %v2556_v38  ;;  %v5952_v60 = vadd.f32 %v2281_v21, %v1677_v22  ;;  %v3773_v38 = vsel %vm5332_vm7, %v3771_v35, %v3772_v30  ;;  %v2438_v5 = vsel %vm5332_vm7, %v4588_v41, %v2437_v11  ;;  %v3497_v21 = vpack.c.b16 %v3469_v24, %v3468_v17  ;;  %v5971_v41 = vld [vmem:[%s5146_s11 + $0x58] sm:$0xf] }
 0x1a1   : > { %v1391_v52 = vadd.f32 %v1342_v7, %v990_v62  ;;  %v3867_v19 = vunpack.c.l.b16 %v3773_v38  ;;  %v993_v11 = vadd.f32 %v992_v14, %v5566_v40  ;;  %v2529_v62 = vunpack.c.l.b16 %v2438_v5  ;;  %v4745_v7 = vld [vmem:[%s5146_s11 + $0x54] sm:$0xf] }
 0x1a2   : > { %v2530_v35 = vunpack.c.l.b16 %v2441_v63  ;;  %v3192_v30 = vshll.u32 %v5963_v56, 16  ;;  %v3776_v40 = vrot.slane %v5931_v16, 5  ;;  %v3197_v53 = vshrl.u32 %v4745_v7, 16 }
 0x1a3   : > { %v3895_v17 = vpack.c.b16 %v3867_v19, %v3866_v8  ;;  %v3200_v28 = vshll.u32 %v4745_v7, 16  ;;  %v3206_v38 = vshll.u32 %v5971_v41, 16  ;;  %v3210_v5 = vshrl.u32 %v5971_v41, 16  ;;  %v4967_v19 = vld [vmem:[%s5146_s11 + $0x50] sm:$0x1] }
 0x1a4   : > { %v2283_v50 = vpop.f32.mrf.mxu0  ;;  %v3194_v24 = vrot.slane %v3192_v30, 5  ;;  %v2447_v61 = vrot.slane %v4967_v19, 5  ;;  %v3779_v16 = vrot.slane %v5963_v56, 5  ;;  %v3778_v30 = vrot.slane %v3776_v40, 4  ;;  %v5998_v19 = vld [vmem:[%s5146_s11 + $0x5c] sm:$0x1] }
 0x1a5   : > { %v1629_v55 = vpop.f32.mrf.mxu3  ;;  %4717 = vmatmul.msk.bf16.gmra.mxu2 %vm655_vm4, %v4881_v20  ;;  %v994_v48 = vpop.f32.mrf.mxu1  ;;  %v2557_v20 = vpack.c.b16 %v2530_v35, %v2529_v62  ;;  %v3185_v62 = vsel %vm5158_vm3, %v3180_v58, %v5954_v9  ;;  %v3202_v7 = vrot.slane %v3200_v28, 5  ;;  %v5992_v56 = vrot.slane %v3206_v38, 5 }
 0x1a6   : > { %v1678_v22 = vadd.f32 %v1629_v55, %v1391_v52  ;;  %v3190_v52 = vrot.slane %v3189_v44, 4  ;;  %v3470_v9 = vunpack.c.l.b16 %v3185_v62 }
 0x1a8   : > { %v1345_v4 = vpop.f32.mrf.mxu2  ;;  %v5976_v14 = vadd.f32 %v2283_v50, %v1678_v22  ;;  %v4573_v50 = vld [vmem:[%s5146_s11 + $0x48] sm:$0xe]  ;;  %v995_v22 = vadd.f32 %v994_v48, %v5581_v10  ;;  %v3195_v35 = vsel %vm5158_vm3, %v3190_v52, %v3194_v24 }
 0x1a9   : > { %v1392_v23 = vadd.f32 %v1345_v4, %v993_v11  ;;  %v4815_v11 = vrot.slane %v4799_v27, 9  ;;  %v3212_v27 = vrot.slane %v3210_v5, 4  ;;  %v4589_v10 = vrot.slane %v4573_v50, 9 }
 0x1aa   : > { %4782 = vmatmul.msk.bf16.gmra.mxu3 %vm655_vm4, %v3497_v21  ;;  %v4966_v21 = vld [vmem:[%s5146_s11 + $0x4c] sm:$0xf]  ;;  %v3471_v58 = vunpack.c.l.b16 %v3195_v35 }
 0x1ab   : > { %v2444_v8 = vrot.slane %v4966_v21, 5  ;;  %v3777_v24 = vsel %vm5332_vm7, %v4815_v11, %v3776_v40  ;;  %v3216_v40 = vshll.u32 %v5998_v19, 16 }
 0x1ac   : > { %v2286_v43 = vpop.f32.mrf.mxu0  ;;  %v3498_v50 = vpack.c.b16 %v3471_v58, %v3470_v9  ;;  %v4968_v58 = vld [vmem:[%s5146_s11 + $0x58] sm:$0xf] }
 0x1ad   : > { %v1632_v63 = vpop.f32.mrf.mxu3  ;;  %v997_v55 = vpop.f32.mrf.mxu1  ;;  %v2446_v48 = vrot.slane %v2444_v8, 4 }
 0x1ae   : > { %v1679_v44 = vadd.f32 %v1632_v63, %v1392_v23  ;;  %v3199_v23 = vrot.slane %v3197_v53, 4  ;;  %v4882_v63 = vld [vmem:[%s5146_s11 + $0x48] sm:$0xff] }
 0x1af   : > { %4831 = vmatmul.msk.bf16.gmra.mxu0 %vm655_vm4, %v3895_v17  ;;  %v2448_v5 = vsel %vm5332_vm7, %v2446_v48, %v2447_v61  ;;  %v6017_v48 = vld [vmem:[%s5146_s11 + $0x64] sm:$0xf] }
 0x1b0   : > { %v1347_v4 = vpop.f32.mrf.mxu2  ;;  %4605 = vmatmul.msk.bf16.gmra.mxu1 %vm655_vm4, %v2557_v20  ;;  %v5995_v21 = vadd.f32 %v2286_v43, %v1679_v44  ;;  %v3780_v20 = vsel %vm5332_vm7, %v3778_v30, %v3779_v16  ;;  %v3203_v53 = vor.u32 %v3202_v7, %v3199_v23  ;;  %v2445_v43 = vsel %vm5332_vm7, %v4589_v10, %v2444_v8 }
 0x1b1   : > { %v1393_v17 = vadd.f32 %v1347_v4, %v995_v22  ;;  %v3213_v44 = vor.u32 %v3212_v27, %v5992_v56  ;;  %v998_v16 = vadd.f32 %v997_v55, %v5457_v49  ;;  %v3868_v22 = vunpack.c.l.b16 %v3777_v24  ;;  %v4800_v27 = vld [vmem:[%s5146_s11 + $0x54] sm:$0xe] }
 0x1b2   : > { %v3869_v62 = vunpack.c.l.b16 %v3780_v20  ;;  %v2531_v30 = vunpack.c.l.b16 %v2445_v43  ;;  %v2532_v8 = vunpack.c.l.b16 %v2448_v5  ;;  %v3204_v23 = vrot.slane %v3203_v53, 4 }
 0x1b3   : > { %v3214_v61 = vrot.slane %v3213_v44, 4  ;;  %v3218_v7 = vrot.slane %v3216_v40, 5  ;;  %v3783_v10 = vrot.slane %v5971_v41, 5  ;;  %v2451_v24 = vrot.slane %v4968_v58, 5  ;;  %v4574_v41 = vld [vmem:[%s5146_s11 + $0x54] sm:$0xe] }
 0x1b4   : > { %v2288_v52 = vpop.f32.mrf.mxu0  ;;  %v2558_v9 = vpack.c.b16 %v2532_v8, %v2531_v30  ;;  %v4816_v5 = vrot.slane %v4800_v27, 9 }
 0x1b5   : > { %v1634_v28 = vpop.f32.mrf.mxu3  ;;  %4718 = vmatmul.msk.bf16.gmra.mxu2 %vm655_vm4, %v4882_v63  ;;  %v999_v38 = vpop.f32.mrf.mxu1  ;;  %v4748_v63 = vld [vmem:[%s5146_s11 + $0x60] sm:$0xf]  ;;  %v3219_v43 = vsel %vm5158_vm3, %v3214_v61, %v3218_v7  ;;  %v4883_v7 = vld [vmem:[%s5146_s11 + $0x54] sm:$0xff] }
 0x1b6   : > { %v1680_v11 = vadd.f32 %v1634_v28, %v1393_v17  ;;  %v3896_v17 = vpack.c.b16 %v3869_v62, %v3868_v22  ;;  %v3209_v28 = vsel %vm5158_vm3, %v3204_v23, %v5992_v56  ;;  %v3221_v44 = vshrl.u32 %v4748_v63, 16  ;;  %v4969_v62 = vld [vmem:[%s5146_s11 + $0x5c] sm:$0x1] }
 0x1b7   : > { %v3785_v22 = vrot.slane %v3783_v10, 4  ;;  %v3786_v56 = vrot.slane %v5998_v19, 5  ;;  %v3472_v8 = vunpack.c.l.b16 %v3209_v28  ;;  %v2453_v23 = vrot.slane %v2451_v24, 4 }
 0x1b8   : > { %v1350_v35 = vpop.f32.mrf.mxu2  ;;  %v6019_v49 = vadd.f32 %v2288_v52, %v1680_v11  ;;  %v3224_v52 = vshll.u32 %v4748_v63, 16  ;;  %v3230_v11 = vshll.u32 %v6017_v48, 16  ;;  %v3473_v27 = vunpack.c.l.b16 %v3219_v43 }
 0x1b9   : > { %v1394_v4 = vadd.f32 %v1350_v35, %v998_v16  ;;  %v1000_v16 = vadd.f32 %v999_v38, %v5476_v0  ;;  %v2454_v35 = vrot.slane %v4969_v62, 5  ;;  %v3784_v63 = vsel %vm5332_vm7, %v4816_v5, %v3783_v10 }
 0x1ba   : > { %4783 = vmatmul.msk.bf16.gmra.mxu3 %vm655_vm4, %v3498_v50  ;;  %v3234_v50 = vshrl.u32 %v6017_v48, 16  ;;  %v3223_v0 = vrot.slane %v3221_v44, 4  ;;  %v3226_v38 = vrot.slane %v3224_v52, 5  ;;  %v6040_v19 = vrot.slane %v3230_v11, 5 }
 0x1bb   : > { %v2455_v43 = vsel %vm5332_vm7, %v2453_v23, %v2454_v35  ;;  %v3870_v5 = vunpack.c.l.b16 %v3784_v63  ;;  %v4801_v63 = vld [vmem:[%s5146_s11 + $0x60] sm:$0xe] }
 0x1bc   : > { %v2291_v55 = vpop.f32.mrf.mxu0  ;;  %v3236_v58 = vrot.slane %v3234_v50, 4  ;;  %v3227_v11 = vor.u32 %v3226_v38, %v3223_v0 }
 0x1bd   : > { %v1637_v20 = vpop.f32.mrf.mxu3  ;;  %v1002_v53 = vpop.f32.mrf.mxu1 }
 0x1be   : > { %v1681_v40 = vadd.f32 %v1637_v20, %v1394_v4  ;;  %v4590_v4 = vrot.slane %v4574_v41, 9  ;;  %v6049_v41 = vld [vmem:[%s5146_s11 + $0x68] sm:$0x1]  ;;  %v3237_v50 = vor.u32 %v3236_v58, %v6040_v19  ;;  %v3228_v23 = vrot.slane %v3227_v11, 4 }
 0x1bf   : > { %4832 = vmatmul.msk.bf16.gmra.mxu0 %vm655_vm4, %v3896_v17 }
 0x1c0   : > { %v1352_v30 = vpop.f32.mrf.mxu2  ;;  %4606 = vmatmul.msk.bf16.gmra.mxu1 %vm655_vm4, %v2558_v9  ;;  %v6038_v17 = vadd.f32 %v2291_v55, %v1681_v40  ;;  %v3787_v9 = vsel %vm5332_vm7, %v3785_v22, %v3786_v56  ;;  %v2452_v28 = vsel %vm5332_vm7, %v4590_v4, %v2451_v24  ;;  %v3499_v55 = vpack.c.b16 %v3473_v27, %v3472_v8  ;;  %v6057_v4 = vld [vmem:[%s5146_s11 + $0x70] sm:$0xf] }
 0x1c1   : > { %v1395_v61 = vadd.f32 %v1352_v30, %v1000_v16  ;;  %v3871_v52 = vunpack.c.l.b16 %v3787_v9  ;;  %v1003_v24 = vadd.f32 %v1002_v53, %v5497_v39  ;;  %v2533_v16 = vunpack.c.l.b16 %v2452_v28  ;;  %v4751_v30 = vld [vmem:[%s5146_s11 + $0x6c] sm:$0xf] }
 0x1c2   : > { %v2534_v22 = vunpack.c.l.b16 %v2455_v43  ;;  %v3240_v56 = vshll.u32 %v6049_v41, 16  ;;  %v3790_v39 = vrot.slane %v6017_v48, 5  ;;  %v3245_v38 = vshrl.u32 %v4751_v30, 16 }
 0x1c3   : > { %v3897_v8 = vpack.c.b16 %v3871_v52, %v3870_v5  ;;  %v3248_v58 = vshll.u32 %v4751_v30, 16  ;;  %v3254_v9 = vshll.u32 %v6057_v4, 16  ;;  %v3258_v28 = vshrl.u32 %v6057_v4, 16  ;;  %v4971_v52 = vld [vmem:[%s5146_s11 + $0x68] sm:$0x1] }
 0x1c4   : > { %v2293_v20 = vpop.f32.mrf.mxu0  ;;  %v3242_v27 = vrot.slane %v3240_v56, 5  ;;  %v2461_v11 = vrot.slane %v4971_v52, 5  ;;  %v3793_v48 = vrot.slane %v6049_v41, 5  ;;  %v3792_v56 = vrot.slane %v3790_v39, 4 }
 0x1c5   : > { %v1639_v10 = vpop.f32.mrf.mxu3  ;;  %4719 = vmatmul.msk.bf16.gmra.mxu2 %vm655_vm4, %v4883_v7  ;;  %v1004_v44 = vpop.f32.mrf.mxu1  ;;  %v2559_v7 = vpack.c.b16 %v2534_v22, %v2533_v16  ;;  %v3233_v16 = vsel %vm5158_vm3, %v3228_v23, %v6040_v19  ;;  %v3250_v30 = vrot.slane %v3248_v58, 5  ;;  %v3256_v41 = vrot.slane %v3254_v9, 5  ;;  %v6082_v23 = vld [vmem:[%s5146_s11 + $0x74] sm:$0x1] }
 0x1c6   : > { %v1682_v40 = vadd.f32 %v1639_v10, %v1395_v61  ;;  %v3238_v61 = vrot.slane %v3237_v50, 4  ;;  %v3474_v52 = vunpack.c.l.b16 %v3233_v16 }
 0x1c8   : > { %v1355_v62 = vpop.f32.mrf.mxu2  ;;  %v6062_v53 = vadd.f32 %v2293_v20, %v1682_v40  ;;  %v4575_v20 = vld [vmem:[%s5146_s11 + $0x60] sm:$0xe]  ;;  %v1005_v40 = vadd.f32 %v1004_v44, %v5516_v6  ;;  %v3243_v22 = vsel %vm5158_vm3, %v3238_v61, %v3242_v27 }
 0x1c9   : > { %v1396_v35 = vadd.f32 %v1355_v62, %v1003_v24  ;;  %v4817_v24 = vrot.slane %v4801_v63, 9  ;;  %v3260_v63 = vrot.slane %v3258_v28, 4  ;;  %v3475_v19 = vunpack.c.l.b16 %v3243_v22 }
 0x1ca   : > { %4784 = vmatmul.msk.bf16.gmra.mxu3 %vm655_vm4, %v3499_v55  ;;  %6528 = vst [vmem:[#allocation7_spill] sm:$0xff] %v6062_v53  ;;  %v4970_v55 = vld [vmem:[%s5146_s11 + $0x64] sm:$0xf] }
 0x1cb   : > { %v2458_v5 = vrot.slane %v4970_v55, 5  ;;  %v4591_v55 = vrot.slane %v4575_v20, 9  ;;  %v3791_v61 = vsel %vm5332_vm7, %v4817_v24, %v3790_v39  ;;  %v3261_v28 = vor.u32 %v3260_v63, %v3256_v41  ;;  %v4754_v63 = vld [vmem:[%s5146_s11 + $0x78] sm:$0xf] }
 0x1cc   : > { %v2296_v0 = vpop.f32.mrf.mxu0  ;;  %v3500_v24 = vpack.c.b16 %v3475_v19, %v3474_v52  ;;  %v3872_v20 = vunpack.c.l.b16 %v3791_v61 }
 0x1cd   : > { %v1642_v43 = vpop.f32.mrf.mxu3  ;;  %v1007_v10 = vpop.f32.mrf.mxu1  ;;  %v2460_v6 = vrot.slane %v2458_v5, 4 }
 0x1ce   : > { %v1683_v50 = vadd.f32 %v1642_v43, %v1396_v35  ;;  %v3247_v35 = vrot.slane %v3245_v38, 4 }
 0x1cf   : > { %4833 = vmatmul.msk.bf16.gmra.mxu0 %vm655_vm4, %v3897_v8  ;;  %v4884_v8 = vld [vmem:[%s5146_s11 + $0x60] sm:$0xff]  ;;  %v2462_v9 = vsel %vm5332_vm7, %v2460_v6, %v2461_v11  ;;  %v4802_v11 = vld [vmem:[%s5146_s11 + $0x6c] sm:$0xe] }
 0x1d0   : > { %v1357_v62 = vpop.f32.mrf.mxu2  ;;  %4607 = vmatmul.msk.bf16.gmra.mxu1 %vm655_vm4, %v2559_v7  ;;  %v6079_v44 = vadd.f32 %v2296_v0, %v1683_v50  ;;  %v3794_v7 = vsel %vm5332_vm7, %v3792_v56, %v3793_v48  ;;  %v3251_v27 = vor.u32 %v3250_v30, %v3247_v35  ;;  %v2459_v0 = vsel %vm5332_vm7, %v4591_v55, %v2458_v5  ;;  %v6100_v55 = vld [vmem:[%s5146_s11 + $0x7c] sm:$0xf] }
 0x1d1   : > { %v1397_v43 = vadd.f32 %v1357_v62, %v1005_v40  ;;  %v3264_v50 = vshll.u32 %v6082_v23, 16  ;;  %v1008_v48 = vadd.f32 %v1007_v10, %v5535_v45  ;;  %v3873_v40 = vunpack.c.l.b16 %v3794_v7 }
 0x1d2   : > { %v2535_v22 = vunpack.c.l.b16 %v2459_v0  ;;  %v2536_v56 = vunpack.c.l.b16 %v2462_v9  ;;  %v3252_v5 = vrot.slane %v3251_v27, 4  ;;  %v3262_v35 = vrot.slane %v3261_v28, 4  ;;  %v4972_v0 = vld [vmem:[%s5146_s11 + $0x70] sm:$0xf] }
 0x1d3   : > { %v3266_v30 = vrot.slane %v3264_v50, 5  ;;  %v4818_v52 = vrot.slane %v4802_v11, 9  ;;  %v2465_v9 = vrot.slane %v4972_v0, 5  ;;  %v3269_v28 = vshrl.u32 %v4754_v63, 16 }
 0x1d4   : > { %v2298_v53 = vpop.f32.mrf.mxu0  ;;  %v2560_v6 = vpack.c.b16 %v2536_v56, %v2535_v22  ;;  %v3257_v7 = vsel %vm5158_vm3, %v3252_v5, %v3256_v41  ;;  %v3272_v50 = vshll.u32 %v4754_v63, 16  ;;  %v4885_v5 = vld [vmem:[%s5146_s11 + $0x6c] sm:$0xff] }
 0x1d5   : > { %v1644_v38 = vpop.f32.mrf.mxu3  ;;  %4720 = vmatmul.msk.bf16.gmra.mxu2 %vm655_vm4, %v4884_v8  ;;  %v1009_v58 = vpop.f32.mrf.mxu1  ;;  %v3797_v8 = vrot.slane %v6057_v4, 5  ;;  %v3267_v27 = vsel %vm5158_vm3, %v3262_v35, %v3266_v30  ;;  %v2467_v35 = vrot.slane %v2465_v9, 4  ;;  %v4973_v30 = vld [vmem:[%s5146_s11 + $0x74] sm:$0x1] }
 0x1d6   : > { %v1684_v39 = vadd.f32 %v1644_v38, %v1397_v43  ;;  %v3898_v43 = vpack.c.b16 %v3873_v40, %v3872_v20  ;;  %v4576_v38 = vld [vmem:[%s5146_s11 + $0x6c] sm:$0xe]  ;;  %v3476_v40 = vunpack.c.l.b16 %v3257_v7  ;;  %v2468_v11 = vrot.slane %v4973_v30, 5  ;;  %v6127_v7 = vld [vmem:[%s5146_s11 + $0x80] sm:$0x1] }
 0x1d7   : > { %v3799_v41 = vrot.slane %v3797_v8, 4  ;;  %v3798_v22 = vsel %vm5332_vm7, %v4818_v52, %v3797_v8  ;;  %v4592_v56 = vrot.slane %v4576_v38, 9 }
 0x1d8   : > { %v1360_v16 = vpop.f32.mrf.mxu2  ;;  %v6102_v45 = vadd.f32 %v2298_v53, %v1684_v39  ;;  %v3278_v53 = vshll.u32 %v6100_v55, 16  ;;  %v3282_v39 = vshrl.u32 %v6100_v55, 16  ;;  %v2469_v0 = vsel %vm5332_vm7, %v2467_v35, %v2468_v11 }
 0x1d9   : > { %v1398_v62 = vadd.f32 %v1360_v16, %v1008_v48  ;;  %v3800_v48 = vrot.slane %v6082_v23, 5  ;;  %v3477_v16 = vunpack.c.l.b16 %v3267_v27  ;;  %v3874_v27 = vunpack.c.l.b16 %v3798_v22  ;;  %v6139_v22 = vld [vmem:[%s5146_s11 + $0x88] sm:$0xf] }
 0x1da   : > { %4785 = vmatmul.msk.bf16.gmra.mxu3 %vm655_vm4, %v3500_v24  ;;  %v1010_v24 = vadd.f32 %v1009_v58, %v5558_v12  ;;  %v3271_v12 = vrot.slane %v3269_v28, 4  ;;  %v3274_v58 = vrot.slane %v3272_v50, 5  ;;  %v6122_v23 = vrot.slane %v3278_v53, 5 }
 0x1db   : > { %v3501_v52 = vpack.c.b16 %v3477_v16, %v3476_v40  ;;  %v2466_v38 = vsel %vm5332_vm7, %v4592_v56, %v2465_v9  ;;  %v4757_v40 = vld [vmem:[%s5146_s11 + $0x84] sm:$0xf] }
 0x1dc   : > { %v2301_v10 = vpop.f32.mrf.mxu0  ;;  %v3275_v50 = vor.u32 %v3274_v58, %v3271_v12  ;;  %v3293_v30 = vshrl.u32 %v4757_v40, 16  ;;  %v3804_v58 = vrot.slane %v6100_v55, 5  ;;  %v3807_v55 = vrot.slane %v6127_v7, 5 }
 0x1dd   : > { %v1647_v19 = vpop.f32.mrf.mxu3  ;;  %v1012_v61 = vpop.f32.mrf.mxu1 }
 0x1de   : > { %v1685_v4 = vadd.f32 %v1647_v19, %v1398_v62  ;;  %v3276_v56 = vrot.slane %v3275_v50, 4 }
 0x1df   : > { %4834 = vmatmul.msk.bf16.gmra.mxu0 %vm655_vm4, %v3898_v43  ;;  %v3284_v43 = vrot.slane %v3282_v39, 4  ;;  %v1013_v39 = vadd.f32 %v1012_v61, %v5577_v59  ;;  %v3296_v59 = vshll.u32 %v4757_v40, 16 }
 0x1e0   : > { %v1362_v20 = vpop.f32.mrf.mxu2  ;;  %4608 = vmatmul.msk.bf16.gmra.mxu1 %vm655_vm4, %v2560_v6  ;;  %v6120_v63 = vadd.f32 %v2301_v10, %v1685_v4  ;;  %v3801_v6 = vsel %vm5332_vm7, %v3799_v41, %v3800_v48  ;;  %v2537_v48 = vunpack.c.l.b16 %v2466_v38  ;;  %v4577_v38 = vld [vmem:[%s5146_s11 + $0x78] sm:$0xe] }
 0x1e1   : > { %v1399_v62 = vadd.f32 %v1362_v20, %v1010_v24  ;;  %v3875_v4 = vunpack.c.l.b16 %v3801_v6  ;;  %v3285_v53 = vor.u32 %v3284_v43, %v6122_v23  ;;  %v3288_v24 = vshll.u32 %v6127_v7, 16  ;;  %v4886_v7 = vld [vmem:[%s5146_s11 + $0x78] sm:$0xff] }
 0x1e2   : > { %v2538_v20 = vunpack.c.l.b16 %v2469_v0  ;;  %v3302_v43 = vshll.u32 %v6139_v22, 16  ;;  %v3306_v6 = vshrl.u32 %v6139_v22, 16  ;;  %v4974_v0 = vld [vmem:[%s5146_s11 + $0x7c] sm:$0xf] }
 0x1e3   : > { %v3899_v9 = vpack.c.b16 %v3875_v4, %v3874_v27  ;;  %v3290_v35 = vrot.slane %v3288_v24, 5  ;;  %v2472_v4 = vrot.slane %v4974_v0, 5  ;;  %v3295_v24 = vrot.slane %v3293_v30, 4 }
 0x1e4   : > { %v2303_v19 = vpop.f32.mrf.mxu0  ;;  %v2561_v12 = vpack.c.b16 %v2538_v20, %v2537_v48  ;;  %v4593_v20 = vrot.slane %v4577_v38, 9  ;;  %v6160_v40 = vrot.slane %v3302_v43, 5 }
 0x1e5   : > { %v1649_v8 = vpop.f32.mrf.mxu3  ;;  %4721 = vmatmul.msk.bf16.gmra.mxu2 %vm655_vm4, %v4885_v5  ;;  %v1014_v10 = vpop.f32.mrf.mxu1  ;;  %v4803_v5 = vld [vmem:[%s5146_s11 + $0x78] sm:$0xe] }
 0x1e6   : > { %v1686_v28 = vadd.f32 %v1649_v8, %v1399_v62  ;;  %v3286_v62 = vrot.slane %v3285_v53, 4  ;;  %v4819_v27 = vrot.slane %v4803_v5, 9  ;;  %v2473_v38 = vsel %vm5332_vm7, %v4593_v20, %v2472_v4 }
 0x1e8   : > { %v1365_v41 = vpop.f32.mrf.mxu2  ;;  %v6143_v61 = vadd.f32 %v2303_v19, %v1686_v28  ;;  %v3281_v19 = vsel %vm5158_vm3, %v3276_v56, %v6122_v23  ;;  %v1015_v28 = vadd.f32 %v1014_v10, %v5594_v32  ;;  %v3308_v23 = vrot.slane %v3306_v6, 4 }
 0x1e9   : > { %v1400_v16 = vadd.f32 %v1365_v41, %v1013_v39  ;;  %v3291_v39 = vsel %vm5158_vm3, %v3286_v62, %v3290_v35  ;;  %v3298_v41 = vrot.slane %v3296_v59, 5  ;;  %v2474_v56 = vrot.slane %v2472_v4, 4  ;;  %v4804_v4 = vld [vmem:[%s5146_s11 + $0x84] sm:$0xe] }
 0x1ea   : > { %4786 = vmatmul.msk.bf16.gmra.mxu3 %vm655_vm4, %v3501_v52  ;;  %v3478_v10 = vunpack.c.l.b16 %v3281_v19  ;;  %v3479_v62 = vunpack.c.l.b16 %v3291_v39  ;;  %v3805_v59 = vsel %vm5332_vm7, %v4819_v27, %v3804_v58  ;;  %v3309_v43 = vor.u32 %v3308_v23, %v6160_v40  ;;  %v4760_v19 = vld [vmem:[%s5146_s11 + $0x90] sm:$0xf] }
 0x1eb   : > { %v3299_v35 = vor.u32 %v3298_v41, %v3295_v24  ;;  %v6183_v24 = vld [vmem:[%s5146_s11 + $0x94] sm:$0xf] }
 0x1ec   : > { %v2306_v11 = vpop.f32.mrf.mxu0  ;;  %v3502_v27 = vpack.c.b16 %v3479_v62, %v3478_v10  ;;  %v3310_v23 = vrot.slane %v3309_v43, 4  ;;  %v4820_v62 = vrot.slane %v4804_v4, 9  ;;  %v4976_v43 = vld [vmem:[%s5146_s11 + $0x88] sm:$0xf] }
 0x1ed   : > { %v1652_v8 = vpop.f32.mrf.mxu3  ;;  %v2629_v52 = vpop.f32.mrf.mxu1  ;;  %v3300_v39 = vrot.slane %v3299_v35, 4 }
 0x1ee   : > { %v1687_v50 = vadd.f32 %v1652_v8, %v1400_v16  ;;  %v2709_v53 = vadd.f32 %v2629_v52, %v5611_v46  ;;  %v3806_v46 = vrot.slane %v3804_v58, 4  ;;  %v6165_v8 = vld [vmem:[%s5146_s11 + $0x8c] sm:$0x1] }
 0x1ef   : > { %4835 = vmatmul.msk.bf16.gmra.mxu0 %vm655_vm4, %v3899_v9  ;;  %v4975_v9 = vld [vmem:[%s5146_s11 + $0x80] sm:$0x1]  ;;  %v3312_v6 = vshll.u32 %v6165_v8, 16 }
 0x1f0   : > { %v1367_v48 = vpop.f32.mrf.mxu2  ;;  %4609 = vmatmul.msk.bf16.gmra.mxu1 %vm655_vm4, %v2561_v12  ;;  %v2475_v5 = vrot.slane %v4975_v9, 5  ;;  %v6167_v32 = vadd.f32 %v2306_v11, %v1687_v50  ;;  %v3808_v12 = vsel %vm5332_vm7, %v3806_v46, %v3807_v55  ;;  %v3876_v55 = vunpack.c.l.b16 %v3805_v59 }
 0x1f1   : > { %v1401_v16 = vadd.f32 %v1367_v48, %v1015_v28  ;;  %v3877_v28 = vunpack.c.l.b16 %v3808_v12  ;;  %v2539_v48 = vunpack.c.l.b16 %v2473_v38  ;;  %v3320_v9 = vshll.u32 %v4760_v19, 16 }
 0x1f2   : > { %v2476_v0 = vsel %vm5332_vm7, %v2474_v56, %v2475_v5  ;;  %v3811_v56 = vrot.slane %v6139_v22, 5  ;;  %v3330_v5 = vshrl.u32 %v6183_v24, 16  ;;  %v3814_v22 = vrot.slane %v6165_v8, 5 }
 0x1f3   : > { %v2540_v46 = vunpack.c.l.b16 %v2476_v0  ;;  %v3900_v10 = vpack.c.b16 %v3877_v28, %v3876_v55 }
 0x1f4   : > { %v2308_v30 = vpop.f32.mrf.mxu0  ;;  %v3813_v0 = vrot.slane %v3811_v56, 4  ;;  %v3332_v8 = vrot.slane %v3330_v5, 4 }
 0x1f5   : > { %v1654_v52 = vpop.f32.mrf.mxu3  ;;  %4722 = vmatmul.msk.bf16.gmra.mxu2 %vm655_vm4, %v4886_v7  ;;  %v2631_v11 = vpop.f32.mrf.mxu1  ;;  %v3314_v7 = vrot.slane %v3312_v6, 5  ;;  %v2562_v12 = vpack.c.b16 %v2540_v46, %v2539_v48  ;;  %v2479_v6 = vrot.slane %v4976_v43, 5  ;;  %v4977_v46 = vld [vmem:[%s5146_s11 + $0x8c] sm:$0x1] }
 0x1f6   : > { %v1688_v58 = vadd.f32 %v1654_v52, %v1401_v16  ;;  %v2710_v50 = vadd.f32 %v2631_v11, %v5624_v42  ;;  %v3317_v16 = vshrl.u32 %v4760_v19, 16  ;;  %v3326_v42 = vshll.u32 %v6183_v24, 16 }
 0x1f7   : > { %v3315_v38 = vsel %vm5158_vm3, %v3310_v23, %v3314_v7  ;;  %v2481_v48 = vrot.slane %v2479_v6, 4  ;;  %v2482_v23 = vrot.slane %v4977_v46, 5  ;;  %v6207_v7 = vld [vmem:[%s5146_s11 + $0x98] sm:$0x1] }
 0x1f8   : > { %v2916_v41 = vpop.f32.mrf.mxu2  ;;  %v6190_v35 = vadd.f32 %v2308_v30, %v1688_v58  ;;  %v4578_v30 = vld [vmem:[%s5146_s11 + $0x84] sm:$0xe]  ;;  %v3319_v58 = vrot.slane %v3317_v16, 4 }
 0x1f9   : > { %v2996_v20 = vadd.f32 %v2916_v41, %v2709_v53  ;;  %v3305_v53 = vsel %vm5158_vm3, %v3300_v39, %v6160_v40  ;;  %v6201_v40 = vrot.slane %v3326_v42, 5  ;;  %v4594_v41 = vrot.slane %v4578_v30, 9  ;;  %v4887_v16 = vld [vmem:[%s5146_s11 + $0x84] sm:$0xff] }
 0x1fa   : > { %4787 = vmatmul.msk.bf16.gmra.mxu3 %vm655_vm4, %v3502_v27  ;;  %v3322_v27 = vrot.slane %v3320_v9, 5  ;;  %v3481_v9 = vunpack.c.l.b16 %v3315_v38  ;;  %v3815_v42 = vsel %vm5332_vm7, %v3813_v0, %v3814_v22 }
 0x1fc   : > { %v3968_v59 = vpop.f32.mrf.mxu0  ;;  %v3323_v5 = vor.u32 %v3322_v27, %v3319_v58 }
 0x1fd   : > { %v3570_v52 = vpop.f32.mrf.mxu3  ;;  %v2634_v11 = vpop.f32.mrf.mxu1 }
 0x1fe   : > { %v3650_v19 = vadd.f32 %v3570_v52, %v2996_v20  ;;  %v2711_v55 = vadd.f32 %v2634_v11, %v5637_v15  ;;  %v3480_v20 = vunpack.c.l.b16 %v3305_v53  ;;  %v3812_v15 = vsel %vm5332_vm7, %v4820_v62, %v3811_v56 }
 0x1ff   : > { %4836 = vmatmul.msk.bf16.gmra.mxu0 %vm655_vm4, %v3900_v10  ;;  %v3333_v10 = vor.u32 %v3332_v8, %v6201_v40  ;;  %v2480_v53 = vsel %vm5332_vm7, %v4594_v41, %v2479_v6  ;;  %v2483_v56 = vsel %vm5332_vm7, %v2481_v48, %v2482_v23  ;;  %v3878_v43 = vunpack.c.l.b16 %v3812_v15  ;;  %v4805_v8 = vld [vmem:[%s5146_s11 + $0x90] sm:$0xe]  ;;  %v6235_v15 = vld [vmem:[%s5146_s11 + $0xa0] sm:$0xf] }
 0x200   : > { %v4048_v28 = vadd.f32 %v3968_v59, %v3650_v19  ;;  %v2918_v39 = vpop.f32.mrf.mxu2  ;;  %4610 = vmatmul.msk.bf16.gmra.mxu1 %vm655_vm4, %v2562_v12  ;;  %v3336_v59 = vshll.u32 %v6207_v7, 16  ;;  %v6219_v12 = vld [vmem:[%s6518_s2] ss:$0 sm:$0xff]  ;;  %v3503_v22 = vpack.c.b16 %v3481_v9, %v3480_v20  ;;  %v3879_v52 = vunpack.c.l.b16 %v3815_v42 }
 0x201   : > { %v2997_v4 = vadd.f32 %v2918_v39, %v2710_v50  ;;  %v3324_v30 = vrot.slane %v3323_v5, 4  ;;  %v3334_v58 = vrot.slane %v3333_v10, 4  ;;  %v2541_v27 = vunpack.c.l.b16 %v2480_v53 }
 0x202   : > { %v2542_v19 = vunpack.c.l.b16 %v2483_v56  ;;  %v3338_v6 = vrot.slane %v3336_v59, 5  ;;  %v3818_v39 = vrot.slane %v6183_v24, 5  ;;  %v4084_v41 = vadd.f32 %v6219_v12, %v4048_v28 }
 0x203   : > { %v3821_v9 = vrot.slane %v6207_v7, 5  ;;  %v3329_v24 = vsel %vm5158_vm3, %v3324_v30, %v6201_v40  ;;  %v4978_v7 = vld [vmem:[%s5146_s11 + $0x94] sm:$0xf]  ;;  %v3354_v30 = vshrl.u32 %v6235_v15, 16 }
 0x204   : > { %v3970_v50 = vpop.f32.mrf.mxu0  ;;  %v2563_v42 = vpack.c.b16 %v2542_v19, %v2541_v27  ;;  %v3820_v28 = vrot.slane %v3818_v39, 4  ;;  %v4116_v5 = vmax.f32 %v4084_v41, 0.0 }
 0x205   : > { %v3572_v62 = vpop.f32.mrf.mxu3  ;;  %4723 = vmatmul.msk.bf16.gmra.mxu2 %vm655_vm4, %v4887_v16  ;;  %v2636_v11 = vpop.f32.mrf.mxu1  ;;  %v4763_v16 = vld [vmem:[%s5146_s11 + $0x9c] sm:$0xf] }
 0x206   : > { %v3651_v38 = vadd.f32 %v3572_v62, %v2997_v4  ;;  %v2712_v0 = vadd.f32 %v2636_v11, %v5650_v13  ;;  %v3901_v13 = vpack.c.b16 %v3879_v52, %v3878_v43  ;;  %v4821_v4 = vrot.slane %v4805_v8, 9 }
 0x207   : > { %v3344_v53 = vshll.u32 %v4763_v16, 16  ;;  %v3350_v43 = vshll.u32 %v6235_v15, 16  ;;  %v3822_v41 = vsel %vm5332_vm7, %v3820_v28, %v3821_v9 }
 0x208   : > { %v4049_v48 = vadd.f32 %v3970_v50, %v3651_v38  ;;  %v2921_v46 = vpop.f32.mrf.mxu2  ;;  %v3341_v50 = vshrl.u32 %v4763_v16, 16  ;;  %v4579_v38 = vld [vmem:[%s5146_s11 + $0x90] sm:$0xe]  ;;  %v3819_v19 = vsel %vm5332_vm7, %v4821_v4, %v3818_v39  ;;  %v3356_v4 = vrot.slane %v3354_v30, 4 }
 0x209   : > { %v2998_v23 = vadd.f32 %v2921_v46, %v2711_v55  ;;  %v3339_v55 = vsel %vm5158_vm3, %v3334_v58, %v3338_v6  ;;  %v3482_v58 = vunpack.c.l.b16 %v3329_v24  ;;  %v4595_v16 = vrot.slane %v4579_v38, 9 }
 0x20a   : > { %v4085_v20 = vadd.f32 %v6219_v12, %v4049_v48  ;;  %4788 = vmatmul.msk.bf16.gmra.mxu3 %vm655_vm4, %v3503_v22  ;;  %v2486_v22 = vrot.slane %v4978_v7, 5  ;;  %v3483_v27 = vunpack.c.l.b16 %v3339_v55  ;;  %v3346_v48 = vrot.slane %v3344_v53, 5 }
 0x20b   : > { %v6259_v39 = vrot.slane %v3350_v43, 5  ;;  %v3881_v9 = vunpack.c.l.b16 %v3822_v41  ;;  %v6271_v41 = vld [vmem:[%s5146_s11 + $0xac] sm:$0xf] }
 0x20c   : > { %v4117_v10 = vmax.f32 %v4085_v20, 0.0  ;;  %v3973_v59 = vpop.f32.mrf.mxu0  ;;  %v2488_v20 = vrot.slane %v2486_v22, 4 }
 0x20d   : > { %v3575_v56 = vpop.f32.mrf.mxu3  ;;  %v2639_v62 = vpop.f32.mrf.mxu1  ;;  %v3357_v30 = vor.u32 %v3356_v4, %v6259_v39 }
 0x20e   : > { %v4148_v52 = vadd.f32 %v4117_v10, %v4116_v5  ;;  %v3652_v11 = vadd.f32 %v3575_v56, %v2998_v23  ;;  %v2713_v40 = vadd.f32 %v2639_v62, %v5663_v57  ;;  %v3343_v57 = vrot.slane %v3341_v50, 4  ;;  %v4888_v23 = vld [vmem:[%s5146_s11 + $0x90] sm:$0xff]  ;;  %v6257_v5 = vld [vmem:[%s5146_s11 + $0xa4] sm:$0x1] }
 0x20f   : > { %4837 = vmatmul.msk.bf16.gmra.mxu0 %vm655_vm4, %v3901_v13  ;;  %v4979_v13 = vld [vmem:[%s5146_s11 + $0x98] sm:$0x1]  ;;  %v3880_v56 = vunpack.c.l.b16 %v3819_v19  ;;  %v2487_v50 = vsel %vm5332_vm7, %v4595_v16, %v2486_v22  ;;  %v3360_v7 = vshll.u32 %v6257_v5, 16 }
 0x210   : > { %v4050_v6 = vadd.f32 %v3973_v59, %v3652_v11  ;;  %v2923_v8 = vpop.f32.mrf.mxu2  ;;  %4611 = vmatmul.msk.bf16.gmra.mxu1 %vm655_vm4, %v2563_v42  ;;  %v2489_v24 = vrot.slane %v4979_v13, 5  ;;  %v3504_v59 = vpack.c.b16 %v3483_v27, %v3482_v58  ;;  %v3347_v62 = vor.u32 %v3346_v48, %v3343_v57 }
 0x211   : > { %v2999_v46 = vadd.f32 %v2923_v8, %v2712_v0  ;;  %v2543_v19 = vunpack.c.l.b16 %v2487_v50  ;;  %v4766_v8 = vld [vmem:[%s5146_s11 + $0xa8] sm:$0xf]  ;;  %v3358_v48 = vrot.slane %v3357_v30, 4  ;;  %v3374_v13 = vshll.u32 %v6271_v41, 16 }
 0x212   : > { %v4086_v55 = vadd.f32 %v6219_v12, %v4050_v6  ;;  %v2490_v53 = vsel %vm5332_vm7, %v2488_v20, %v2489_v24  ;;  %v3365_v16 = vshrl.u32 %v4766_v8, 16  ;;  %v3368_v20 = vshll.u32 %v4766_v8, 16 }
 0x213   : > { %v2544_v6 = vunpack.c.l.b16 %v2490_v53  ;;  %v3378_v24 = vshrl.u32 %v6271_v41, 16 }
 0x214   : > { %v4118_v10 = vmax.f32 %v4086_v55, 0.0  ;;  %v3975_v42 = vpop.f32.mrf.mxu0  ;;  %v3370_v30 = vrot.slane %v3368_v20, 5 }
 0x215   : > { %v3577_v28 = vpop.f32.mrf.mxu3  ;;  %4724 = vmatmul.msk.bf16.gmra.mxu2 %vm655_vm4, %v4888_v23  ;;  %v2641_v0 = vpop.f32.mrf.mxu1  ;;  %v3348_v23 = vrot.slane %v3347_v62, 4 }
 0x216   : > { %v4149_v43 = vadd.f32 %v4148_v52, %v4118_v10  ;;  %v3653_v11 = vadd.f32 %v3577_v28, %v2999_v46  ;;  %v2714_v38 = vadd.f32 %v2641_v0, %v5676_v54  ;;  %v3902_v52 = vpack.c.b16 %v3881_v9, %v3880_v56  ;;  %v4806_v54 = vld [vmem:[%s5146_s11 + $0x9c] sm:$0xe]  ;;  %v4980_v9 = vld [vmem:[%s5146_s11 + $0xa0] sm:$0xf] }
 0x217   : > { %v3362_v46 = vrot.slane %v3360_v7, 5  ;;  %v3825_v10 = vrot.slane %v6235_v15, 5  ;;  %v4822_v56 = vrot.slane %v4806_v54, 9  ;;  %v2493_v0 = vrot.slane %v4980_v9, 5 }
 0x218   : > { %v4051_v58 = vadd.f32 %v3975_v42, %v3653_v11  ;;  %v2926_v27 = vpop.f32.mrf.mxu2  ;;  %v4580_v11 = vld [vmem:[%s5146_s11 + $0x9c] sm:$0xe]  ;;  %v3367_v15 = vrot.slane %v3365_v16, 4 }
 0x219   : > { %v3000_v22 = vadd.f32 %v2926_v27, %v2713_v40  ;;  %v2564_v40 = vpack.c.b16 %v2544_v6, %v2543_v19  ;;  %v3363_v7 = vsel %vm5158_vm3, %v3358_v48, %v3362_v46  ;;  %v3828_v6 = vrot.slane %v6257_v5, 5  ;;  %v4981_v48 = vld [vmem:[%s5146_s11 + $0xa4] sm:$0x1] }
 0x21a   : > { %v4087_v57 = vadd.f32 %v6219_v12, %v4051_v58  ;;  %4789 = vmatmul.msk.bf16.gmra.mxu3 %vm655_vm4, %v3504_v59  ;;  %v3353_v59 = vsel %vm5158_vm3, %v3348_v23, %v6259_v39  ;;  %v6288_v58 = vrot.slane %v3374_v13, 5  ;;  %v3380_v39 = vrot.slane %v3378_v24, 4 }
 0x21b   : > { %v4596_v23 = vrot.slane %v4580_v11, 9  ;;  %v3484_v54 = vunpack.c.l.b16 %v3353_v59  ;;  %v3485_v16 = vunpack.c.l.b16 %v3363_v7  ;;  %v3826_v20 = vsel %vm5332_vm7, %v4822_v56, %v3825_v10 }
 0x21c   : > { %v4119_v55 = vmax.f32 %v4087_v57, 0.0  ;;  %v3978_v4 = vpop.f32.mrf.mxu0  ;;  %v2495_v57 = vrot.slane %v2493_v0, 4  ;;  %v3371_v13 = vor.u32 %v3370_v30, %v3367_v15  ;;  %v3381_v24 = vor.u32 %v3380_v39, %v6288_v58 }
 0x21d   : > { %v3580_v42 = vpop.f32.mrf.mxu3  ;;  %v2644_v28 = vpop.f32.mrf.mxu1  ;;  %v2494_v59 = vsel %vm5332_vm7, %v4596_v23, %v2493_v0  ;;  %v3832_v23 = vrot.slane %v6271_v41, 5 }
 0x21e   : > { %v4150_v50 = vadd.f32 %v4149_v43, %v4119_v55  ;;  %v3654_v53 = vadd.f32 %v3580_v42, %v3000_v22  ;;  %v2715_v62 = vadd.f32 %v2644_v28, %v5689_v33  ;;  %v3827_v43 = vrot.slane %v3825_v10, 4  ;;  %v6293_v33 = vld [vmem:[%s5146_s11 + $0xb0] sm:$0x1]  ;;  %v4889_v22 = vld [vmem:[%s5146_s11 + $0x9c] sm:$0xff] }
 0x21f   : > { %4838 = vmatmul.msk.bf16.gmra.mxu0 %vm655_vm4, %v3902_v52  ;;  %v2496_v52 = vrot.slane %v4981_v48, 5  ;;  %v3384_v5 = vshll.u32 %v6293_v33, 16  ;;  %v3882_v42 = vunpack.c.l.b16 %v3826_v20  ;;  %v3372_v15 = vrot.slane %v3371_v13, 4 }
 0x220   : > { %v4052_v27 = vadd.f32 %v3978_v4, %v3654_v53  ;;  %v2928_v19 = vpop.f32.mrf.mxu2  ;;  %4612 = vmatmul.msk.bf16.gmra.mxu1 %vm655_vm4, %v2564_v40  ;;  %v3505_v53 = vpack.c.b16 %v3485_v16, %v3484_v54  ;;  %v3382_v30 = vrot.slane %v3381_v24, 4 }
 0x221   : > { %v3001_v8 = vadd.f32 %v2928_v19, %v2714_v38  ;;  %v3829_v38 = vsel %vm5332_vm7, %v3827_v43, %v3828_v6  ;;  %v2497_v10 = vsel %vm5332_vm7, %v2495_v57, %v2496_v52  ;;  %v3386_v39 = vrot.slane %v3384_v5, 5  ;;  %v4769_v57 = vld [vmem:[%s5146_s11 + $0xb4] sm:$0xf] }
 0x222   : > { %v4088_v46 = vadd.f32 %v6219_v12, %v4052_v27  ;;  %v3883_v11 = vunpack.c.l.b16 %v3829_v38  ;;  %v2545_v43 = vunpack.c.l.b16 %v2494_v59  ;;  %v2546_v6 = vunpack.c.l.b16 %v2497_v10  ;;  %v4581_v59 = vld [vmem:[%s5146_s11 + $0xa8] sm:$0xe] }
 0x223   : > { %v3377_v48 = vsel %vm5158_vm3, %v3372_v15, %v6288_v58  ;;  %v3387_v52 = vsel %vm5158_vm3, %v3382_v30, %v3386_v39  ;;  %v3389_v16 = vshrl.u32 %v4769_v57, 16  ;;  %v3392_v20 = vshll.u32 %v4769_v57, 16 }
 0x224   : > { %v4120_v55 = vmax.f32 %v4088_v46, 0.0  ;;  %v3980_v4 = vpop.f32.mrf.mxu0  ;;  %v2565_v54 = vpack.c.b16 %v2546_v6, %v2545_v43  ;;  %v3834_v5 = vrot.slane %v3832_v23, 4  ;;  %v4983_v43 = vld [vmem:[%s5146_s11 + $0xb0] sm:$0x1] }
 0x225   : > { %v3582_v40 = vpop.f32.mrf.mxu3  ;;  %4725 = vmatmul.msk.bf16.gmra.mxu2 %vm655_vm4, %v4889_v22  ;;  %v2646_v28 = vpop.f32.mrf.mxu1  ;;  %v4807_v22 = vld [vmem:[%s5146_s11 + $0xa8] sm:$0xe]  ;;  %v3391_v30 = vrot.slane %v3389_v16, 4  ;;  %v2503_v6 = vrot.slane %v4983_v43, 5 }
 0x226   : > { %v4151_v56 = vadd.f32 %v4150_v50, %v4120_v55  ;;  %v3655_v9 = vadd.f32 %v3582_v40, %v3001_v8  ;;  %v2716_v7 = vadd.f32 %v2646_v28, %v5702_v31  ;;  %v6316_v8 = vld [vmem:[%s5146_s11 + $0xb8] sm:$0xf]  ;;  %v3903_v31 = vpack.c.b16 %v3883_v11, %v3882_v42 }
 0x227   : > { %v4823_v46 = vrot.slane %v4807_v22, 9  ;;  %v3835_v55 = vrot.slane %v6293_v33, 5  ;;  %v3398_v40 = vshll.u32 %v6316_v8, 16  ;;  %v3402_v10 = vshrl.u32 %v6316_v8, 16 }
 0x228   : > { %v4053_v27 = vadd.f32 %v3980_v4, %v3655_v9  ;;  %v2931_v19 = vpop.f32.mrf.mxu2  ;;  %v4982_v4 = vld [vmem:[%s5146_s11 + $0xac] sm:$0xf]  ;;  %v3486_v9 = vunpack.c.l.b16 %v3377_v48 }
 0x229   : > { %v3002_v0 = vadd.f32 %v2931_v19, %v2715_v62  ;;  %v2500_v38 = vrot.slane %v4982_v4, 5  ;;  %v3833_v33 = vsel %vm5332_vm7, %v4823_v46, %v3832_v23  ;;  %v6338_v57 = vrot.slane %v3398_v40, 5  ;;  %v6341_v46 = vld [vmem:[%s5146_s11 + $0xbc] sm:$0x1] }
 0x22a   : > { %v4089_v50 = vadd.f32 %v6219_v12, %v4053_v27  ;;  %4790 = vmatmul.msk.bf16.gmra.mxu3 %vm655_vm4, %v3505_v53  ;;  %v3487_v53 = vunpack.c.l.b16 %v3387_v52  ;;  %v4597_v27 = vrot.slane %v4581_v59, 9  ;;  %v3884_v52 = vunpack.c.l.b16 %v3833_v33  ;;  %v4808_v33 = vld [vmem:[%s5146_s11 + $0xb4] sm:$0xe] }
 0x22b   : > { %v2502_v19 = vrot.slane %v2500_v38, 4  ;;  %v3408_v4 = vshll.u32 %v6341_v46, 16 }
 0x22c   : > { %v4121_v62 = vmax.f32 %v4089_v50, 0.0  ;;  %v3983_v41 = vpop.f32.mrf.mxu0  ;;  %v3404_v50 = vrot.slane %v3402_v10, 4  ;;  %v3506_v23 = vpack.c.b16 %v3487_v53, %v3486_v9  ;;  %v4772_v9 = vld [vmem:[%s5146_s11 + $0xc0] sm:$0xf] }
 0x22d   : > { %v3585_v13 = vpop.f32.mrf.mxu3  ;;  %v2649_v24 = vpop.f32.mrf.mxu1  ;;  %v2504_v16 = vsel %vm5332_vm7, %v2502_v19, %v2503_v6 }
 0x22e   : > { %v4152_v58 = vadd.f32 %v4151_v56, %v4121_v62  ;;  %v3656_v42 = vadd.f32 %v3585_v13, %v3002_v0  ;;  %v2717_v28 = vadd.f32 %v2649_v24, %v5715_v1  ;;  %v3394_v56 = vrot.slane %v3392_v20, 5  ;;  %v4890_v1 = vld [vmem:[%s5146_s11 + $0xa8] sm:$0xff] }
 0x22f   : > { %4839 = vmatmul.msk.bf16.gmra.mxu0 %vm655_vm4, %v3903_v31  ;;  %v3836_v0 = vsel %vm5332_vm7, %v3834_v5, %v3835_v55  ;;  %v3405_v55 = vor.u32 %v3404_v50, %v6338_v57  ;;  %v2548_v10 = vunpack.c.l.b16 %v2504_v16  ;;  %v4824_v50 = vrot.slane %v4808_v33, 9 }
 0x230   : > { %v4054_v11 = vadd.f32 %v3983_v41, %v3656_v42  ;;  %v2933_v15 = vpop.f32.mrf.mxu2  ;;  %4613 = vmatmul.msk.bf16.gmra.mxu1 %vm655_vm4, %v2565_v54  ;;  %v3885_v62 = vunpack.c.l.b16 %v3836_v0  ;;  %v2501_v54 = vsel %vm5332_vm7, %v4597_v27, %v2500_v38  ;;  %v3395_v20 = vor.u32 %v3394_v56, %v3391_v30  ;;  %v6353_v38 = vld [vmem:[%s5146_s11 + $0xc4] sm:$0xf] }
 0x231   : > { %v3003_v39 = vadd.f32 %v2933_v15, %v2716_v7  ;;  %v2547_v59 = vunpack.c.l.b16 %v2501_v54  ;;  %v3410_v30 = vrot.slane %v3408_v4, 5  ;;  %v3839_v56 = vrot.slane %v6316_v8, 5 }
 0x232   : > { %v4090_v22 = vadd.f32 %v6219_v12, %v4054_v11  ;;  %v3396_v15 = vrot.slane %v3395_v20, 4  ;;  %v3422_v43 = vshll.u32 %v6353_v38, 16  ;;  %v3426_v6 = vshrl.u32 %v6353_v38, 16 }
 0x233   : > { %v3842_v16 = vrot.slane %v6341_v46, 5  ;;  %v3841_v4 = vrot.slane %v3839_v56, 4 }
 0x234   : > { %v4122_v31 = vmax.f32 %v4090_v22, 0.0  ;;  %v3985_v48 = vpop.f32.mrf.mxu0 }
 0x235   : > { %v3587_v7 = vpop.f32.mrf.mxu3  ;;  %4726 = vmatmul.msk.bf16.gmra.mxu2 %vm655_vm4, %v4890_v1  ;;  %v2651_v41 = vpop.f32.mrf.mxu1  ;;  %v3416_v1 = vshll.u32 %v4772_v9, 16 }
 0x236   : > { %v4153_v13 = vadd.f32 %v4152_v58, %v4122_v31  ;;  %v3657_v24 = vadd.f32 %v3587_v7, %v3003_v39  ;;  %v2718_v5 = vadd.f32 %v2651_v41, %v5729_v25  ;;  %v3904_v58 = vpack.c.b16 %v3885_v62, %v3884_v52  ;;  %v4984_v31 = vld [vmem:[%s5146_s11 + $0xb8] sm:$0xf]  ;;  %v6529_v7 = vld [vmem:[#allocation5_spill] sm:$0xff]  ;;  %v4582_v41 = vld [vmem:[%s5146_s11 + $0xb4] sm:$0xe] }
 0x237   : > { %v3406_v25 = vrot.slane %v3405_v55, 4  ;;  %v3413_v39 = vshrl.u32 %v4772_v9, 16  ;;  %v3401_v62 = vsel %vm5158_vm3, %v3396_v15, %v6338_v57 }
 0x238   : > { %v4055_v40 = vadd.f32 %v3985_v48, %v3657_v24  ;;  %v2936_v42 = vpop.f32.mrf.mxu2  ;;  %v2507_v48 = vrot.slane %v4984_v31, 5  ;;  %v3418_v24 = vrot.slane %v3416_v1, 5  ;;  %v3488_v15 = vunpack.c.l.b16 %v3401_v62 }
 0x239   : > { %v3004_v53 = vadd.f32 %v2936_v42, %v2717_v28  ;;  %v2566_v28 = vpack.c.b16 %v2548_v10, %v2547_v59  ;;  %v3411_v54 = vsel %vm5158_vm3, %v3406_v25, %v3410_v30  ;;  %v3415_v20 = vrot.slane %v3413_v39, 4  ;;  %v4891_v59 = vld [vmem:[%s5146_s11 + $0xb4] sm:$0xff]  ;;  %v6376_v25 = vld [vmem:[%s5146_s11 + $0xc8] sm:$0x1] }
 0x23a   : > { %v4091_v11 = vadd.f32 %v6219_v12, %v4055_v40  ;;  %4791 = vmatmul.msk.bf16.gmra.mxu3 %vm655_vm4, %v3506_v23  ;;  %v3424_v40 = vrot.slane %v3422_v43, 5  ;;  %v3428_v42 = vrot.slane %v3426_v6, 4  ;;  %v4598_v10 = vrot.slane %v4582_v41, 9 }
 0x23b   : > { %v2509_v9 = vrot.slane %v2507_v48, 4  ;;  %v3489_v46 = vunpack.c.l.b16 %v3411_v54  ;;  %v3419_v33 = vor.u32 %v3418_v24, %v3415_v20  ;;  %v3840_v1 = vsel %vm5332_vm7, %v4824_v50, %v3839_v56 }
 0x23c   : > { %v4123_v27 = vmax.f32 %v4091_v11, 0.0  ;;  %v3988_v19 = vpop.f32.mrf.mxu0  ;;  %v3429_v6 = vor.u32 %v3428_v42, %v3424_v40 }
 0x23d   : > { %v3590_v22 = vpop.f32.mrf.mxu3  ;;  %v2654_v0 = vpop.f32.mrf.mxu1  ;;  %v3507_v56 = vpack.c.b16 %v3489_v46, %v3488_v15  ;;  %v3420_v62 = vrot.slane %v3419_v33, 4  ;;  %v4986_v46 = vld [vmem:[%s5146_s11 + $0xc4] sm:$0xf] }
 0x23e   : > { %v4154_v23 = vadd.f32 %v4153_v13, %v4123_v27  ;;  %v3658_v52 = vadd.f32 %v3590_v22, %v3004_v53  ;;  %v2719_v8 = vadd.f32 %v2654_v0, %v6529_v7  ;;  %v4985_v53 = vld [vmem:[%s5146_s11 + $0xbc] sm:$0x1]  ;;  %v3432_v22 = vshll.u32 %v6376_v25, 16 }
 0x23f   : > { %4840 = vmatmul.msk.bf16.gmra.mxu0 %vm655_vm4, %v3904_v58  ;;  %v2510_v11 = vrot.slane %v4985_v53, 5  ;;  %v3430_v24 = vrot.slane %v3429_v6, 4  ;;  %v2514_v33 = vrot.slane %v4986_v46, 5 }
 0x240   : > { %v4056_v13 = vadd.f32 %v3988_v19, %v3658_v52  ;;  %v2938_v55 = vpop.f32.mrf.mxu2  ;;  %4614 = vmatmul.msk.bf16.gmra.mxu1 %vm655_vm4, %v2566_v28  ;;  %v2508_v28 = vsel %vm5332_vm7, %v4598_v10, %v2507_v48  ;;  %v3886_v52 = vunpack.c.l.b16 %v3840_v1  ;;  %v3846_v10 = vrot.slane %v6353_v38, 5 }
 0x241   : > { %v3005_v57 = vadd.f32 %v2938_v55, %v2718_v5  ;;  %v3843_v5 = vsel %vm5332_vm7, %v3841_v4, %v3842_v16  ;;  %v2511_v43 = vsel %vm5332_vm7, %v2509_v9, %v2510_v11  ;;  %v2549_v48 = vunpack.c.l.b16 %v2508_v28  ;;  %v4809_v55 = vld [vmem:[%s5146_s11 + $0xc0] sm:$0xe]  ;;  %v4775_v9 = vld [vmem:[%s5146_s11 + $0xcc] sm:$0xf] }
 0x242   : > { %v4092_v58 = vadd.f32 %v6219_v12, %v4056_v13  ;;  %v3887_v7 = vunpack.c.l.b16 %v3843_v5  ;;  %v2550_v16 = vunpack.c.l.b16 %v2511_v43  ;;  %v3434_v13 = vrot.slane %v3432_v22, 5  ;;  %v4583_v5 = vld [vmem:[%s5146_s11 + $0xc0] sm:$0xe] }
 0x243   : > { %v4825_v15 = vrot.slane %v4809_v55, 9  ;;  %v3437_v38 = vshrl.u32 %v4775_v9, 16 }
 0x244   : > { %v4124_v30 = vmax.f32 %v4092_v58, 0.0  ;;  %v3990_v39 = vpop.f32.mrf.mxu0  ;;  %v3905_v4 = vpack.c.b16 %v3887_v7, %v3886_v52  ;;  %v3435_v58 = vsel %vm5158_vm3, %v3430_v24, %v3434_v13  ;;  %v4599_v52 = vrot.slane %v4583_v5, 9 }
 0x245   : > { %v3592_v27 = vpop.f32.mrf.mxu3  ;;  %4727 = vmatmul.msk.bf16.gmra.mxu2 %vm655_vm4, %v4891_v59  ;;  %v2656_v19 = vpop.f32.mrf.mxu1  ;;  %v2567_v59 = vpack.c.b16 %v2550_v16, %v2549_v48  ;;  %v3491_v22 = vunpack.c.l.b16 %v3435_v58  ;;  %v2516_v7 = vrot.slane %v2514_v33, 4  ;;  %v3847_v48 = vsel %vm5332_vm7, %v4825_v15, %v3846_v10 }
 0x246   : > { %v4155_v0 = vadd.f32 %v4154_v23, %v4124_v30  ;;  %v3659_v31 = vadd.f32 %v3592_v27, %v3005_v57  ;;  %v2720_v50 = vadd.f32 %v2656_v19, %v5776_v47  ;;  %v3425_v47 = vsel %vm5158_vm3, %v3420_v62, %v3424_v40  ;;  %v4987_v62 = vld [vmem:[%s5146_s11 + $0xc8] sm:$0x1] }
 0x247   : > { %v3490_v1 = vunpack.c.l.b16 %v3425_v47  ;;  %v3440_v27 = vshll.u32 %v4775_v9, 16  ;;  %v3439_v16 = vrot.slane %v3437_v38, 4 }
 0x248   : > { %v4057_v41 = vadd.f32 %v3990_v39, %v3659_v31  ;;  %v2941_v54 = vpop.f32.mrf.mxu2  ;;  %v3849_v31 = vrot.slane %v6376_v25, 5 }
 0x249   : > { %v3006_v20 = vadd.f32 %v2941_v54, %v2719_v8  ;;  %v6397_v8 = vld [vmem:[%s5146_s11 + $0xd0] sm:$0xf]  ;;  %v3508_v47 = vpack.c.b16 %v3491_v22, %v3490_v1 }
 0x24a   : > { %v4093_v23 = vadd.f32 %v6219_v12, %v4057_v41  ;;  %4792 = vmatmul.msk.bf16.gmra.mxu3 %vm655_vm4, %v3507_v56  ;;  %v3446_v19 = vshll.u32 %v6397_v8, 16  ;;  %v3450_v28 = vshrl.u32 %v6397_v8, 16  ;;  %v4892_v56 = vld [vmem:[%s5146_s11 + $0xc0] sm:$0xff]  ;;  %v2517_v41 = vrot.slane %v4987_v62, 5  ;;  %v4810_v62 = vld [vmem:[%s5146_s11 + $0xcc] sm:$0xe] }
 0x24c   : > { %v4125_v42 = vmax.f32 %v4093_v23, 0.0  ;;  %v3993_v57 = vpop.f32.mrf.mxu0  ;;  %v3448_v24 = vrot.slane %v3446_v19, 5  ;;  %v3452_v13 = vrot.slane %v3450_v28, 4 }
 0x24d   : > { %v3595_v53 = vpop.f32.mrf.mxu3  ;;  %v2659_v11 = vpop.f32.mrf.mxu1 }
 0x24e   : > { %v4156_v30 = vadd.f32 %v4155_v0, %v4125_v42  ;;  %v3660_v39 = vadd.f32 %v3595_v53, %v3006_v20  ;;  %v2721_v40 = vadd.f32 %v2659_v11, %v5787_v51  ;;  %v3848_v0 = vrot.slane %v3846_v10, 4  ;;  %v6530_v11 = vld [vmem:[#allocation6_spill] sm:$0xff] }
 0x24f   : > { %4841 = vmatmul.msk.bf16.gmra.mxu0 %vm655_vm4, %v3905_v4  ;;  %v3442_v20 = vrot.slane %v3440_v27, 5  ;;  %v3888_v53 = vunpack.c.l.b16 %v3847_v48 }
 0x250   : > { %v4058_v43 = vadd.f32 %v3993_v57, %v3660_v39  ;;  %v2943_v6 = vpop.f32.mrf.mxu2  ;;  %4615 = vmatmul.msk.bf16.gmra.mxu1 %vm655_vm4, %v2567_v59  ;;  %v3850_v25 = vsel %vm5332_vm7, %v3848_v0, %v3849_v31  ;;  %v2515_v57 = vsel %vm5332_vm7, %v4599_v52, %v2514_v33  ;;  %v2518_v59 = vsel %vm5332_vm7, %v2516_v7, %v2517_v41 }
 0x251   : > { %v3007_v51 = vadd.f32 %v2943_v6, %v2720_v50  ;;  %v4777_v50 = vld [vmem:[%s5146_s11 + $0xd4] sm:$0x1]  ;;  %v3889_v15 = vunpack.c.l.b16 %v3850_v25  ;;  %v3443_v46 = vor.u32 %v3442_v20, %v3439_v16  ;;  %v3453_v39 = vor.u32 %v3452_v13, %v3448_v24 }
 0x252   : > { %v4094_v54 = vadd.f32 %v6219_v12, %v4058_v43  ;;  %v3456_v5 = vshll.u32 %v4777_v50, 16  ;;  %v2551_v1 = vunpack.c.l.b16 %v2515_v57  ;;  %v2552_v19 = vunpack.c.l.b16 %v2518_v59 }
 0x253   : > { %v3906_v43 = vpack.c.b16 %v3889_v15, %v3888_v53  ;;  %v3454_v6 = vrot.slane %v3453_v39, 4 }
 0x254   : > { %v4126_v23 = vmax.f32 %v4094_v54, 0.0  ;;  %v3995_v55 = vpop.f32.mrf.mxu0  ;;  %v3458_v22 = vrot.slane %v3456_v5, 5 }
 0x255   : > { %v3597_v4 = vpop.f32.mrf.mxu3  ;;  %4728 = vmatmul.msk.bf16.gmra.mxu2 %vm655_vm4, %v4892_v56  ;;  %v2661_v42 = vpop.f32.mrf.mxu1  ;;  %v3853_v56 = vrot.slane %v6397_v8, 5  ;;  %v4826_v8 = vrot.slane %v4810_v62, 9 }
 0x256   : > { %v4157_v10 = vadd.f32 %v4156_v30, %v4126_v23  ;;  %v3661_v9 = vadd.f32 %v3597_v4, %v3007_v51  ;;  %v2722_v58 = vadd.f32 %v2661_v42, %v6530_v11  ;;  %v3444_v30 = vrot.slane %v3443_v46, 4  ;;  %v4893_v4 = vld [vmem:[%s5146_s11 + $0xcc] sm:$0xff]  ;;  %s4198_s11 = sshll.u32 %s162_s10, 4  ;;  %s4199_s11 = int_to_ptr.vmem [resolvable:$true] %s4198_s11 }
 0x257   : > { %v2568_v51 = vpack.c.b16 %v2552_v19, %v2551_v1  ;;  %v3459_v16 = vsel %vm5158_vm3, %v3454_v6, %v3458_v22  ;;  %v3855_v23 = vrot.slane %v3853_v56, 4 }
 0x258   : > { %v4059_v38 = vadd.f32 %v3995_v55, %v3661_v9  ;;  %v2946_v27 = vpop.f32.mrf.mxu2  ;;  %v3449_v48 = vsel %vm5158_vm3, %v3444_v30, %v3448_v24  ;;  %v3856_v55 = vrot.slane %v4777_v50, 5  ;;  %v3493_v42 = vunpack.c.l.b16 %v3459_v16 }
 0x259   : > { %v3008_v28 = vadd.f32 %v2946_v27, %v2721_v40  ;;  %v3854_v24 = vsel %vm5332_vm7, %v4826_v8, %v3853_v56 }
 0x25a   : > { %v4095_v33 = vadd.f32 %v6219_v12, %v4059_v38  ;;  %4793 = vmatmul.msk.bf16.gmra.mxu3 %vm655_vm4, %v3508_v47  ;;  %v3857_v36 = vsel %vm5332_vm7, %v3855_v23, %v3856_v55  ;;  %v3890_v15 = vunpack.c.l.b16 %v3854_v24 }
 0x25b   : > { %v3891_v46 = vunpack.c.l.b16 %v3857_v36 }
 0x25c   : > { %v4127_v0 = vmax.f32 %v4095_v33, 0.0  ;;  %v3998_v31 = vpop.f32.mrf.mxu0 }
 0x25d   : > { %v3600_v52 = vpop.f32.mrf.mxu3  ;;  %v2664_v7 = vpop.f32.mrf.mxu1  ;;  %v3907_v18 = vpack.c.b16 %v3891_v46, %v3890_v15 }
 0x25e   : > { %v4158_v41 = vadd.f32 %v4157_v10, %v4127_v0  ;;  %v3662_v54 = vadd.f32 %v3600_v52, %v3008_v28  ;;  %v2723_v40 = vadd.f32 %v2664_v7, %v5823_v29  ;;  %v3492_v29 = vunpack.c.l.b16 %v3449_v48 }
 0x25f   : > { %4842 = vmatmul.msk.bf16.gmra.mxu0 %vm655_vm4, %v3906_v43 }
 0x260   : > { %v4060_v20 = vadd.f32 %v3998_v31, %v3662_v54  ;;  %v2948_v13 = vpop.f32.mrf.mxu2  ;;  %4616 = vmatmul.msk.bf16.gmra.mxu1 %vm655_vm4, %v2568_v51  ;;  %v3509_v11 = vpack.c.b16 %v3493_v42, %v3492_v29 }
 0x261   : > { %v3009_v25 = vadd.f32 %v2948_v13, %v2722_v58 }
 0x262   : > { %v4096_v47 = vadd.f32 %v6219_v12, %v4060_v20 }
 0x264   : > { %v4128_v57 = vmax.f32 %v4096_v47, 0.0  ;;  %v4000_v59 = vpop.f32.mrf.mxu0 }
 0x265   : > { %v3602_v10 = vpop.f32.mrf.mxu3  ;;  %4729 = vmatmul.msk.bf16.gmra.mxu2 %vm655_vm4, %v4893_v4  ;;  %v2666_v9 = vpop.f32.mrf.mxu1 }
 0x266   : > { %v4159_v53 = vadd.f32 %v4158_v41, %v4128_v57  ;;  %v3663_v50 = vadd.f32 %v3602_v10, %v3009_v25  ;;  %v2724_v58 = vadd.f32 %v2666_v9, %v5847_v37 }
 0x268   : > { %v4061_v39 = vadd.f32 %v4000_v59, %v3663_v50  ;;  %v2951_v5 = vpop.f32.mrf.mxu2 }
 0x269   : > { %v3010_v38 = vadd.f32 %v2951_v5, %v2723_v40 }
 0x26a   : > { %v4097_v27 = vadd.f32 %v6219_v12, %v4061_v39  ;;  %4794 = vmatmul.msk.bf16.gmra.mxu3 %vm655_vm4, %v3509_v11 }
 0x26c   : > { %v4129_v1 = vmax.f32 %v4097_v27, 0.0  ;;  %v4003_v19 = vpop.f32.mrf.mxu0 }
 0x26d   : > { %v3605_v28 = vpop.f32.mrf.mxu3  ;;  %v2669_v33 = vpop.f32.mrf.mxu1 }
 0x26e   : > { %v4160_v43 = vadd.f32 %v4159_v53, %v4129_v1  ;;  %v3664_v30 = vadd.f32 %v3605_v28, %v3010_v38  ;;  %v2725_v6 = vadd.f32 %v2669_v33, %v5866_v34 }
 0x26f   : > { %4843 = vmatmul.msk.bf16.gmra.mxu0 %vm655_vm4, %v3907_v18 }
 0x270   : > { %v4062_v37 = vadd.f32 %v4003_v19, %v3664_v30  ;;  %v2953_v22 = vpop.f32.mrf.mxu2 }
 0x271   : > { %v3011_v0 = vadd.f32 %v2953_v22, %v2724_v58 }
 0x272   : > { %v4098_v31 = vadd.f32 %v6219_v12, %v4062_v37 }
 0x274   : > { %v4130_v51 = vmax.f32 %v4098_v31, 0.0  ;;  %v4005_v56 = vpop.f32.mrf.mxu0 }
 0x275   : > { %v3607_v52 = vpop.f32.mrf.mxu3  ;;  %v2671_v7 = vpop.f32.mrf.mxu1 }
 0x276   : > { %v4161_v62 = vadd.f32 %v4160_v43, %v4130_v51  ;;  %v3665_v41 = vadd.f32 %v3607_v52, %v3011_v0  ;;  %v2726_v54 = vadd.f32 %v2671_v7, %v5890_v3 }
 0x278   : > { %v4063_v40 = vadd.f32 %v4005_v56, %v3665_v41  ;;  %v2956_v48 = vpop.f32.mrf.mxu2 }
 0x279   : > { %v3012_v16 = vadd.f32 %v2956_v48, %v2725_v6 }
 0x27a   : > { %v4099_v34 = vadd.f32 %v6219_v12, %v4063_v40 }
 0x27c   : > { %v4131_v20 = vmax.f32 %v4099_v34, 0.0  ;;  %v4008_v13 = vpop.f32.mrf.mxu0 }
 0x27d   : > { %v3610_v8 = vpop.f32.mrf.mxu3  ;;  %v2674_v23 = vpop.f32.mrf.mxu1 }
 0x27e   : > { %v4162_v55 = vadd.f32 %v4161_v62, %v4131_v20  ;;  %v3666_v25 = vadd.f32 %v3610_v8, %v3012_v16  ;;  %v2727_v4 = vadd.f32 %v2674_v23, %v5909_v2 }
 0x280   : > { %v4064_v47 = vadd.f32 %v4008_v13, %v3666_v25  ;;  %v2958_v29 = vpop.f32.mrf.mxu2 }
 0x281   : > { %v3013_v42 = vadd.f32 %v2958_v29, %v2726_v54 }
 0x282   : > { %v4100_v57 = vadd.f32 %v6219_v12, %v4064_v47 }
 0x284   : > { %v4132_v59 = vmax.f32 %v4100_v57, 0.0  ;;  %v4010_v3 = vpop.f32.mrf.mxu0 }
 0x285   : > { %v3612_v24 = vpop.f32.mrf.mxu3  ;;  %v2676_v36 = vpop.f32.mrf.mxu1 }
 0x286   : > { %v4163_v10 = vadd.f32 %v4162_v55, %v4132_v59  ;;  %v3667_v9 = vadd.f32 %v3612_v24, %v3013_v42  ;;  %v2728_v53 = vadd.f32 %v2676_v36, %v5933_v26 }
 0x288   : > { %v4065_v50 = vadd.f32 %v4010_v3, %v3667_v9  ;;  %v2961_v11 = vpop.f32.mrf.mxu2 }
 0x289   : > { %v3014_v58 = vadd.f32 %v2961_v11, %v2727_v4 }
 0x28a   : > { %v4101_v15 = vadd.f32 %v6219_v12, %v4065_v50 }
 0x28c   : > { %v4133_v46 = vmax.f32 %v4101_v15, 0.0  ;;  %v4013_v2 = vpop.f32.mrf.mxu0 }
 0x28d   : > { %v3615_v39 = vpop.f32.mrf.mxu3  ;;  %v2679_v5 = vpop.f32.mrf.mxu1 }
 0x28e   : > { %v4164_v38 = vadd.f32 %v4163_v10, %v4133_v46  ;;  %v3668_v27 = vadd.f32 %v3615_v39, %v3014_v58  ;;  %v2729_v18 = vadd.f32 %v2679_v5, %v5952_v60 }
 0x290   : > { %v4066_v1 = vadd.f32 %v4013_v2, %v3668_v27  ;;  %v2963_v19 = vpop.f32.mrf.mxu2 }
 0x291   : > { %v3015_v28 = vadd.f32 %v2963_v19, %v2728_v53  ;;  %v6466_v19 = vld [vmem:[%s6518_s2] ss:$0 sm:$0xff] }
 0x292   : > { %v4102_v33 = vadd.f32 %v6219_v12, %v4066_v1 }
 0x294   : > { %v4134_v43 = vmax.f32 %v4102_v33, 0.0  ;;  %v4015_v26 = vpop.f32.mrf.mxu0 }
 0x295   : > { %v3617_v30 = vpop.f32.mrf.mxu3  ;;  %v2681_v6 = vpop.f32.mrf.mxu1 }
 0x296   : > { %v4165_v37 = vadd.f32 %v4164_v38, %v4134_v43  ;;  %v3669_v22 = vadd.f32 %v3617_v30, %v3015_v28  ;;  %v2730_v48 = vadd.f32 %v2681_v6, %v5976_v14 }
 0x298   : > { %v4067_v0 = vadd.f32 %v4015_v26, %v3669_v22  ;;  %v2966_v31 = vpop.f32.mrf.mxu2  ;;  %v6531_v22 = vld [vmem:[#allocation7_spill] sm:$0xff] }
 0x299   : > { %v3016_v51 = vadd.f32 %v2966_v31, %v2729_v18 }
 0x29a   : > { %v4103_v56 = vadd.f32 %v6219_v12, %v4067_v0 }
 0x29c   : > { %v4135_v52 = vmax.f32 %v4103_v56, 0.0  ;;  %v4018_v7 = vpop.f32.mrf.mxu0 }
 0x29d   : > { %v3620_v62 = vpop.f32.mrf.mxu3  ;;  %v2684_v60 = vpop.f32.mrf.mxu1 }
 0x29e   : > { %v4166_v41 = vadd.f32 %v4165_v37, %v4135_v52  ;;  %v3670_v54 = vadd.f32 %v3620_v62, %v3016_v51  ;;  %v2731_v29 = vadd.f32 %v2684_v60, %v5995_v21 }
 0x2a0   : > { %v4068_v40 = vadd.f32 %v4018_v7, %v3670_v54  ;;  %v2968_v16 = vpop.f32.mrf.mxu2 }
 0x2a1   : > { %v3017_v20 = vadd.f32 %v2968_v16, %v2730_v48 }
 0x2a2   : > { %v4104_v34 = vadd.f32 %v6219_v12, %v4068_v40 }
 0x2a4   : > { %v4136_v13 = vmax.f32 %v4104_v34, 0.0  ;;  %v4020_v8 = vpop.f32.mrf.mxu0 }
 0x2a5   : > { %v3622_v23 = vpop.f32.mrf.mxu3  ;;  %v2686_v55 = vpop.f32.mrf.mxu1 }
 0x2a6   : > { %v4167_v25 = vadd.f32 %v4166_v41, %v4136_v13  ;;  %v3671_v4 = vadd.f32 %v3622_v23, %v3017_v20  ;;  %v2732_v50 = vadd.f32 %v2686_v55, %v6019_v49 }
 0x2a8   : > { %v4069_v47 = vadd.f32 %v4020_v8, %v3671_v4  ;;  %v2971_v42 = vpop.f32.mrf.mxu2 }
 0x2a9   : > { %v3018_v59 = vadd.f32 %v2971_v42, %v2731_v29 }
 0x2aa   : > { %v4105_v57 = vadd.f32 %v6219_v12, %v4069_v47 }
 0x2ac   : > { %v4137_v3 = vmax.f32 %v4105_v57, 0.0  ;;  %v4023_v24 = vpop.f32.mrf.mxu0 }
 0x2ad   : > { %v3625_v14 = vpop.f32.mrf.mxu3  ;;  %v2689_v36 = vpop.f32.mrf.mxu1 }
 0x2ae   : > { %v4168_v10 = vadd.f32 %v4167_v25, %v4137_v3  ;;  %v3672_v9 = vadd.f32 %v3625_v14, %v3018_v59  ;;  %v2733_v18 = vadd.f32 %v2689_v36, %v6038_v17 }
 0x2b0   : > { %v4070_v53 = vadd.f32 %v4023_v24, %v3672_v9  ;;  %v2973_v11 = vpop.f32.mrf.mxu2 }
 0x2b1   : > { %v3019_v15 = vadd.f32 %v2973_v11, %v2732_v50 }
 0x2b2   : > { %v4106_v58 = vadd.f32 %v6219_v12, %v4070_v53 }
 0x2b4   : > { %v4138_v46 = vmax.f32 %v4106_v58, 0.0  ;;  %v4025_v2 = vpop.f32.mrf.mxu0 }
 0x2b5   : > { %v3627_v21 = vpop.f32.mrf.mxu3  ;;  %v2691_v39 = vpop.f32.mrf.mxu1 }
 0x2b6   : > { %v4169_v5 = vadd.f32 %v4168_v10, %v4138_v46  ;;  %v3673_v38 = vadd.f32 %v3627_v21, %v3019_v15  ;;  %v2734_v0 = vadd.f32 %v2691_v39, %v6531_v22 }
 0x2b8   : > { %v4071_v27 = vadd.f32 %v4025_v2, %v3673_v38  ;;  %v2976_v1 = vpop.f32.mrf.mxu2 }
 0x2b9   : > { %v3020_v28 = vadd.f32 %v2976_v1, %v2733_v18 }
 0x2ba   : > { %v4107_v49 = vadd.f32 %v6466_v19, %v4071_v27 }
 0x2bc   : > { %v4139_v12 = vmax.f32 %v4107_v49, 0.0  ;;  %v4028_v33 = vpop.f32.mrf.mxu0 }
 0x2bd   : > { %v3630_v43 = vpop.f32.mrf.mxu3  ;;  %v2694_v26 = vpop.f32.mrf.mxu1 }
 0x2be   : > { %v4170_v30 = vadd.f32 %v4169_v5, %v4139_v12  ;;  %v3674_v6 = vadd.f32 %v3630_v43, %v3020_v28  ;;  %v2735_v40 = vadd.f32 %v2694_v26, %v6079_v44 }
 0x2c0   : > { %v4072_v37 = vadd.f32 %v4028_v33, %v3674_v6  ;;  %v2978_v31 = vpop.f32.mrf.mxu2 }
 0x2c1   : > { %v3021_v51 = vadd.f32 %v2978_v31, %v2734_v0 }
 0x2c2   : > { %v4108_v17 = vadd.f32 %v6466_v19, %v4072_v37 }
 0x2c4   : > { %v4140_v56 = vmax.f32 %v4108_v17, 0.0  ;;  %v4030_v52 = vpop.f32.mrf.mxu0 }
 0x2c5   : > { %v3632_v7 = vpop.f32.mrf.mxu3  ;;  %v2696_v62 = vpop.f32.mrf.mxu1 }
 0x2c6   : > { %v4171_v60 = vadd.f32 %v4170_v30, %v4140_v56  ;;  %v3675_v41 = vadd.f32 %v3632_v7, %v3021_v51  ;;  %v2736_v47 = vadd.f32 %v2696_v62, %v6102_v45 }
 0x2c8   : > { %v4073_v54 = vadd.f32 %v4030_v52, %v3675_v41  ;;  %v2981_v48 = vpop.f32.mrf.mxu2 }
 0x2c9   : > { %v3022_v34 = vadd.f32 %v2981_v48, %v2735_v40 }
 0x2ca   : > { %v4109_v16 = vadd.f32 %v6466_v19, %v4073_v54 }
 0x2cc   : > { %v4141_v20 = vmax.f32 %v4109_v16, 0.0  ;;  %v4033_v13 = vpop.f32.mrf.mxu0 }
 0x2cd   : > { %v3635_v8 = vpop.f32.mrf.mxu3  ;;  %v2699_v25 = vpop.f32.mrf.mxu1 }
 0x2ce   : > { %v4172_v23 = vadd.f32 %v4171_v60, %v4141_v20  ;;  %v3676_v55 = vadd.f32 %v3635_v8, %v3022_v34  ;;  %v2737_v10 = vadd.f32 %v2699_v25, %v6120_v63 }
 0x2d0   : > { %v4074_v4 = vadd.f32 %v4033_v13, %v3676_v55  ;;  %v2983_v29 = vpop.f32.mrf.mxu2 }
 0x2d1   : > { %v3023_v57 = vadd.f32 %v2983_v29, %v2736_v47 }
 0x2d2   : > { %v4110_v42 = vadd.f32 %v6466_v19, %v4074_v4 }
 0x2d4   : > { %v4142_v59 = vmax.f32 %v4110_v42, 0.0  ;;  %v4035_v3 = vpop.f32.mrf.mxu0 }
 0x2d5   : > { %v3637_v44 = vpop.f32.mrf.mxu3  ;;  %v2701_v53 = vpop.f32.mrf.mxu1 }
 0x2d6   : > { %v4173_v24 = vadd.f32 %v4172_v23, %v4142_v59  ;;  %v3677_v14 = vadd.f32 %v3637_v44, %v3023_v57  ;;  %v2738_v39 = vadd.f32 %v2701_v53, %v6143_v61 }
 0x2d8   : > { %v4075_v36 = vadd.f32 %v4035_v3, %v3677_v14  ;;  %v2986_v9 = vpop.f32.mrf.mxu2 }
 0x2d9   : > { %v3024_v11 = vadd.f32 %v2986_v9, %v2737_v10 }
 0x2da   : > { %v4111_v50 = vadd.f32 %v6466_v19, %v4075_v36 }
 0x2dc   : > { %v4143_v58 = vmax.f32 %v4111_v50, 0.0  ;;  %v4038_v15 = vpop.f32.mrf.mxu0 }
 0x2dd   : > { %v3640_v45 = vpop.f32.mrf.mxu3  ;;  %v2704_v18 = vpop.f32.mrf.mxu1 }
 0x2de   : > { %v4174_v46 = vadd.f32 %v4173_v24, %v4143_v58  ;;  %v3678_v2 = vadd.f32 %v3640_v45, %v3024_v11  ;;  %v2739_v43 = vadd.f32 %v2704_v18, %v6167_v32 }
 0x2e0   : > { %v4076_v21 = vadd.f32 %v4038_v15, %v3678_v2  ;;  %v2988_v5 = vpop.f32.mrf.mxu2 }
 0x2e1   : > { %v3025_v27 = vadd.f32 %v2988_v5, %v2738_v39 }
 0x2e2   : > { %v4112_v38 = vadd.f32 %v6466_v19, %v4076_v21 }
 0x2e4   : > { %v4144_v1 = vmax.f32 %v4112_v38, 0.0  ;;  %v4040_v63 = vpop.f32.mrf.mxu0 }
 0x2e5   : > { %v3642_v49 = vpop.f32.mrf.mxu3  ;;  %v2706_v22 = vpop.f32.mrf.mxu1 }
 0x2e6   : > { %v4175_v28 = vadd.f32 %v4174_v46, %v4144_v1  ;;  %v3679_v12 = vadd.f32 %v3642_v49, %v3025_v27  ;;  %v2740_v56 = vadd.f32 %v2706_v22, %v6190_v35 }
 0x2e8   : > { %v4077_v33 = vadd.f32 %v4040_v63, %v3679_v12  ;;  %v2991_v26 = vpop.f32.mrf.mxu2 }
 0x2e9   : > { %v3026_v6 = vadd.f32 %v2991_v26, %v2739_v43 }
 0x2ea   : > { %v4113_v30 = vadd.f32 %v6466_v19, %v4077_v33 }
 0x2ec   : > { %v4145_v37 = vmax.f32 %v4113_v30, 0.0  ;;  %v4043_v61 = vpop.f32.mrf.mxu0 }
 0x2ed   : > { %v3645_v0 = vpop.f32.mrf.mxu3 }
 0x2ee   : > { %v4176_v31 = vadd.f32 %v4175_v28, %v4145_v37  ;;  %v3680_v17 = vadd.f32 %v3645_v0, %v3026_v6 }
 0x2f0   : > { %v4078_v51 = vadd.f32 %v4043_v61, %v3680_v17  ;;  %v2993_v52 = vpop.f32.mrf.mxu2 }
 0x2f1   : > { %v3027_v62 = vadd.f32 %v2993_v52, %v2740_v56 }
 0x2f2   : > { %v4114_v7 = vadd.f32 %v6466_v19, %v4078_v51 }
 0x2f4   : > { %v4146_v32 = vmax.f32 %v4114_v7, 0.0  ;;  %v4045_v40 = vpop.f32.mrf.mxu0 }
 0x2f5   : > { %v3647_v60 = vpop.f32.mrf.mxu3 }
 0x2f6   : > { %v4177_v41 = vadd.f32 %v4176_v31, %v4146_v32  ;;  %v3681_v54 = vadd.f32 %v3647_v60, %v3027_v62 }
 0x2f8   : > { %v4079_v48 = vadd.f32 %v4045_v40, %v3681_v54 }
 0x2fa   : > { %v4115_v16 = vadd.f32 %v6466_v19, %v4079_v48 }
 0x2fc   : > { %v4147_v34 = vmax.f32 %v4115_v16, 0.0 }
 0x2fe   : > { %v4178_v20 = vadd.f32 %v4177_v41, %v4147_v34 }
 0x300   : > { %v4179_v13 = vrot.slane %v4178_v20, 4 }
 0x302   : > { %v4180_v8 = vadd.f32 %v4179_v13, %v4178_v20 }
 0x304   : > { %v4181_v23 = vrot.slane %v4180_v8, 2 }
 0x306   : > { %v4182_v35 = vadd.f32 %v4181_v23, %v4180_v8 }
 0x308   : > { %v4183_v55 = vrot.slane %v4182_v35, 1 }
 0x30a   : > { %v4184_v25 = vadd.f32 %v4183_v55, %v4182_v35 }
 0x30c   : > { %v4185_v4 = vmul.f32 0.00390625, %v4184_v25 }
 0x30e   : > { %4186 = vst [vmem:[%s162_s10] sm:$0x1] %v4185_v4 }
 0x30f   : > { %5016 = shalt.err (!%p5013_p3)
}
 0x310   : > { %4898 = dma.vmem_to_hbm [thread:$0]  (%p5111_p5), %s4199_s11, 16, %s4201_s17, %s4188_s19  }
 0x311 PF: > { %p4904_p4 = scmp.ge.s32.totalorder %s5051_s15, 2  ;;  %s4212_s29 = sand.u32 1, %s5039_s12  }
 0x312   : > { %s4213_s30 = scalar_lea.sflag [#allocation3], %s4212_s29 }
 0x313   : > { %p4901_p7 = pnand %p4904_p4, %p5115_p6 }
 0x315   : > { %p4902_p8 = pneg %p4901_p7 }
 0x317   : > { %5034 = dma.done.wait (%p4902_p8), %s4213_s30, 16  }
 0x318   : > { %5036 = vsyncadd (%p4902_p8), %s4213_s30, 4294967280  ;;  %p13_p9 = scmp.ge.s32.totalorder %s5098_s18, 4   ;;  %s6532_s12 = smov %s5043_s13 }
 0x319   : > { %s6533_s13 = smov %s5047_s14  ;;  %s6534_s14 = smov %s5109_s21 }
 0x31a   : > { %s6535_s15 = smov %s5098_s18  ;;  %15 = sbr.rel (!%p13_p9) target bundleno = 3 (0x3), region = 77 }
 0x31f   :  { %4218 = vsyncpa [#allocation3], 1 }
 0x320   :  { %4220 = vsyncpa [#allocation3 + $0x1], 1 }

</bundles_post_ra>
